<compile_context>
chip_gen: v5e
topology: v5e:2x2
jax: 0.10.0
libtpu: 0.0.40
codegen_flags: <defaults>
</compile_context>

<pallas_src>
import functools
import math

import jax
import jax.numpy as jnp
from jax import lax
from jax.experimental import pallas as pl
from jax.experimental.pallas import tpu as pltpu

# ----------------------------- hyper-parameters ------------------------------
N_MELS = 16
D_MODEL = 32
NUM_LAYERS = 2
NUM_HEADS = 4
D_HEAD = D_MODEL // NUM_HEADS
CONV_KERNEL = 7                 # depthwise conv kernel (odd, padding='same')
FF_EXPANSION = 4
RESIDUAL_FACTOR = 0.5
LN_EPS = 6.1e-5                 # LayerNorm eps used by the reference model
BN_EPS = 6.1e-5                 # BatchNorm1d eps
NEG_INF = -1e30                 # additive mask bias for float32 attention logits


# ------------------------------ spec helpers ---------------------------------
def _vmem():
    return pl.BlockSpec(memory_space=pltpu.MemorySpace.VMEM)


# --------------------------- conv1 Pallas kernel ------------------------------
def _matmul_relu_kernel(p_ref, w_ref, b_ref, o_ref):
    o_ref[...] = jnp.maximum(
        jnp.dot(p_ref[...], w_ref[...], preferred_element_type=jnp.float32)
        + b_ref[...], 0.0)


def matmul_relu(p, w, b):
    return pl.pallas_call(
        _matmul_relu_kernel,
        out_shape=jax.ShapeDtypeStruct((p.shape[0], w.shape[1]), jnp.float32),
        in_specs=[_vmem()] * 3,
        out_specs=_vmem(),
    )(p, w, b)


# --------------------------- fused encoder kernel ----------------------------
def _encoder_kernel(p2_ref, pos_ref, mb_ref,
                    sub_w2_ref, sub_b2_ref, proj_wf_ref, proj_b_ref, *refs,
                    num_layers, seq, d_model, num_heads, d_head,
                    kernel_size, nf, patch_w, eps):
    (ff1_lng, ff1_lnb, ff1_w1, ff1_b1, ff1_w2, ff1_b2,
     at_lng, at_lnb, at_wqkv, at_bqkv, at_wpos, at_u, at_v, at_wout, at_bout,
     cv_lng, cv_lnb, cv_pw1w, cv_pw1b, cv_dww, cv_dwb,
     cv_bns, cv_bnb, cv_pw2w, cv_pw2b,
     ff2_lng, ff2_lnb, ff2_w1, ff2_b1, ff2_w2, ff2_b2,
     lnf_g, lnf_b, o_ref) = refs

    S, D, H, dh, K = seq, d_model, num_heads, d_head, kernel_size
    pad = (K - 1) // 2
    inv_sqrt_d = 1.0 / math.sqrt(D)
    f32 = jnp.float32

    def _ln(val, g, b):
        mu = jnp.mean(val, axis=-1, keepdims=True)
        var = jnp.mean(jnp.square(val - mu), axis=-1, keepdims=True)
        return (val - mu) * lax.rsqrt(var + eps) * g + b

    def _ffn(val, g, b, w1, b1, w2, b2):
        # LayerNorm -> Linear -> SiLU -> Linear (Dropout = identity in eval)
        hid = jnp.dot(_ln(val, g, b), w1, preferred_element_type=f32) + b1
        hid = hid * jax.nn.sigmoid(hid)
        return jnp.dot(hid, w2, preferred_element_type=f32) + b2

    def _dot_nt(a, b):  # a @ b.T, contracting the last dim of both operands
        return lax.dot_general(a, b, (((1,), (1,)), ((), ())),
                               preferred_element_type=f32)

    # ---- front-end prologue: conv2 (as matmul over im2col patches) + ReLU
    #      + flatten over the subsampled-frequency axis + input projection.
    p2 = p2_ref[0]                                   # (S, nf * patch_w)
    w2 = sub_w2_ref[...]
    b2 = sub_b2_ref[...]
    acc0 = jnp.zeros((S, D), f32)
    for f in range(nf):
        pf = p2[:, f * patch_w:(f + 1) * patch_w]    # (S, 9*D) lane slice
        hf = jnp.maximum(jnp.dot(pf, w2, preferred_element_type=f32) + b2, 0.0)
        acc0 = acc0 + jnp.dot(hf, proj_wf_ref[f], preferred_element_type=f32)
    x = acc0 + proj_b_ref[...]                       # (S, D)

    pos = pos_ref[...]                               # (S, D)
    mb = mb_ref[0]                                   # (S, S) additive mask bias

    # ---- all conformer blocks, unrolled (weights resident, x stays in vregs)
    for l in range(num_layers):
        # feed-forward module 1 (half-step residual)
        x = x + RESIDUAL_FACTOR * _ffn(x, ff1_lng[l], ff1_lnb[l],
                                       ff1_w1[l], ff1_b1[l], ff1_w2[l], ff1_b2[l])

        # relative multi-head self-attention
        xn = _ln(x, at_lng[l], at_lnb[l])
        qkv = jnp.dot(xn, at_wqkv[l], preferred_element_type=f32) + at_bqkv[l]   # (S, 3D)
        pp = jnp.dot(pos, at_wpos[l], preferred_element_type=f32)                # (S, D) pos path only
        q = qkv[:, 0 * D:1 * D]
        k = qkv[:, 1 * D:2 * D]
        v = qkv[:, 2 * D:3 * D]
        q_u = (q + at_u[l]) * inv_sqrt_d             # u/v pre-flattened to (1, D)
        q_v = (q + at_v[l]) * inv_sqrt_d             # 1/sqrt(d_model) folded into q

        ac_h, bd_h = [], []
        for h in range(H):
            lo, hi = h * dh, (h + 1) * dh
            ac_h.append(_dot_nt(q_u[:, lo:hi], k[:, lo:hi]))    # content (S, S)
            bd_h.append(_dot_nt(q_v[:, lo:hi], pp[:, lo:hi]))   # position (S, S)
        ac = jnp.stack(ac_h, axis=0)                 # (H, S, S) value (no scratch)
        bd = jnp.stack(bd_h, axis=0)                 # (H, S, S)

        # Transformer-XL relative shift, vectorized on values.  Each output row
        # r is one static slice of [bd_row_r | 0 | bd_row_{r+1}] which exactly
        # reproduces the pad/reshape/slice wraparound artifact of the reference.
        bd_up = jnp.concatenate(
            [bd[:, 1:, :], jnp.zeros((H, 1, S), f32)], axis=1)
        wide = jnp.concatenate(
            [bd, jnp.zeros((H, S, 1), f32), bd_up], axis=2)      # (H, S, 2S+1)
        shifted = jnp.concatenate(
            [wide[:, r:r + 1, S - 1 - r:2 * S - 1 - r] for r in range(S)],
            axis=1)                                              # (H, S, S)

        logits = ac + shifted + mb
        logits = logits - jnp.max(logits, axis=-1, keepdims=True)
        e = jnp.exp(logits)
        attn = e / jnp.sum(e, axis=-1, keepdims=True)            # exact divide

        ctx = jnp.concatenate(
            [jnp.dot(attn[h], v[:, h * dh:(h + 1) * dh],
                     preferred_element_type=f32) for h in range(H)], axis=-1)
        x = x + jnp.dot(ctx, at_wout[l], preferred_element_type=f32) + at_bout[l]

        # convolution module
        cn = _ln(x, cv_lng[l], cv_lnb[l])
        y = jnp.dot(cn, cv_pw1w[l], preferred_element_type=f32) + cv_pw1b[l]     # (S, 2D)
        glu = y[:, :D] * jax.nn.sigmoid(y[:, D:])                                # GLU (S, D)
        zpad = jnp.zeros((pad, D), f32)
        padded = jnp.concatenate([zpad, glu, zpad], axis=0)      # (S+K-1, D) value
        dw = cv_dww[l]                                           # (K, D)
        acc = jnp.zeros((S, D), f32) + cv_dwb[l]
        for kk in range(K):                                      # depthwise taps on values
            acc = acc + padded[kk:kk + S, :] * dw[kk:kk + 1, :]
        ybn = acc * cv_bns[l] + cv_bnb[l]                        # BatchNorm1d (eval, folded)
        ybn = ybn * jax.nn.sigmoid(ybn)                          # SiLU
        x = x + jnp.dot(ybn, cv_pw2w[l], preferred_element_type=f32) + cv_pw2b[l]

        # feed-forward module 2 + per-block final LayerNorm
        x = x + RESIDUAL_FACTOR * _ffn(x, ff2_lng[l], ff2_lnb[l],
                                       ff2_w1[l], ff2_b1[l], ff2_w2[l], ff2_b2[l])
        x = _ln(x, lnf_g[l], lnf_b[l])

    o_ref[0] = x


# -------------------------------- XLA glue ------------------------------------
def im2col_nhwc(x, ksize=3, stride=2):
    # x: (B, H, W, C) -> patches (B, oh, ow, ksize*ksize*C); feature order (di, dj, c)
    B, Hh, Ww, C = x.shape
    oh = (Hh - ksize) // stride + 1
    ow = (Ww - ksize) // stride + 1
    cols = []
    for di in range(ksize):
        for dj in range(ksize):
            cols.append(x[:, di:di + stride * oh:stride, dj:dj + stride * ow:stride, :])
    return jnp.concatenate(cols, axis=-1), oh, ow


def positional_encoding(seq_len, d_model):
    pos = jnp.arange(seq_len, dtype=jnp.float32)[:, None]
    idx = jnp.arange(0, d_model, 2, dtype=jnp.float32)
    inv_freq = 1.0 / (10000.0 ** (idx / d_model))
    enc = jnp.zeros((seq_len, d_model), jnp.float32)
    enc = enc.at[:, 0::2].set(jnp.sin(pos * inv_freq))
    enc = enc.at[:, 1::2].set(jnp.cos(pos * inv_freq))
    return enc


def conformer_forward(params, x, mask):
    # x: (B, T, n_mels)   mask: (B, T, T) bool (True = masked)
    B, T, F = x.shape

    # Conv2dSubsampling conv1 (k=3, s=2) + ReLU as a single Pallas matmul.
    # TODO(synk): conv1 stays a separate pallas_call because the second conv's
    # im2col needs conv1's (post-ReLU) output; the patch extraction is XLA glue.
    p1, oh1, ow1 = im2col_nhwc(x[:, :, :, None])
    h1 = matmul_relu(p1.reshape(B * oh1 * ow1, -1), params['sub_w1'], params['sub_b1'])
    h1 = h1.reshape(B, oh1, ow1, D_MODEL)

    # conv2 patches in natural layout (no HBM transpose); per-frequency blocks
    # are lane slices inside the fused encoder kernel.
    p2, oh2, ow2 = im2col_nhwc(h1)
    S = oh2
    patch_w = p2.shape[-1]                       # 9 * D_MODEL
    p2 = p2.reshape(B, S, ow2 * patch_w)

    # subsample the mask exactly like the PyTorch encoder, fold into additive bias
    m = mask[:, :-2:2, :-2:2]
    m = m[:, :-2:2, :-2:2]
    assert m.shape[1] == S
    mask_bias = jnp.where(m, NEG_INF, 0.0).astype(jnp.float32)

    pos = positional_encoding(S, D_MODEL)        # shared by all layers / batches
    stacked = params['stacked']

    def _zero_map(nd):
        return lambda b: (0,) * nd

    weight_arrays = (params['sub_w2'], params['sub_b2'],
                     params['proj_wf'], params['proj_b'], *stacked)
    weight_specs = [pl.BlockSpec(w.shape, _zero_map(w.ndim)) for w in weight_arrays]

    kernel = functools.partial(
        _encoder_kernel, num_layers=NUM_LAYERS, seq=S, d_model=D_MODEL,
        num_heads=NUM_HEADS, d_head=D_HEAD, kernel_size=CONV_KERNEL,
        nf=ow2, patch_w=patch_w, eps=LN_EPS)

    # TODO(synk): nn.Dropout layers are identity here (inference-mode forward).
    return pl.pallas_call(
        kernel,
        out_shape=jax.ShapeDtypeStruct((B, S, D_MODEL), jnp.float32),
        grid=(B,),
        in_specs=[pl.BlockSpec((1, S, ow2 * patch_w), lambda b: (b, 0, 0)),  # conv2 patches
                  pl.BlockSpec((S, D_MODEL), lambda b: (0, 0)),              # pos encoding
                  pl.BlockSpec((1, S, S), lambda b: (b, 0, 0))]              # mask bias
                 + weight_specs,
        out_specs=pl.BlockSpec((1, S, D_MODEL), lambda b: (b, 0, 0)),
        compiler_params=pltpu.CompilerParams(
            dimension_semantics=("parallel",)),
    )(p2, pos, mask_bias, *weight_arrays)


# ------------------------------ parameter init --------------------------------
def _linear_init(key, fan_in, fan_out):
    kw, kb = jax.random.split(key)
    bound = 1.0 / math.sqrt(fan_in)
    w = jax.random.uniform(kw, (fan_in, fan_out), jnp.float32, -bound, bound)
    b = jax.random.uniform(kb, (1, fan_out), jnp.float32, -bound, bound)
    return w, b


_PARAM_ORDER = (
    'ff1_lng', 'ff1_lnb', 'ff1_w1', 'ff1_b1', 'ff1_w2', 'ff1_b2',
    'at_lng', 'at_lnb', 'at_wqkv', 'at_bqkv', 'at_wpos', 'at_u', 'at_v',
    'at_wout', 'at_bout',
    'cv_lng', 'cv_lnb', 'cv_pw1w', 'cv_pw1b', 'cv_dww', 'cv_dwb',
    'cv_bns', 'cv_bnb', 'cv_pw2w', 'cv_pw2b',
    'ff2_lng', 'ff2_lnb', 'ff2_w1', 'ff2_b1', 'ff2_w2', 'ff2_b2',
    'lnf_g', 'lnf_b',
)


def init_params(key):
    keys = iter(jax.random.split(key, 8 + 16 * NUM_LAYERS))
    ones = jnp.ones((1, D_MODEL), jnp.float32)
    zeros = jnp.zeros((1, D_MODEL), jnp.float32)

    p = {}
    p['sub_w1'], p['sub_b1'] = _linear_init(next(keys), 1 * 3 * 3, D_MODEL)
    p['sub_w2'], p['sub_b2'] = _linear_init(next(keys), D_MODEL * 3 * 3, D_MODEL)
    f_sub = ((N_MELS - 1) // 2 - 1) // 2
    proj_w, p['proj_b'] = _linear_init(next(keys), D_MODEL * f_sub, D_MODEL)
    # reorder rows (channel-major flatten -> per-frequency blocks) for the fused kernel
    p['proj_wf'] = proj_w.reshape(D_MODEL, f_sub, D_MODEL).transpose(1, 0, 2)

    def ffn_leaves(prefix, d):
        d[prefix + '_lng'] = ones
        d[prefix + '_lnb'] = zeros
        d[prefix + '_w1'], d[prefix + '_b1'] = _linear_init(
            next(keys), D_MODEL, D_MODEL * FF_EXPANSION)
        d[prefix + '_w2'], d[prefix + '_b2'] = _linear_init(
            next(keys), D_MODEL * FF_EXPANSION, D_MODEL)

    layer_dicts = []
    for _ in range(NUM_LAYERS):
        d = {}
        ffn_leaves('ff1', d)

        d['at_lng'] = ones
        d['at_lnb'] = zeros
        wq, bq = _linear_init(next(keys), D_MODEL, D_MODEL)
        wk, bk = _linear_init(next(keys), D_MODEL, D_MODEL)
        wv, bv = _linear_init(next(keys), D_MODEL, D_MODEL)
        wpos, _ = _linear_init(next(keys), D_MODEL, D_MODEL)        # bias=False
        d['at_wqkv'] = jnp.concatenate([wq, wk, wv], axis=1)         # (D, 3D)
        d['at_bqkv'] = jnp.concatenate([bq, bk, bv], axis=1)         # (1, 3D)
        d['at_wpos'] = wpos                                          # (D, D)
        b_uv = math.sqrt(6.0 / (NUM_HEADS + D_HEAD))
        d['at_u'] = jax.random.uniform(next(keys), (NUM_HEADS, D_HEAD), jnp.float32,
                                       -b_uv, b_uv).reshape(1, D_MODEL)
        d['at_v'] = jax.random.uniform(next(keys), (NUM_HEADS, D_HEAD), jnp.float32,
                                       -b_uv, b_uv).reshape(1, D_MODEL)
        d['at_wout'], d['at_bout'] = _linear_init(next(keys), D_MODEL, D_MODEL)

        d['cv_lng'] = ones
        d['cv_lnb'] = zeros
        d['cv_pw1w'], d['cv_pw1b'] = _linear_init(next(keys), D_MODEL, 2 * D_MODEL)
        dwb = 1.0 / math.sqrt(CONV_KERNEL)
        kdw, kdb = jax.random.split(next(keys))
        d['cv_dww'] = jax.random.uniform(kdw, (CONV_KERNEL, D_MODEL), jnp.float32,
                                         -dwb, dwb)
        d['cv_dwb'] = jax.random.uniform(kdb, (1, D_MODEL), jnp.float32, -dwb, dwb)
        # TODO(synk): BatchNorm1d is folded with its (fresh) running stats -> eval mode.
        bn_gamma, bn_beta = ones, zeros
        bn_mean, bn_var = zeros, ones
        d['cv_bns'] = bn_gamma / jnp.sqrt(bn_var + BN_EPS)
        d['cv_bnb'] = bn_beta - bn_mean * d['cv_bns']
        d['cv_pw2w'], d['cv_pw2b'] = _linear_init(next(keys), D_MODEL, D_MODEL)

        ffn_leaves('ff2', d)
        d['lnf_g'] = ones
        d['lnf_b'] = zeros
        layer_dicts.append(d)

    p['stacked'] = [jnp.stack([ld[name] for ld in layer_dicts], axis=0)
                    for name in _PARAM_ORDER]
    return p


# ----------------------------------- main -------------------------------------
if __name__ == "__main__":
    key = jax.random.PRNGKey(0)
    k_x, k_p = jax.random.split(key)

    B, T = 2, 34                                        # subsampled seq len = 7
    x = jax.random.normal(k_x, (B, T, N_MELS), jnp.float32)
    mask = jnp.zeros((B, T, T), dtype=bool)             # no padding -> nothing masked
    params = init_params(k_p)

    out = jax.jit(conformer_forward)(params, x, mask)
    out = jax.block_until_ready(out)
    assert out.shape == (B, 7, D_MODEL), out.shape
    assert bool(jnp.all(jnp.isfinite(out)))
    print("KERNEL_OK")
</pallas_src>

<mosaic_0001>
module attributes {stable_mosaic.version = 11 : i64} {
  func.func @_matmul_relu_kernel(%arg0: memref<224x9xf32, #tpu.memory_space<vmem>>, %arg1: memref<9x32xf32, #tpu.memory_space<vmem>>, %arg2: memref<1x32xf32, #tpu.memory_space<vmem>>, %arg3: memref<224x32xf32, #tpu.memory_space<vmem>>) attributes {dimension_semantics = [], scalar_prefetch = 0 : i64, scratch_operands = 0 : i64, tpu.core_type = #tpu.core_type<tc>} {
    %c0 = arith.constant 0 : index
    %c0_0 = arith.constant 0 : index
    %0 = vector.load %arg0[%c0, %c0_0] : memref<224x9xf32, #tpu.memory_space<vmem>>, vector<224x9xf32>
    %c0_1 = arith.constant 0 : index
    %c0_2 = arith.constant 0 : index
    %1 = vector.load %arg1[%c0_1, %c0_2] : memref<9x32xf32, #tpu.memory_space<vmem>>, vector<9x32xf32>
    %cst = arith.constant dense<0.000000e+00> : vector<224x32xf32>
    %2 = tpu.matmul %0, %1, %cst {dimension_numbers = #tpu.dot_dimension_numbers<[1], [0], [0], [1], [0, 0, 1, 1], [], []>} : vector<224x9xf32>, vector<9x32xf32>, vector<224x32xf32> -> vector<224x32xf32>
    %c0_3 = arith.constant 0 : index
    %c0_4 = arith.constant 0 : index
    %3 = vector.load %arg2[%c0_3, %c0_4] : memref<1x32xf32, #tpu.memory_space<vmem>>, vector<1x32xf32>
    %4 = vector.broadcast %3 : vector<1x32xf32> to vector<224x32xf32>
    %5 = arith.addf %2, %4 : vector<224x32xf32>
    %cst_5 = arith.constant 0.000000e+00 : f32
    %6 = vector.broadcast %cst_5 : f32 to vector<224x32xf32>
    %7 = arith.maximumf %5, %6 : vector<224x32xf32>
    %c0_6 = arith.constant 0 : index
    %c0_7 = arith.constant 0 : index
    %8 = vector.load %arg3[%c0_6, %c0_7] : memref<224x32xf32, #tpu.memory_space<vmem>>, vector<224x32xf32>
    tpu.vector_store %arg3[%c0_6, %c0_7], %7 {strides = array<i32>} : memref<224x32xf32, #tpu.memory_space<vmem>>, vector<224x32xf32>,
    return
  }
}

module attributes {stable_mosaic.version = 11 : i64} {
  func.func @_encoder_kernel(%arg0: i32, %arg1: memref<1x7x864xf32, #tpu.memory_space<vmem>>, %arg2: memref<7x32xf32, #tpu.memory_space<vmem>>, %arg3: memref<1x7x7xf32, #tpu.memory_space<vmem>>, %arg4: memref<288x32xf32, #tpu.memory_space<vmem>>, %arg5: memref<1x32xf32, #tpu.memory_space<vmem>>, %arg6: memref<3x32x32xf32, #tpu.memory_space<vmem>>, %arg7: memref<1x32xf32, #tpu.memory_space<vmem>>, %arg8: memref<2x1x32xf32, #tpu.memory_space<vmem>>, %arg9: memref<2x1x32xf32, #tpu.memory_space<vmem>>, %arg10: memref<2x32x128xf32, #tpu.memory_space<vmem>>, %arg11: memref<2x1x128xf32, #tpu.memory_space<vmem>>, %arg12: memref<2x128x32xf32, #tpu.memory_space<vmem>>, %arg13: memref<2x1x32xf32, #tpu.memory_space<vmem>>, %arg14: memref<2x1x32xf32, #tpu.memory_space<vmem>>, %arg15: memref<2x1x32xf32, #tpu.memory_space<vmem>>, %arg16: memref<2x32x96xf32, #tpu.memory_space<vmem>>, %arg17: memref<2x1x96xf32, #tpu.memory_space<vmem>>, %arg18: memref<2x32x32xf32, #tpu.memory_space<vmem>>, %arg19: memref<2x1x32xf32, #tpu.memory_space<vmem>>, %arg20: memref<2x1x32xf32, #tpu.memory_space<vmem>>, %arg21: memref<2x32x32xf32, #tpu.memory_space<vmem>>, %arg22: memref<2x1x32xf32, #tpu.memory_space<vmem>>, %arg23: memref<2x1x32xf32, #tpu.memory_space<vmem>>, %arg24: memref<2x1x32xf32, #tpu.memory_space<vmem>>, %arg25: memref<2x32x64xf32, #tpu.memory_space<vmem>>, %arg26: memref<2x1x64xf32, #tpu.memory_space<vmem>>, %arg27: memref<2x7x32xf32, #tpu.memory_space<vmem>>, %arg28: memref<2x1x32xf32, #tpu.memory_space<vmem>>, %arg29: memref<2x1x32xf32, #tpu.memory_space<vmem>>, %arg30: memref<2x1x32xf32, #tpu.memory_space<vmem>>, %arg31: memref<2x32x32xf32, #tpu.memory_space<vmem>>, %arg32: memref<2x1x32xf32, #tpu.memory_space<vmem>>, %arg33: memref<2x1x32xf32, #tpu.memory_space<vmem>>, %arg34: memref<2x1x32xf32, #tpu.memory_space<vmem>>, %arg35: memref<2x32x128xf32, #tpu.memory_space<vmem>>, %arg36: memref<2x1x128xf32, #tpu.memory_space<vmem>>, %arg37: memref<2x128x32xf32, #tpu.memory_space<vmem>>, %arg38: memref<2x1x32xf32, #tpu.memory_space<vmem>>, %arg39: memref<2x1x32xf32, #tpu.memory_space<vmem>>, %arg40: memref<2x1x32xf32, #tpu.memory_space<vmem>>, %arg41: memref<1x7x32xf32, #tpu.memory_space<vmem>>) attributes {dimension_semantics = [#tpu.dimension_semantics<parallel>], iteration_bounds = array<i64: 2>, scalar_prefetch = 0 : i64, scratch_operands = 0 : i64, tpu.core_type = #tpu.core_type<tc>, window_params = [{transform_indices = @transform_0, window_bounds = array<i64: 1, 7, 864>}, {pipeline_mode = #tpu.pipeline_mode<synchronous>, transform_indices = @transform_1, window_bounds = array<i64: 7, 32>}, {transform_indices = @transform_2, window_bounds = array<i64: 1, 7, 7>}, {pipeline_mode = #tpu.pipeline_mode<synchronous>, transform_indices = @transform_3, window_bounds = array<i64: 288, 32>}, {pipeline_mode = #tpu.pipeline_mode<synchronous>, transform_indices = @transform_4, window_bounds = array<i64: 1, 32>}, {pipeline_mode = #tpu.pipeline_mode<synchronous>, transform_indices = @transform_5, window_bounds = array<i64: 3, 32, 32>}, {pipeline_mode = #tpu.pipeline_mode<synchronous>, transform_indices = @transform_6, window_bounds = array<i64: 1, 32>}, {pipeline_mode = #tpu.pipeline_mode<synchronous>, transform_indices = @transform_7, window_bounds = array<i64: 2, 1, 32>}, {pipeline_mode = #tpu.pipeline_mode<synchronous>, transform_indices = @transform_8, window_bounds = array<i64: 2, 1, 32>}, {pipeline_mode = #tpu.pipeline_mode<synchronous>, transform_indices = @transform_9, window_bounds = array<i64: 2, 32, 128>}, {pipeline_mode = #tpu.pipeline_mode<synchronous>, transform_indices = @transform_10, window_bounds = array<i64: 2, 1, 128>}, {pipeline_mode = #tpu.pipeline_mode<synchronous>, transform_indices = @transform_11, window_bounds = array<i64: 2, 128, 32>}, {pipeline_mode = #tpu.pipeline_mode<synchronous>, transform_indices = @transform_12, window_bounds = array<i64: 2, 1, 32>}, {pipeline_mode = #tpu.pipeline_mode<synchronous>, transform_indices = @transform_13, window_bounds = array<i64: 2, 1, 32>}, {pipeline_mode = #tpu.pipeline_mode<synchronous>, transform_indices = @transform_14, window_bounds = array<i64: 2, 1, 32>}, {pipeline_mode = #tpu.pipeline_mode<synchronous>, transform_indices = @transform_15, window_bounds = array<i64: 2, 32, 96>}, {pipeline_mode = #tpu.pipeline_mode<synchronous>, transform_indices = @transform_16, window_bounds = array<i64: 2, 1, 96>}, {pipeline_mode = #tpu.pipeline_mode<synchronous>, transform_indices = @transform_17, window_bounds = array<i64: 2, 32, 32>}, {pipeline_mode = #tpu.pipeline_mode<synchronous>, transform_indices = @transform_18, window_bounds = array<i64: 2, 1, 32>}, {pipeline_mode = #tpu.pipeline_mode<synchronous>, transform_indices = @transform_19, window_bounds = array<i64: 2, 1, 32>}, {pipeline_mode = #tpu.pipeline_mode<synchronous>, transform_indices = @transform_20, window_bounds = array<i64: 2, 32, 32>}, {pipeline_mode = #tpu.pipeline_mode<synchronous>, transform_indices = @transform_21, window_bounds = array<i64: 2, 1, 32>}, {pipeline_mode = #tpu.pipeline_mode<synchronous>, transform_indices = @transform_22, window_bounds = array<i64: 2, 1, 32>}, {pipeline_mode = #tpu.pipeline_mode<synchronous>, transform_indices = @transform_23, window_bounds = array<i64: 2, 1, 32>}, {pipeline_mode = #tpu.pipeline_mode<synchronous>, transform_indices = @transform_24, window_bounds = array<i64: 2, 32, 64>}, {pipeline_mode = #tpu.pipeline_mode<synchronous>, transform_indices = @transform_25, window_bounds = array<i64: 2, 1, 64>}, {pipeline_mode = #tpu.pipeline_mode<synchronous>, transform_indices = @transform_26, window_bounds = array<i64: 2, 7, 32>}, {pipeline_mode = #tpu.pipeline_mode<synchronous>, transform_indices = @transform_27, window_bounds = array<i64: 2, 1, 32>}, {pipeline_mode = #tpu.pipeline_mode<synchronous>, transform_indices = @transform_28, window_bounds = array<i64: 2, 1, 32>}, {pipeline_mode = #tpu.pipeline_mode<synchronous>, transform_indices = @transform_29, window_bounds = array<i64: 2, 1, 32>}, {pipeline_mode = #tpu.pipeline_mode<synchronous>, transform_indices = @transform_30, window_bounds = array<i64: 2, 32, 32>}, {pipeline_mode = #tpu.pipeline_mode<synchronous>, transform_indices = @transform_31, window_bounds = array<i64: 2, 1, 32>}, {pipeline_mode = #tpu.pipeline_mode<synchronous>, transform_indices = @transform_32, window_bounds = array<i64: 2, 1, 32>}, {pipeline_mode = #tpu.pipeline_mode<synchronous>, transform_indices = @transform_33, window_bounds = array<i64: 2, 1, 32>}, {pipeline_mode = #tpu.pipeline_mode<synchronous>, transform_indices = @transform_34, window_bounds = array<i64: 2, 32, 128>}, {pipeline_mode = #tpu.pipeline_mode<synchronous>, transform_indices = @transform_35, window_bounds = array<i64: 2, 1, 128>}, {pipeline_mode = #tpu.pipeline_mode<synchronous>, transform_indices = @transform_36, window_bounds = array<i64: 2, 128, 32>}, {pipeline_mode = #tpu.pipeline_mode<synchronous>, transform_indices = @transform_37, window_bounds = array<i64: 2, 1, 32>}, {pipeline_mode = #tpu.pipeline_mode<synchronous>, transform_indices = @transform_38, window_bounds = array<i64: 2, 1, 32>}, {pipeline_mode = #tpu.pipeline_mode<synchronous>, transform_indices = @transform_39, window_bounds = array<i64: 2, 1, 32>}, {transform_indices = @transform_40, window_bounds = array<i64: 1, 7, 32>}]} {
    %c0 = arith.constant 0 : index
    %c0_0 = arith.constant 0 : index
    %c0_1 = arith.constant 0 : index
    %0 = vector.load %arg1[%c0, %c0_0, %c0_1] : memref<1x7x864xf32, #tpu.memory_space<vmem>>, vector<1x7x864xf32>
    %1 = vector.shape_cast %0 : vector<1x7x864xf32> to vector<7x864xf32>
    %c0_2 = arith.constant 0 : index
    %c0_3 = arith.constant 0 : index
    %2 = vector.load %arg4[%c0_2, %c0_3] : memref<288x32xf32, #tpu.memory_space<vmem>>, vector<288x32xf32>
    %c0_4 = arith.constant 0 : index
    %c0_5 = arith.constant 0 : index
    %3 = vector.load %arg5[%c0_4, %c0_5] : memref<1x32xf32, #tpu.memory_space<vmem>>, vector<1x32xf32>
    %cst = arith.constant 0.000000e+00 : f32
    %4 = vector.broadcast %cst : f32 to vector<7x32xf32>
    %5 = vector.extract_strided_slice %1 {offsets = [0, 0], sizes = [7, 288], strides = [1, 1]} : vector<7x864xf32> to vector<7x288xf32>
    %cst_6 = arith.constant dense<0.000000e+00> : vector<7x32xf32>
    %6 = tpu.matmul %5, %2, %cst_6 {dimension_numbers = #tpu.dot_dimension_numbers<[1], [0], [0], [1], [0, 0, 1, 1], [], []>} : vector<7x288xf32>, vector<288x32xf32>, vector<7x32xf32> -> vector<7x32xf32>
    %7 = vector.broadcast %3 : vector<1x32xf32> to vector<7x32xf32>
    %8 = arith.addf %6, %7 : vector<7x32xf32>
    %cst_7 = arith.constant 0.000000e+00 : f32
    %9 = vector.broadcast %cst_7 : f32 to vector<7x32xf32>
    %10 = arith.maximumf %8, %9 : vector<7x32xf32>
    %c0_8 = arith.constant 0 : index
    %c0_9 = arith.constant 0 : index
    %c0_10 = arith.constant 0 : index
    %11 = vector.load %arg6[%c0_8, %c0_9, %c0_10] : memref<3x32x32xf32, #tpu.memory_space<vmem>>, vector<1x32x32xf32>
    %12 = vector.shape_cast %11 : vector<1x32x32xf32> to vector<32x32xf32>
    %cst_11 = arith.constant dense<0.000000e+00> : vector<7x32xf32>
    %13 = tpu.matmul %10, %12, %cst_11 {dimension_numbers = #tpu.dot_dimension_numbers<[1], [0], [0], [1], [0, 0, 1, 1], [], []>} : vector<7x32xf32>, vector<32x32xf32>, vector<7x32xf32> -> vector<7x32xf32>
    %14 = arith.addf %4, %13 : vector<7x32xf32>
    %15 = vector.extract_strided_slice %1 {offsets = [0, 288], sizes = [7, 288], strides = [1, 1]} : vector<7x864xf32> to vector<7x288xf32>
    %cst_12 = arith.constant dense<0.000000e+00> : vector<7x32xf32>
    %16 = tpu.matmul %15, %2, %cst_12 {dimension_numbers = #tpu.dot_dimension_numbers<[1], [0], [0], [1], [0, 0, 1, 1], [], []>} : vector<7x288xf32>, vector<288x32xf32>, vector<7x32xf32> -> vector<7x32xf32>
    %17 = vector.broadcast %3 : vector<1x32xf32> to vector<7x32xf32>
    %18 = arith.addf %16, %17 : vector<7x32xf32>
    %cst_13 = arith.constant 0.000000e+00 : f32
    %19 = vector.broadcast %cst_13 : f32 to vector<7x32xf32>
    %20 = arith.maximumf %18, %19 : vector<7x32xf32>
    %c1 = arith.constant 1 : index
    %c0_14 = arith.constant 0 : index
    %c0_15 = arith.constant 0 : index
    %21 = vector.load %arg6[%c1, %c0_14, %c0_15] : memref<3x32x32xf32, #tpu.memory_space<vmem>>, vector<1x32x32xf32>
    %22 = vector.shape_cast %21 : vector<1x32x32xf32> to vector<32x32xf32>
    %cst_16 = arith.constant dense<0.000000e+00> : vector<7x32xf32>
    %23 = tpu.matmul %20, %22, %cst_16 {dimension_numbers = #tpu.dot_dimension_numbers<[1], [0], [0], [1], [0, 0, 1, 1], [], []>} : vector<7x32xf32>, vector<32x32xf32>, vector<7x32xf32> -> vector<7x32xf32>
    %24 = arith.addf %14, %23 : vector<7x32xf32>
    %25 = vector.extract_strided_slice %1 {offsets = [0, 576], sizes = [7, 288], strides = [1, 1]} : vector<7x864xf32> to vector<7x288xf32>
    %cst_17 = arith.constant dense<0.000000e+00> : vector<7x32xf32>
    %26 = tpu.matmul %25, %2, %cst_17 {dimension_numbers = #tpu.dot_dimension_numbers<[1], [0], [0], [1], [0, 0, 1, 1], [], []>} : vector<7x288xf32>, vector<288x32xf32>, vector<7x32xf32> -> vector<7x32xf32>
    %27 = vector.broadcast %3 : vector<1x32xf32> to vector<7x32xf32>
    %28 = arith.addf %26, %27 : vector<7x32xf32>
    %cst_18 = arith.constant 0.000000e+00 : f32
    %29 = vector.broadcast %cst_18 : f32 to vector<7x32xf32>
    %30 = arith.maximumf %28, %29 : vector<7x32xf32>
    %c2 = arith.constant 2 : index
    %c0_19 = arith.constant 0 : index
    %c0_20 = arith.constant 0 : index
    %31 = vector.load %arg6[%c2, %c0_19, %c0_20] : memref<3x32x32xf32, #tpu.memory_space<vmem>>, vector<1x32x32xf32>
    %32 = vector.shape_cast %31 : vector<1x32x32xf32> to vector<32x32xf32>
    %cst_21 = arith.constant dense<0.000000e+00> : vector<7x32xf32>
    %33 = tpu.matmul %30, %32, %cst_21 {dimension_numbers = #tpu.dot_dimension_numbers<[1], [0], [0], [1], [0, 0, 1, 1], [], []>} : vector<7x32xf32>, vector<32x32xf32>, vector<7x32xf32> -> vector<7x32xf32>
    %34 = arith.addf %24, %33 : vector<7x32xf32>
    %c0_22 = arith.constant 0 : index
    %c0_23 = arith.constant 0 : index
    %35 = vector.load %arg7[%c0_22, %c0_23] : memref<1x32xf32, #tpu.memory_space<vmem>>, vector<1x32xf32>
    %36 = vector.broadcast %35 : vector<1x32xf32> to vector<7x32xf32>
    %37 = arith.addf %34, %36 : vector<7x32xf32>
    %c0_24 = arith.constant 0 : index
    %c0_25 = arith.constant 0 : index
    %38 = vector.load %arg2[%c0_24, %c0_25] : memref<7x32xf32, #tpu.memory_space<vmem>>, vector<7x32xf32>
    %c0_26 = arith.constant 0 : index
    %c0_27 = arith.constant 0 : index
    %c0_28 = arith.constant 0 : index
    %39 = vector.load %arg3[%c0_26, %c0_27, %c0_28] : memref<1x7x7xf32, #tpu.memory_space<vmem>>, vector<1x7x7xf32>
    %40 = vector.shape_cast %39 : vector<1x7x7xf32> to vector<7x7xf32>
    %c0_29 = arith.constant 0 : index
    %c0_30 = arith.constant 0 : index
    %c0_31 = arith.constant 0 : index
    %41 = vector.load %arg8[%c0_29, %c0_30, %c0_31] : memref<2x1x32xf32, #tpu.memory_space<vmem>>, vector<1x1x32xf32>
    %42 = vector.shape_cast %41 : vector<1x1x32xf32> to vector<1x32xf32>
    %c0_32 = arith.constant 0 : index
    %c0_33 = arith.constant 0 : index
    %c0_34 = arith.constant 0 : index
    %43 = vector.load %arg9[%c0_32, %c0_33, %c0_34] : memref<2x1x32xf32, #tpu.memory_space<vmem>>, vector<1x1x32xf32>
    %44 = vector.shape_cast %43 : vector<1x1x32xf32> to vector<1x32xf32>
    %c0_35 = arith.constant 0 : index
    %c0_36 = arith.constant 0 : index
    %c0_37 = arith.constant 0 : index
    %45 = vector.load %arg10[%c0_35, %c0_36, %c0_37] : memref<2x32x128xf32, #tpu.memory_space<vmem>>, vector<1x32x128xf32>
    %46 = vector.shape_cast %45 : vector<1x32x128xf32> to vector<32x128xf32>
    %c0_38 = arith.constant 0 : index
    %c0_39 = arith.constant 0 : index
    %c0_40 = arith.constant 0 : index
    %47 = vector.load %arg11[%c0_38, %c0_39, %c0_40] : memref<2x1x128xf32, #tpu.memory_space<vmem>>, vector<1x1x128xf32>
    %48 = vector.shape_cast %47 : vector<1x1x128xf32> to vector<1x128xf32>
    %c0_41 = arith.constant 0 : index
    %c0_42 = arith.constant 0 : index
    %c0_43 = arith.constant 0 : index
    %49 = vector.load %arg12[%c0_41, %c0_42, %c0_43] : memref<2x128x32xf32, #tpu.memory_space<vmem>>, vector<1x128x32xf32>
    %50 = vector.shape_cast %49 : vector<1x128x32xf32> to vector<128x32xf32>
    %c0_44 = arith.constant 0 : index
    %c0_45 = arith.constant 0 : index
    %c0_46 = arith.constant 0 : index
    %51 = vector.load %arg13[%c0_44, %c0_45, %c0_46] : memref<2x1x32xf32, #tpu.memory_space<vmem>>, vector<1x1x32xf32>
    %52 = vector.shape_cast %51 : vector<1x1x32xf32> to vector<1x32xf32>
    %cst_47 = arith.constant dense<0.000000e+00> : vector<7xf32>
    %53 = vector.multi_reduction <add>, %37, %cst_47 [1] : vector<7x32xf32> to vector<7xf32>
    %54 = vector.shape_cast %53 : vector<7xf32> to vector<7x1xf32>
    %cst_48 = arith.constant 3.200000e+01 : f32
    %55 = vector.broadcast %cst_48 : f32 to vector<7x1xf32>
    %56 = arith.divf %54, %55 : vector<7x1xf32>
    %57 = vector.broadcast %56 : vector<7x1xf32> to vector<7x32xf32>
    %58 = arith.subf %37, %57 : vector<7x32xf32>
    %59 = arith.mulf %58, %58 : vector<7x32xf32>
    %cst_49 = arith.constant dense<0.000000e+00> : vector<7xf32>
    %60 = vector.multi_reduction <add>, %59, %cst_49 [1] : vector<7x32xf32> to vector<7xf32>
    %61 = vector.shape_cast %60 : vector<7xf32> to vector<7x1xf32>
    %cst_50 = arith.constant 3.200000e+01 : f32
    %62 = vector.broadcast %cst_50 : f32 to vector<7x1xf32>
    %63 = arith.divf %61, %62 : vector<7x1xf32>
    %64 = vector.broadcast %56 : vector<7x1xf32> to vector<7x32xf32>
    %65 = arith.subf %37, %64 : vector<7x32xf32>
    %cst_51 = arith.constant 6.100000e-05 : f32
    %66 = vector.broadcast %cst_51 : f32 to vector<7x1xf32>
    %67 = arith.addf %63, %66 : vector<7x1xf32>
    %68 = math.rsqrt %67 : vector<7x1xf32>
    %69 = vector.broadcast %68 : vector<7x1xf32> to vector<7x32xf32>
    %70 = arith.mulf %65, %69 : vector<7x32xf32>
    %71 = vector.broadcast %42 : vector<1x32xf32> to vector<7x32xf32>
    %72 = arith.mulf %70, %71 : vector<7x32xf32>
    %73 = vector.broadcast %44 : vector<1x32xf32> to vector<7x32xf32>
    %74 = arith.addf %72, %73 : vector<7x32xf32>
    %cst_52 = arith.constant dense<0.000000e+00> : vector<7x128xf32>
    %75 = tpu.matmul %74, %46, %cst_52 {dimension_numbers = #tpu.dot_dimension_numbers<[1], [0], [0], [1], [0, 0, 1, 1], [], []>} : vector<7x32xf32>, vector<32x128xf32>, vector<7x128xf32> -> vector<7x128xf32>
    %76 = vector.broadcast %48 : vector<1x128xf32> to vector<7x128xf32>
    %77 = arith.addf %75, %76 : vector<7x128xf32>
    %78 = arith.negf %77 : vector<7x128xf32>
    %79 = math.exp %78 : vector<7x128xf32>
    %cst_53 = arith.constant 1.000000e+00 : f32
    %80 = vector.broadcast %cst_53 : f32 to vector<7x128xf32>
    %81 = arith.addf %80, %79 : vector<7x128xf32>
    %82 = arith.divf %80, %81 : vector<7x128xf32>
    %83 = arith.mulf %77, %82 : vector<7x128xf32>
    %cst_54 = arith.constant dense<0.000000e+00> : vector<7x32xf32>
    %84 = tpu.matmul %83, %50, %cst_54 {dimension_numbers = #tpu.dot_dimension_numbers<[1], [0], [0], [1], [0, 0, 1, 1], [], []>} : vector<7x128xf32>, vector<128x32xf32>, vector<7x32xf32> -> vector<7x32xf32>
    %85 = vector.broadcast %52 : vector<1x32xf32> to vector<7x32xf32>
    %86 = arith.addf %84, %85 : vector<7x32xf32>
    %cst_55 = arith.constant 5.000000e-01 : f32
    %87 = vector.broadcast %cst_55 : f32 to vector<7x32xf32>
    %88 = arith.mulf %87, %86 : vector<7x32xf32>
    %89 = arith.addf %37, %88 : vector<7x32xf32>
    %c0_56 = arith.constant 0 : index
    %c0_57 = arith.constant 0 : index
    %c0_58 = arith.constant 0 : index
    %90 = vector.load %arg14[%c0_56, %c0_57, %c0_58] : memref<2x1x32xf32, #tpu.memory_space<vmem>>, vector<1x1x32xf32>
    %91 = vector.shape_cast %90 : vector<1x1x32xf32> to vector<1x32xf32>
    %c0_59 = arith.constant 0 : index
    %c0_60 = arith.constant 0 : index
    %c0_61 = arith.constant 0 : index
    %92 = vector.load %arg15[%c0_59, %c0_60, %c0_61] : memref<2x1x32xf32, #tpu.memory_space<vmem>>, vector<1x1x32xf32>
    %93 = vector.shape_cast %92 : vector<1x1x32xf32> to vector<1x32xf32>
    %cst_62 = arith.constant dense<0.000000e+00> : vector<7xf32>
    %94 = vector.multi_reduction <add>, %89, %cst_62 [1] : vector<7x32xf32> to vector<7xf32>
    %95 = vector.shape_cast %94 : vector<7xf32> to vector<7x1xf32>
    %cst_63 = arith.constant 3.200000e+01 : f32
    %96 = vector.broadcast %cst_63 : f32 to vector<7x1xf32>
    %97 = arith.divf %95, %96 : vector<7x1xf32>
    %98 = vector.broadcast %97 : vector<7x1xf32> to vector<7x32xf32>
    %99 = arith.subf %89, %98 : vector<7x32xf32>
    %100 = arith.mulf %99, %99 : vector<7x32xf32>
    %cst_64 = arith.constant dense<0.000000e+00> : vector<7xf32>
    %101 = vector.multi_reduction <add>, %100, %cst_64 [1] : vector<7x32xf32> to vector<7xf32>
    %102 = vector.shape_cast %101 : vector<7xf32> to vector<7x1xf32>
    %cst_65 = arith.constant 3.200000e+01 : f32
    %103 = vector.broadcast %cst_65 : f32 to vector<7x1xf32>
    %104 = arith.divf %102, %103 : vector<7x1xf32>
    %105 = vector.broadcast %97 : vector<7x1xf32> to vector<7x32xf32>
    %106 = arith.subf %89, %105 : vector<7x32xf32>
    %cst_66 = arith.constant 6.100000e-05 : f32
    %107 = vector.broadcast %cst_66 : f32 to vector<7x1xf32>
    %108 = arith.addf %104, %107 : vector<7x1xf32>
    %109 = math.rsqrt %108 : vector<7x1xf32>
    %110 = vector.broadcast %109 : vector<7x1xf32> to vector<7x32xf32>
    %111 = arith.mulf %106, %110 : vector<7x32xf32>
    %112 = vector.broadcast %91 : vector<1x32xf32> to vector<7x32xf32>
    %113 = arith.mulf %111, %112 : vector<7x32xf32>
    %114 = vector.broadcast %93 : vector<1x32xf32> to vector<7x32xf32>
    %115 = arith.addf %113, %114 : vector<7x32xf32>
    %c0_67 = arith.constant 0 : index
    %c0_68 = arith.constant 0 : index
    %c0_69 = arith.constant 0 : index
    %116 = vector.load %arg16[%c0_67, %c0_68, %c0_69] : memref<2x32x96xf32, #tpu.memory_space<vmem>>, vector<1x32x96xf32>
    %117 = vector.shape_cast %116 : vector<1x32x96xf32> to vector<32x96xf32>
    %cst_70 = arith.constant dense<0.000000e+00> : vector<7x96xf32>
    %118 = tpu.matmul %115, %117, %cst_70 {dimension_numbers = #tpu.dot_dimension_numbers<[1], [0], [0], [1], [0, 0, 1, 1], [], []>} : vector<7x32xf32>, vector<32x96xf32>, vector<7x96xf32> -> vector<7x96xf32>
    %c0_71 = arith.constant 0 : index
    %c0_72 = arith.constant 0 : index
    %c0_73 = arith.constant 0 : index
    %119 = vector.load %arg17[%c0_71, %c0_72, %c0_73] : memref<2x1x96xf32, #tpu.memory_space<vmem>>, vector<1x1x96xf32>
    %120 = vector.shape_cast %119 : vector<1x1x96xf32> to vector<1x96xf32>
    %121 = vector.broadcast %120 : vector<1x96xf32> to vector<7x96xf32>
    %122 = arith.addf %118, %121 : vector<7x96xf32>
    %c0_74 = arith.constant 0 : index
    %c0_75 = arith.constant 0 : index
    %c0_76 = arith.constant 0 : index
    %123 = vector.load %arg18[%c0_74, %c0_75, %c0_76] : memref<2x32x32xf32, #tpu.memory_space<vmem>>, vector<1x32x32xf32>
    %124 = vector.shape_cast %123 : vector<1x32x32xf32> to vector<32x32xf32>
    %cst_77 = arith.constant dense<0.000000e+00> : vector<7x32xf32>
    %125 = tpu.matmul %38, %124, %cst_77 {dimension_numbers = #tpu.dot_dimension_numbers<[1], [0], [0], [1], [0, 0, 1, 1], [], []>} : vector<7x32xf32>, vector<32x32xf32>, vector<7x32xf32> -> vector<7x32xf32>
    %126 = vector.extract_strided_slice %122 {offsets = [0, 0], sizes = [7, 32], strides = [1, 1]} : vector<7x96xf32> to vector<7x32xf32>
    %127 = vector.extract_strided_slice %122 {offsets = [0, 32], sizes = [7, 32], strides = [1, 1]} : vector<7x96xf32> to vector<7x32xf32>
    %128 = vector.extract_strided_slice %122 {offsets = [0, 64], sizes = [7, 32], strides = [1, 1]} : vector<7x96xf32> to vector<7x32xf32>
    %c0_78 = arith.constant 0 : index
    %c0_79 = arith.constant 0 : index
    %c0_80 = arith.constant 0 : index
    %129 = vector.load %arg19[%c0_78, %c0_79, %c0_80] : memref<2x1x32xf32, #tpu.memory_space<vmem>>, vector<1x1x32xf32>
    %130 = vector.shape_cast %129 : vector<1x1x32xf32> to vector<1x32xf32>
    %131 = vector.broadcast %130 : vector<1x32xf32> to vector<7x32xf32>
    %132 = arith.addf %126, %131 : vector<7x32xf32>
    %cst_81 = arith.constant 0.176776692 : f32
    %133 = vector.broadcast %cst_81 : f32 to vector<7x32xf32>
    %134 = arith.mulf %132, %133 : vector<7x32xf32>
    %c0_82 = arith.constant 0 : index
    %c0_83 = arith.constant 0 : index
    %c0_84 = arith.constant 0 : index
    %135 = vector.load %arg20[%c0_82, %c0_83, %c0_84] : memref<2x1x32xf32, #tpu.memory_space<vmem>>, vector<1x1x32xf32>
    %136 = vector.shape_cast %135 : vector<1x1x32xf32> to vector<1x32xf32>
    %137 = vector.broadcast %136 : vector<1x32xf32> to vector<7x32xf32>
    %138 = arith.addf %126, %137 : vector<7x32xf32>
    %cst_85 = arith.constant 0.176776692 : f32
    %139 = vector.broadcast %cst_85 : f32 to vector<7x32xf32>
    %140 = arith.mulf %138, %139 : vector<7x32xf32>
    %141 = vector.extract_strided_slice %134 {offsets = [0, 0], sizes = [7, 8], strides = [1, 1]} : vector<7x32xf32> to vector<7x8xf32>
    %142 = vector.extract_strided_slice %127 {offsets = [0, 0], sizes = [7, 8], strides = [1, 1]} : vector<7x32xf32> to vector<7x8xf32>
    %cst_86 = arith.constant dense<0.000000e+00> : vector<7x7xf32>
    %143 = tpu.matmul %141, %142, %cst_86 {dimension_numbers = #tpu.dot_dimension_numbers<[1], [1], [0], [0], [0, 0, 1, 0], [], []>} : vector<7x8xf32>, vector<7x8xf32>, vector<7x7xf32> -> vector<7x7xf32>
    %144 = vector.extract_strided_slice %140 {offsets = [0, 0], sizes = [7, 8], strides = [1, 1]} : vector<7x32xf32> to vector<7x8xf32>
    %145 = vector.extract_strided_slice %125 {offsets = [0, 0], sizes = [7, 8], strides = [1, 1]} : vector<7x32xf32> to vector<7x8xf32>
    %cst_87 = arith.constant dense<0.000000e+00> : vector<7x7xf32>
    %146 = tpu.matmul %144, %145, %cst_87 {dimension_numbers = #tpu.dot_dimension_numbers<[1], [1], [0], [0], [0, 0, 1, 0], [], []>} : vector<7x8xf32>, vector<7x8xf32>, vector<7x7xf32> -> vector<7x7xf32>
    %147 = vector.extract_strided_slice %134 {offsets = [0, 8], sizes = [7, 8], strides = [1, 1]} : vector<7x32xf32> to vector<7x8xf32>
    %148 = vector.extract_strided_slice %127 {offsets = [0, 8], sizes = [7, 8], strides = [1, 1]} : vector<7x32xf32> to vector<7x8xf32>
    %cst_88 = arith.constant dense<0.000000e+00> : vector<7x7xf32>
    %149 = tpu.matmul %147, %148, %cst_88 {dimension_numbers = #tpu.dot_dimension_numbers<[1], [1], [0], [0], [0, 0, 1, 0], [], []>} : vector<7x8xf32>, vector<7x8xf32>, vector<7x7xf32> -> vector<7x7xf32>
    %150 = vector.extract_strided_slice %140 {offsets = [0, 8], sizes = [7, 8], strides = [1, 1]} : vector<7x32xf32> to vector<7x8xf32>
    %151 = vector.extract_strided_slice %125 {offsets = [0, 8], sizes = [7, 8], strides = [1, 1]} : vector<7x32xf32> to vector<7x8xf32>
    %cst_89 = arith.constant dense<0.000000e+00> : vector<7x7xf32>
    %152 = tpu.matmul %150, %151, %cst_89 {dimension_numbers = #tpu.dot_dimension_numbers<[1], [1], [0], [0], [0, 0, 1, 0], [], []>} : vector<7x8xf32>, vector<7x8xf32>, vector<7x7xf32> -> vector<7x7xf32>
    %153 = vector.extract_strided_slice %134 {offsets = [0, 16], sizes = [7, 8], strides = [1, 1]} : vector<7x32xf32> to vector<7x8xf32>
    %154 = vector.extract_strided_slice %127 {offsets = [0, 16], sizes = [7, 8], strides = [1, 1]} : vector<7x32xf32> to vector<7x8xf32>
    %cst_90 = arith.constant dense<0.000000e+00> : vector<7x7xf32>
    %155 = tpu.matmul %153, %154, %cst_90 {dimension_numbers = #tpu.dot_dimension_numbers<[1], [1], [0], [0], [0, 0, 1, 0], [], []>} : vector<7x8xf32>, vector<7x8xf32>, vector<7x7xf32> -> vector<7x7xf32>
    %156 = vector.extract_strided_slice %140 {offsets = [0, 16], sizes = [7, 8], strides = [1, 1]} : vector<7x32xf32> to vector<7x8xf32>
    %157 = vector.extract_strided_slice %125 {offsets = [0, 16], sizes = [7, 8], strides = [1, 1]} : vector<7x32xf32> to vector<7x8xf32>
    %cst_91 = arith.constant dense<0.000000e+00> : vector<7x7xf32>
    %158 = tpu.matmul %156, %157, %cst_91 {dimension_numbers = #tpu.dot_dimension_numbers<[1], [1], [0], [0], [0, 0, 1, 0], [], []>} : vector<7x8xf32>, vector<7x8xf32>, vector<7x7xf32> -> vector<7x7xf32>
    %159 = vector.extract_strided_slice %134 {offsets = [0, 24], sizes = [7, 8], strides = [1, 1]} : vector<7x32xf32> to vector<7x8xf32>
    %160 = vector.extract_strided_slice %127 {offsets = [0, 24], sizes = [7, 8], strides = [1, 1]} : vector<7x32xf32> to vector<7x8xf32>
    %cst_92 = arith.constant dense<0.000000e+00> : vector<7x7xf32>
    %161 = tpu.matmul %159, %160, %cst_92 {dimension_numbers = #tpu.dot_dimension_numbers<[1], [1], [0], [0], [0, 0, 1, 0], [], []>} : vector<7x8xf32>, vector<7x8xf32>, vector<7x7xf32> -> vector<7x7xf32>
    %162 = vector.extract_strided_slice %140 {offsets = [0, 24], sizes = [7, 8], strides = [1, 1]} : vector<7x32xf32> to vector<7x8xf32>
    %163 = vector.extract_strided_slice %125 {offsets = [0, 24], sizes = [7, 8], strides = [1, 1]} : vector<7x32xf32> to vector<7x8xf32>
    %cst_93 = arith.constant dense<0.000000e+00> : vector<7x7xf32>
    %164 = tpu.matmul %162, %163, %cst_93 {dimension_numbers = #tpu.dot_dimension_numbers<[1], [1], [0], [0], [0, 0, 1, 0], [], []>} : vector<7x8xf32>, vector<7x8xf32>, vector<7x7xf32> -> vector<7x7xf32>
    %165 = vector.shape_cast %143 : vector<7x7xf32> to vector<1x7x7xf32>
    %166 = vector.shape_cast %149 : vector<7x7xf32> to vector<1x7x7xf32>
    %167 = vector.shape_cast %155 : vector<7x7xf32> to vector<1x7x7xf32>
    %168 = vector.shape_cast %161 : vector<7x7xf32> to vector<1x7x7xf32>
    %169 = tpu.concatenate %165, %166, %167, %168 in 0 : vector<1x7x7xf32>, vector<1x7x7xf32>, vector<1x7x7xf32>, vector<1x7x7xf32> -> vector<4x7x7xf32>
    %170 = vector.shape_cast %146 : vector<7x7xf32> to vector<1x7x7xf32>
    %171 = vector.shape_cast %152 : vector<7x7xf32> to vector<1x7x7xf32>
    %172 = vector.shape_cast %158 : vector<7x7xf32> to vector<1x7x7xf32>
    %173 = vector.shape_cast %164 : vector<7x7xf32> to vector<1x7x7xf32>
    %174 = tpu.concatenate %170, %171, %172, %173 in 0 : vector<1x7x7xf32>, vector<1x7x7xf32>, vector<1x7x7xf32>, vector<1x7x7xf32> -> vector<4x7x7xf32>
    %175 = vector.extract_strided_slice %174 {offsets = [0, 1, 0], sizes = [4, 6, 7], strides = [1, 1, 1]} : vector<4x7x7xf32> to vector<4x6x7xf32>
    %cst_94 = arith.constant 0.000000e+00 : f32
    %176 = vector.broadcast %cst_94 : f32 to vector<4x1x7xf32>
    %177 = tpu.concatenate %175, %176 in 1 : vector<4x6x7xf32>, vector<4x1x7xf32> -> vector<4x7x7xf32>
    %cst_95 = arith.constant 0.000000e+00 : f32
    %178 = vector.broadcast %cst_95 : f32 to vector<4x7x1xf32>
    %179 = tpu.concatenate %174, %178, %177 in 2 : vector<4x7x7xf32>, vector<4x7x1xf32>, vector<4x7x7xf32> -> vector<4x7x15xf32>
    %180 = vector.extract_strided_slice %179 {offsets = [0, 0, 6], sizes = [4, 1, 7], strides = [1, 1, 1]} : vector<4x7x15xf32> to vector<4x1x7xf32>
    %181 = vector.extract_strided_slice %179 {offsets = [0, 1, 5], sizes = [4, 1, 7], strides = [1, 1, 1]} : vector<4x7x15xf32> to vector<4x1x7xf32>
    %182 = vector.extract_strided_slice %179 {offsets = [0, 2, 4], sizes = [4, 1, 7], strides = [1, 1, 1]} : vector<4x7x15xf32> to vector<4x1x7xf32>
    %183 = vector.extract_strided_slice %179 {offsets = [0, 3, 3], sizes = [4, 1, 7], strides = [1, 1, 1]} : vector<4x7x15xf32> to vector<4x1x7xf32>
    %184 = vector.extract_strided_slice %179 {offsets = [0, 4, 2], sizes = [4, 1, 7], strides = [1, 1, 1]} : vector<4x7x15xf32> to vector<4x1x7xf32>
    %185 = vector.extract_strided_slice %179 {offsets = [0, 5, 1], sizes = [4, 1, 7], strides = [1, 1, 1]} : vector<4x7x15xf32> to vector<4x1x7xf32>
    %186 = vector.extract_strided_slice %179 {offsets = [0, 6, 0], sizes = [4, 1, 7], strides = [1, 1, 1]} : vector<4x7x15xf32> to vector<4x1x7xf32>
    %187 = tpu.concatenate %180, %181, %182, %183, %184, %185, %186 in 1 : vector<4x1x7xf32>, vector<4x1x7xf32>, vector<4x1x7xf32>, vector<4x1x7xf32>, vector<4x1x7xf32>, vector<4x1x7xf32>, vector<4x1x7xf32> -> vector<4x7x7xf32>
    %188 = arith.addf %169, %187 : vector<4x7x7xf32>
    %189 = vector.shape_cast %40 : vector<7x7xf32> to vector<1x7x7xf32>
    %190 = vector.broadcast %189 : vector<1x7x7xf32> to vector<4x7x7xf32>
    %191 = arith.addf %188, %190 : vector<4x7x7xf32>
    %cst_96 = arith.constant dense<0xFF800000> : vector<4x7xf32>
    %192 = vector.multi_reduction <maximumf>, %191, %cst_96 [2] : vector<4x7x7xf32> to vector<4x7xf32>
    %193 = vector.shape_cast %192 : vector<4x7xf32> to vector<4x7x1xf32>
    %194 = vector.broadcast %193 : vector<4x7x1xf32> to vector<4x7x7xf32>
    %195 = arith.subf %191, %194 : vector<4x7x7xf32>
    %196 = math.exp %195 : vector<4x7x7xf32>
    %cst_97 = arith.constant dense<0.000000e+00> : vector<4x7xf32>
    %197 = vector.multi_reduction <add>, %196, %cst_97 [2] : vector<4x7x7xf32> to vector<4x7xf32>
    %198 = vector.shape_cast %197 : vector<4x7xf32> to vector<4x7x1xf32>
    %199 = vector.broadcast %198 : vector<4x7x1xf32> to vector<4x7x7xf32>
    %200 = arith.divf %196, %199 : vector<4x7x7xf32>
    %201 = vector.extract_strided_slice %200 {offsets = [0, 0, 0], sizes = [1, 7, 7], strides = [1, 1, 1]} : vector<4x7x7xf32> to vector<1x7x7xf32>
    %202 = vector.shape_cast %201 : vector<1x7x7xf32> to vector<7x7xf32>
    %203 = vector.extract_strided_slice %128 {offsets = [0, 0], sizes = [7, 8], strides = [1, 1]} : vector<7x32xf32> to vector<7x8xf32>
    %cst_98 = arith.constant dense<0.000000e+00> : vector<7x8xf32>
    %204 = tpu.matmul %202, %203, %cst_98 {dimension_numbers = #tpu.dot_dimension_numbers<[1], [0], [0], [1], [0, 0, 1, 1], [], []>} : vector<7x7xf32>, vector<7x8xf32>, vector<7x8xf32> -> vector<7x8xf32>
    %205 = vector.extract_strided_slice %200 {offsets = [1, 0, 0], sizes = [1, 7, 7], strides = [1, 1, 1]} : vector<4x7x7xf32> to vector<1x7x7xf32>
    %206 = vector.shape_cast %205 : vector<1x7x7xf32> to vector<7x7xf32>
    %207 = vector.extract_strided_slice %128 {offsets = [0, 8], sizes = [7, 8], strides = [1, 1]} : vector<7x32xf32> to vector<7x8xf32>
    %cst_99 = arith.constant dense<0.000000e+00> : vector<7x8xf32>
    %208 = tpu.matmul %206, %207, %cst_99 {dimension_numbers = #tpu.dot_dimension_numbers<[1], [0], [0], [1], [0, 0, 1, 1], [], []>} : vector<7x7xf32>, vector<7x8xf32>, vector<7x8xf32> -> vector<7x8xf32>
    %209 = vector.extract_strided_slice %200 {offsets = [2, 0, 0], sizes = [1, 7, 7], strides = [1, 1, 1]} : vector<4x7x7xf32> to vector<1x7x7xf32>
    %210 = vector.shape_cast %209 : vector<1x7x7xf32> to vector<7x7xf32>
    %211 = vector.extract_strided_slice %128 {offsets = [0, 16], sizes = [7, 8], strides = [1, 1]} : vector<7x32xf32> to vector<7x8xf32>
    %cst_100 = arith.constant dense<0.000000e+00> : vector<7x8xf32>
    %212 = tpu.matmul %210, %211, %cst_100 {dimension_numbers = #tpu.dot_dimension_numbers<[1], [0], [0], [1], [0, 0, 1, 1], [], []>} : vector<7x7xf32>, vector<7x8xf32>, vector<7x8xf32> -> vector<7x8xf32>
    %213 = vector.extract_strided_slice %200 {offsets = [3, 0, 0], sizes = [1, 7, 7], strides = [1, 1, 1]} : vector<4x7x7xf32> to vector<1x7x7xf32>
    %214 = vector.shape_cast %213 : vector<1x7x7xf32> to vector<7x7xf32>
    %215 = vector.extract_strided_slice %128 {offsets = [0, 24], sizes = [7, 8], strides = [1, 1]} : vector<7x32xf32> to vector<7x8xf32>
    %cst_101 = arith.constant dense<0.000000e+00> : vector<7x8xf32>
    %216 = tpu.matmul %214, %215, %cst_101 {dimension_numbers = #tpu.dot_dimension_numbers<[1], [0], [0], [1], [0, 0, 1, 1], [], []>} : vector<7x7xf32>, vector<7x8xf32>, vector<7x8xf32> -> vector<7x8xf32>
    %217 = tpu.concatenate %204, %208, %212, %216 in 1 : vector<7x8xf32>, vector<7x8xf32>, vector<7x8xf32>, vector<7x8xf32> -> vector<7x32xf32>
    %c0_102 = arith.constant 0 : index
    %c0_103 = arith.constant 0 : index
    %c0_104 = arith.constant 0 : index
    %218 = vector.load %arg21[%c0_102, %c0_103, %c0_104] : memref<2x32x32xf32, #tpu.memory_space<vmem>>, vector<1x32x32xf32>
    %219 = vector.shape_cast %218 : vector<1x32x32xf32> to vector<32x32xf32>
    %cst_105 = arith.constant dense<0.000000e+00> : vector<7x32xf32>
    %220 = tpu.matmul %217, %219, %cst_105 {dimension_numbers = #tpu.dot_dimension_numbers<[1], [0], [0], [1], [0, 0, 1, 1], [], []>} : vector<7x32xf32>, vector<32x32xf32>, vector<7x32xf32> -> vector<7x32xf32>
    %221 = arith.addf %89, %220 : vector<7x32xf32>
    %c0_106 = arith.constant 0 : index
    %c0_107 = arith.constant 0 : index
    %c0_108 = arith.constant 0 : index
    %222 = vector.load %arg22[%c0_106, %c0_107, %c0_108] : memref<2x1x32xf32, #tpu.memory_space<vmem>>, vector<1x1x32xf32>
    %223 = vector.shape_cast %222 : vector<1x1x32xf32> to vector<1x32xf32>
    %224 = vector.broadcast %223 : vector<1x32xf32> to vector<7x32xf32>
    %225 = arith.addf %221, %224 : vector<7x32xf32>
    %c0_109 = arith.constant 0 : index
    %c0_110 = arith.constant 0 : index
    %c0_111 = arith.constant 0 : index
    %226 = vector.load %arg23[%c0_109, %c0_110, %c0_111] : memref<2x1x32xf32, #tpu.memory_space<vmem>>, vector<1x1x32xf32>
    %227 = vector.shape_cast %226 : vector<1x1x32xf32> to vector<1x32xf32>
    %c0_112 = arith.constant 0 : index
    %c0_113 = arith.constant 0 : index
    %c0_114 = arith.constant 0 : index
    %228 = vector.load %arg24[%c0_112, %c0_113, %c0_114] : memref<2x1x32xf32, #tpu.memory_space<vmem>>, vector<1x1x32xf32>
    %229 = vector.shape_cast %228 : vector<1x1x32xf32> to vector<1x32xf32>
    %cst_115 = arith.constant dense<0.000000e+00> : vector<7xf32>
    %230 = vector.multi_reduction <add>, %225, %cst_115 [1] : vector<7x32xf32> to vector<7xf32>
    %231 = vector.shape_cast %230 : vector<7xf32> to vector<7x1xf32>
    %cst_116 = arith.constant 3.200000e+01 : f32
    %232 = vector.broadcast %cst_116 : f32 to vector<7x1xf32>
    %233 = arith.divf %231, %232 : vector<7x1xf32>
    %234 = vector.broadcast %233 : vector<7x1xf32> to vector<7x32xf32>
    %235 = arith.subf %225, %234 : vector<7x32xf32>
    %236 = arith.mulf %235, %235 : vector<7x32xf32>
    %cst_117 = arith.constant dense<0.000000e+00> : vector<7xf32>
    %237 = vector.multi_reduction <add>, %236, %cst_117 [1] : vector<7x32xf32> to vector<7xf32>
    %238 = vector.shape_cast %237 : vector<7xf32> to vector<7x1xf32>
    %cst_118 = arith.constant 3.200000e+01 : f32
    %239 = vector.broadcast %cst_118 : f32 to vector<7x1xf32>
    %240 = arith.divf %238, %239 : vector<7x1xf32>
    %241 = vector.broadcast %233 : vector<7x1xf32> to vector<7x32xf32>
    %242 = arith.subf %225, %241 : vector<7x32xf32>
    %cst_119 = arith.constant 6.100000e-05 : f32
    %243 = vector.broadcast %cst_119 : f32 to vector<7x1xf32>
    %244 = arith.addf %240, %243 : vector<7x1xf32>
    %245 = math.rsqrt %244 : vector<7x1xf32>
    %246 = vector.broadcast %245 : vector<7x1xf32> to vector<7x32xf32>
    %247 = arith.mulf %242, %246 : vector<7x32xf32>
    %248 = vector.broadcast %227 : vector<1x32xf32> to vector<7x32xf32>
    %249 = arith.mulf %247, %248 : vector<7x32xf32>
    %250 = vector.broadcast %229 : vector<1x32xf32> to vector<7x32xf32>
    %251 = arith.addf %249, %250 : vector<7x32xf32>
    %c0_120 = arith.constant 0 : index
    %c0_121 = arith.constant 0 : index
    %c0_122 = arith.constant 0 : index
    %252 = vector.load %arg25[%c0_120, %c0_121, %c0_122] : memref<2x32x64xf32, #tpu.memory_space<vmem>>, vector<1x32x64xf32>
    %253 = vector.shape_cast %252 : vector<1x32x64xf32> to vector<32x64xf32>
    %cst_123 = arith.constant dense<0.000000e+00> : vector<7x64xf32>
    %254 = tpu.matmul %251, %253, %cst_123 {dimension_numbers = #tpu.dot_dimension_numbers<[1], [0], [0], [1], [0, 0, 1, 1], [], []>} : vector<7x32xf32>, vector<32x64xf32>, vector<7x64xf32> -> vector<7x64xf32>
    %c0_124 = arith.constant 0 : index
    %c0_125 = arith.constant 0 : index
    %c0_126 = arith.constant 0 : index
    %255 = vector.load %arg26[%c0_124, %c0_125, %c0_126] : memref<2x1x64xf32, #tpu.memory_space<vmem>>, vector<1x1x64xf32>
    %256 = vector.shape_cast %255 : vector<1x1x64xf32> to vector<1x64xf32>
    %257 = vector.broadcast %256 : vector<1x64xf32> to vector<7x64xf32>
    %258 = arith.addf %254, %257 : vector<7x64xf32>
    %259 = vector.extract_strided_slice %258 {offsets = [0, 0], sizes = [7, 32], strides = [1, 1]} : vector<7x64xf32> to vector<7x32xf32>
    %260 = vector.extract_strided_slice %258 {offsets = [0, 32], sizes = [7, 32], strides = [1, 1]} : vector<7x64xf32> to vector<7x32xf32>
    %261 = arith.negf %260 : vector<7x32xf32>
    %262 = math.exp %261 : vector<7x32xf32>
    %cst_127 = arith.constant 1.000000e+00 : f32
    %263 = vector.broadcast %cst_127 : f32 to vector<7x32xf32>
    %264 = arith.addf %263, %262 : vector<7x32xf32>
    %265 = arith.divf %263, %264 : vector<7x32xf32>
    %266 = arith.mulf %259, %265 : vector<7x32xf32>
    %cst_128 = arith.constant 0.000000e+00 : f32
    %267 = vector.broadcast %cst_128 : f32 to vector<3x32xf32>
    %268 = tpu.concatenate %267, %266, %267 in 0 : vector<3x32xf32>, vector<7x32xf32>, vector<3x32xf32> -> vector<13x32xf32>
    %c0_129 = arith.constant 0 : index
    %c0_130 = arith.constant 0 : index
    %c0_131 = arith.constant 0 : index
    %269 = vector.load %arg27[%c0_129, %c0_130, %c0_131] : memref<2x7x32xf32, #tpu.memory_space<vmem>>, vector<1x7x32xf32>
    %270 = vector.shape_cast %269 : vector<1x7x32xf32> to vector<7x32xf32>
    %cst_132 = arith.constant 0.000000e+00 : f32
    %271 = vector.broadcast %cst_132 : f32 to vector<7x32xf32>
    %c0_133 = arith.constant 0 : index
    %c0_134 = arith.constant 0 : index
    %c0_135 = arith.constant 0 : index
    %272 = vector.load %arg28[%c0_133, %c0_134, %c0_135] : memref<2x1x32xf32, #tpu.memory_space<vmem>>, vector<1x1x32xf32>
    %273 = vector.shape_cast %272 : vector<1x1x32xf32> to vector<1x32xf32>
    %274 = vector.broadcast %273 : vector<1x32xf32> to vector<7x32xf32>
    %275 = arith.addf %271, %274 : vector<7x32xf32>
    %276 = vector.extract_strided_slice %268 {offsets = [0, 0], sizes = [7, 32], strides = [1, 1]} : vector<13x32xf32> to vector<7x32xf32>
    %277 = vector.extract_strided_slice %270 {offsets = [0, 0], sizes = [1, 32], strides = [1, 1]} : vector<7x32xf32> to vector<1x32xf32>
    %278 = vector.broadcast %277 : vector<1x32xf32> to vector<7x32xf32>
    %279 = arith.mulf %276, %278 : vector<7x32xf32>
    %280 = arith.addf %275, %279 : vector<7x32xf32>
    %281 = vector.extract_strided_slice %268 {offsets = [1, 0], sizes = [7, 32], strides = [1, 1]} : vector<13x32xf32> to vector<7x32xf32>
    %282 = vector.extract_strided_slice %270 {offsets = [1, 0], sizes = [1, 32], strides = [1, 1]} : vector<7x32xf32> to vector<1x32xf32>
    %283 = vector.broadcast %282 : vector<1x32xf32> to vector<7x32xf32>
    %284 = arith.mulf %281, %283 : vector<7x32xf32>
    %285 = arith.addf %280, %284 : vector<7x32xf32>
    %286 = vector.extract_strided_slice %268 {offsets = [2, 0], sizes = [7, 32], strides = [1, 1]} : vector<13x32xf32> to vector<7x32xf32>
    %287 = vector.extract_strided_slice %270 {offsets = [2, 0], sizes = [1, 32], strides = [1, 1]} : vector<7x32xf32> to vector<1x32xf32>
    %288 = vector.broadcast %287 : vector<1x32xf32> to vector<7x32xf32>
    %289 = arith.mulf %286, %288 : vector<7x32xf32>
    %290 = arith.addf %285, %289 : vector<7x32xf32>
    %291 = vector.extract_strided_slice %268 {offsets = [3, 0], sizes = [7, 32], strides = [1, 1]} : vector<13x32xf32> to vector<7x32xf32>
    %292 = vector.extract_strided_slice %270 {offsets = [3, 0], sizes = [1, 32], strides = [1, 1]} : vector<7x32xf32> to vector<1x32xf32>
    %293 = vector.broadcast %292 : vector<1x32xf32> to vector<7x32xf32>
    %294 = arith.mulf %291, %293 : vector<7x32xf32>
    %295 = arith.addf %290, %294 : vector<7x32xf32>
    %296 = vector.extract_strided_slice %268 {offsets = [4, 0], sizes = [7, 32], strides = [1, 1]} : vector<13x32xf32> to vector<7x32xf32>
    %297 = vector.extract_strided_slice %270 {offsets = [4, 0], sizes = [1, 32], strides = [1, 1]} : vector<7x32xf32> to vector<1x32xf32>
    %298 = vector.broadcast %297 : vector<1x32xf32> to vector<7x32xf32>
    %299 = arith.mulf %296, %298 : vector<7x32xf32>
    %300 = arith.addf %295, %299 : vector<7x32xf32>
    %301 = vector.extract_strided_slice %268 {offsets = [5, 0], sizes = [7, 32], strides = [1, 1]} : vector<13x32xf32> to vector<7x32xf32>
    %302 = vector.extract_strided_slice %270 {offsets = [5, 0], sizes = [1, 32], strides = [1, 1]} : vector<7x32xf32> to vector<1x32xf32>
    %303 = vector.broadcast %302 : vector<1x32xf32> to vector<7x32xf32>
    %304 = arith.mulf %301, %303 : vector<7x32xf32>
    %305 = arith.addf %300, %304 : vector<7x32xf32>
    %306 = vector.extract_strided_slice %268 {offsets = [6, 0], sizes = [7, 32], strides = [1, 1]} : vector<13x32xf32> to vector<7x32xf32>
    %307 = vector.extract_strided_slice %270 {offsets = [6, 0], sizes = [1, 32], strides = [1, 1]} : vector<7x32xf32> to vector<1x32xf32>
    %308 = vector.broadcast %307 : vector<1x32xf32> to vector<7x32xf32>
    %309 = arith.mulf %306, %308 : vector<7x32xf32>
    %310 = arith.addf %305, %309 : vector<7x32xf32>
    %c0_136 = arith.constant 0 : index
    %c0_137 = arith.constant 0 : index
    %c0_138 = arith.constant 0 : index
    %311 = vector.load %arg29[%c0_136, %c0_137, %c0_138] : memref<2x1x32xf32, #tpu.memory_space<vmem>>, vector<1x1x32xf32>
    %312 = vector.shape_cast %311 : vector<1x1x32xf32> to vector<1x32xf32>
    %313 = vector.broadcast %312 : vector<1x32xf32> to vector<7x32xf32>
    %314 = arith.mulf %310, %313 : vector<7x32xf32>
    %c0_139 = arith.constant 0 : index
    %c0_140 = arith.constant 0 : index
    %c0_141 = arith.constant 0 : index
    %315 = vector.load %arg30[%c0_139, %c0_140, %c0_141] : memref<2x1x32xf32, #tpu.memory_space<vmem>>, vector<1x1x32xf32>
    %316 = vector.shape_cast %315 : vector<1x1x32xf32> to vector<1x32xf32>
    %317 = vector.broadcast %316 : vector<1x32xf32> to vector<7x32xf32>
    %318 = arith.addf %314, %317 : vector<7x32xf32>
    %319 = arith.negf %318 : vector<7x32xf32>
    %320 = math.exp %319 : vector<7x32xf32>
    %cst_142 = arith.constant 1.000000e+00 : f32
    %321 = vector.broadcast %cst_142 : f32 to vector<7x32xf32>
    %322 = arith.addf %321, %320 : vector<7x32xf32>
    %323 = arith.divf %321, %322 : vector<7x32xf32>
    %324 = arith.mulf %318, %323 : vector<7x32xf32>
    %c0_143 = arith.constant 0 : index
    %c0_144 = arith.constant 0 : index
    %c0_145 = arith.constant 0 : index
    %325 = vector.load %arg31[%c0_143, %c0_144, %c0_145] : memref<2x32x32xf32, #tpu.memory_space<vmem>>, vector<1x32x32xf32>
    %326 = vector.shape_cast %325 : vector<1x32x32xf32> to vector<32x32xf32>
    %cst_146 = arith.constant dense<0.000000e+00> : vector<7x32xf32>
    %327 = tpu.matmul %324, %326, %cst_146 {dimension_numbers = #tpu.dot_dimension_numbers<[1], [0], [0], [1], [0, 0, 1, 1], [], []>} : vector<7x32xf32>, vector<32x32xf32>, vector<7x32xf32> -> vector<7x32xf32>
    %328 = arith.addf %225, %327 : vector<7x32xf32>
    %c0_147 = arith.constant 0 : index
    %c0_148 = arith.constant 0 : index
    %c0_149 = arith.constant 0 : index
    %329 = vector.load %arg32[%c0_147, %c0_148, %c0_149] : memref<2x1x32xf32, #tpu.memory_space<vmem>>, vector<1x1x32xf32>
    %330 = vector.shape_cast %329 : vector<1x1x32xf32> to vector<1x32xf32>
    %331 = vector.broadcast %330 : vector<1x32xf32> to vector<7x32xf32>
    %332 = arith.addf %328, %331 : vector<7x32xf32>
    %c0_150 = arith.constant 0 : index
    %c0_151 = arith.constant 0 : index
    %c0_152 = arith.constant 0 : index
    %333 = vector.load %arg33[%c0_150, %c0_151, %c0_152] : memref<2x1x32xf32, #tpu.memory_space<vmem>>, vector<1x1x32xf32>
    %334 = vector.shape_cast %333 : vector<1x1x32xf32> to vector<1x32xf32>
    %c0_153 = arith.constant 0 : index
    %c0_154 = arith.constant 0 : index
    %c0_155 = arith.constant 0 : index
    %335 = vector.load %arg34[%c0_153, %c0_154, %c0_155] : memref<2x1x32xf32, #tpu.memory_space<vmem>>, vector<1x1x32xf32>
    %336 = vector.shape_cast %335 : vector<1x1x32xf32> to vector<1x32xf32>
    %c0_156 = arith.constant 0 : index
    %c0_157 = arith.constant 0 : index
    %c0_158 = arith.constant 0 : index
    %337 = vector.load %arg35[%c0_156, %c0_157, %c0_158] : memref<2x32x128xf32, #tpu.memory_space<vmem>>, vector<1x32x128xf32>
    %338 = vector.shape_cast %337 : vector<1x32x128xf32> to vector<32x128xf32>
    %c0_159 = arith.constant 0 : index
    %c0_160 = arith.constant 0 : index
    %c0_161 = arith.constant 0 : index
    %339 = vector.load %arg36[%c0_159, %c0_160, %c0_161] : memref<2x1x128xf32, #tpu.memory_space<vmem>>, vector<1x1x128xf32>
    %340 = vector.shape_cast %339 : vector<1x1x128xf32> to vector<1x128xf32>
    %c0_162 = arith.constant 0 : index
    %c0_163 = arith.constant 0 : index
    %c0_164 = arith.constant 0 : index
    %341 = vector.load %arg37[%c0_162, %c0_163, %c0_164] : memref<2x128x32xf32, #tpu.memory_space<vmem>>, vector<1x128x32xf32>
    %342 = vector.shape_cast %341 : vector<1x128x32xf32> to vector<128x32xf32>
    %c0_165 = arith.constant 0 : index
    %c0_166 = arith.constant 0 : index
    %c0_167 = arith.constant 0 : index
    %343 = vector.load %arg38[%c0_165, %c0_166, %c0_167] : memref<2x1x32xf32, #tpu.memory_space<vmem>>, vector<1x1x32xf32>
    %344 = vector.shape_cast %343 : vector<1x1x32xf32> to vector<1x32xf32>
    %cst_168 = arith.constant dense<0.000000e+00> : vector<7xf32>
    %345 = vector.multi_reduction <add>, %332, %cst_168 [1] : vector<7x32xf32> to vector<7xf32>
    %346 = vector.shape_cast %345 : vector<7xf32> to vector<7x1xf32>
    %cst_169 = arith.constant 3.200000e+01 : f32
    %347 = vector.broadcast %cst_169 : f32 to vector<7x1xf32>
    %348 = arith.divf %346, %347 : vector<7x1xf32>
    %349 = vector.broadcast %348 : vector<7x1xf32> to vector<7x32xf32>
    %350 = arith.subf %332, %349 : vector<7x32xf32>
    %351 = arith.mulf %350, %350 : vector<7x32xf32>
    %cst_170 = arith.constant dense<0.000000e+00> : vector<7xf32>
    %352 = vector.multi_reduction <add>, %351, %cst_170 [1] : vector<7x32xf32> to vector<7xf32>
    %353 = vector.shape_cast %352 : vector<7xf32> to vector<7x1xf32>
    %cst_171 = arith.constant 3.200000e+01 : f32
    %354 = vector.broadcast %cst_171 : f32 to vector<7x1xf32>
    %355 = arith.divf %353, %354 : vector<7x1xf32>
    %356 = vector.broadcast %348 : vector<7x1xf32> to vector<7x32xf32>
    %357 = arith.subf %332, %356 : vector<7x32xf32>
    %cst_172 = arith.constant 6.100000e-05 : f32
    %358 = vector.broadcast %cst_172 : f32 to vector<7x1xf32>
    %359 = arith.addf %355, %358 : vector<7x1xf32>
    %360 = math.rsqrt %359 : vector<7x1xf32>
    %361 = vector.broadcast %360 : vector<7x1xf32> to vector<7x32xf32>
    %362 = arith.mulf %357, %361 : vector<7x32xf32>
    %363 = vector.broadcast %334 : vector<1x32xf32> to vector<7x32xf32>
    %364 = arith.mulf %362, %363 : vector<7x32xf32>
    %365 = vector.broadcast %336 : vector<1x32xf32> to vector<7x32xf32>
    %366 = arith.addf %364, %365 : vector<7x32xf32>
    %cst_173 = arith.constant dense<0.000000e+00> : vector<7x128xf32>
    %367 = tpu.matmul %366, %338, %cst_173 {dimension_numbers = #tpu.dot_dimension_numbers<[1], [0], [0], [1], [0, 0, 1, 1], [], []>} : vector<7x32xf32>, vector<32x128xf32>, vector<7x128xf32> -> vector<7x128xf32>
    %368 = vector.broadcast %340 : vector<1x128xf32> to vector<7x128xf32>
    %369 = arith.addf %367, %368 : vector<7x128xf32>
    %370 = arith.negf %369 : vector<7x128xf32>
    %371 = math.exp %370 : vector<7x128xf32>
    %cst_174 = arith.constant 1.000000e+00 : f32
    %372 = vector.broadcast %cst_174 : f32 to vector<7x128xf32>
    %373 = arith.addf %372, %371 : vector<7x128xf32>
    %374 = arith.divf %372, %373 : vector<7x128xf32>
    %375 = arith.mulf %369, %374 : vector<7x128xf32>
    %cst_175 = arith.constant dense<0.000000e+00> : vector<7x32xf32>
    %376 = tpu.matmul %375, %342, %cst_175 {dimension_numbers = #tpu.dot_dimension_numbers<[1], [0], [0], [1], [0, 0, 1, 1], [], []>} : vector<7x128xf32>, vector<128x32xf32>, vector<7x32xf32> -> vector<7x32xf32>
    %377 = vector.broadcast %344 : vector<1x32xf32> to vector<7x32xf32>
    %378 = arith.addf %376, %377 : vector<7x32xf32>
    %cst_176 = arith.constant 5.000000e-01 : f32
    %379 = vector.broadcast %cst_176 : f32 to vector<7x32xf32>
    %380 = arith.mulf %379, %378 : vector<7x32xf32>
    %381 = arith.addf %332, %380 : vector<7x32xf32>
    %c0_177 = arith.constant 0 : index
    %c0_178 = arith.constant 0 : index
    %c0_179 = arith.constant 0 : index
    %382 = vector.load %arg39[%c0_177, %c0_178, %c0_179] : memref<2x1x32xf32, #tpu.memory_space<vmem>>, vector<1x1x32xf32>
    %383 = vector.shape_cast %382 : vector<1x1x32xf32> to vector<1x32xf32>
    %c0_180 = arith.constant 0 : index
    %c0_181 = arith.constant 0 : index
    %c0_182 = arith.constant 0 : index
    %384 = vector.load %arg40[%c0_180, %c0_181, %c0_182] : memref<2x1x32xf32, #tpu.memory_space<vmem>>, vector<1x1x32xf32>
    %385 = vector.shape_cast %384 : vector<1x1x32xf32> to vector<1x32xf32>
    %cst_183 = arith.constant dense<0.000000e+00> : vector<7xf32>
    %386 = vector.multi_reduction <add>, %381, %cst_183 [1] : vector<7x32xf32> to vector<7xf32>
    %387 = vector.shape_cast %386 : vector<7xf32> to vector<7x1xf32>
    %cst_184 = arith.constant 3.200000e+01 : f32
    %388 = vector.broadcast %cst_184 : f32 to vector<7x1xf32>
    %389 = arith.divf %387, %388 : vector<7x1xf32>
    %390 = vector.broadcast %389 : vector<7x1xf32> to vector<7x32xf32>
    %391 = arith.subf %381, %390 : vector<7x32xf32>
    %392 = arith.mulf %391, %391 : vector<7x32xf32>
    %cst_185 = arith.constant dense<0.000000e+00> : vector<7xf32>
    %393 = vector.multi_reduction <add>, %392, %cst_185 [1] : vector<7x32xf32> to vector<7xf32>
    %394 = vector.shape_cast %393 : vector<7xf32> to vector<7x1xf32>
    %cst_186 = arith.constant 3.200000e+01 : f32
    %395 = vector.broadcast %cst_186 : f32 to vector<7x1xf32>
    %396 = arith.divf %394, %395 : vector<7x1xf32>
    %397 = vector.broadcast %389 : vector<7x1xf32> to vector<7x32xf32>
    %398 = arith.subf %381, %397 : vector<7x32xf32>
    %cst_187 = arith.constant 6.100000e-05 : f32
    %399 = vector.broadcast %cst_187 : f32 to vector<7x1xf32>
    %400 = arith.addf %396, %399 : vector<7x1xf32>
    %401 = math.rsqrt %400 : vector<7x1xf32>
    %402 = vector.broadcast %401 : vector<7x1xf32> to vector<7x32xf32>
    %403 = arith.mulf %398, %402 : vector<7x32xf32>
    %404 = vector.broadcast %383 : vector<1x32xf32> to vector<7x32xf32>
    %405 = arith.mulf %403, %404 : vector<7x32xf32>
    %406 = vector.broadcast %385 : vector<1x32xf32> to vector<7x32xf32>
    %407 = arith.addf %405, %406 : vector<7x32xf32>
    %c1_188 = arith.constant 1 : index
    %c0_189 = arith.constant 0 : index
    %c0_190 = arith.constant 0 : index
    %408 = vector.load %arg8[%c1_188, %c0_189, %c0_190] : memref<2x1x32xf32, #tpu.memory_space<vmem>>, vector<1x1x32xf32>
    %409 = vector.shape_cast %408 : vector<1x1x32xf32> to vector<1x32xf32>
    %c1_191 = arith.constant 1 : index
    %c0_192 = arith.constant 0 : index
    %c0_193 = arith.constant 0 : index
    %410 = vector.load %arg9[%c1_191, %c0_192, %c0_193] : memref<2x1x32xf32, #tpu.memory_space<vmem>>, vector<1x1x32xf32>
    %411 = vector.shape_cast %410 : vector<1x1x32xf32> to vector<1x32xf32>
    %c1_194 = arith.constant 1 : index
    %c0_195 = arith.constant 0 : index
    %c0_196 = arith.constant 0 : index
    %412 = vector.load %arg10[%c1_194, %c0_195, %c0_196] : memref<2x32x128xf32, #tpu.memory_space<vmem>>, vector<1x32x128xf32>
    %413 = vector.shape_cast %412 : vector<1x32x128xf32> to vector<32x128xf32>
    %c1_197 = arith.constant 1 : index
    %c0_198 = arith.constant 0 : index
    %c0_199 = arith.constant 0 : index
    %414 = vector.load %arg11[%c1_197, %c0_198, %c0_199] : memref<2x1x128xf32, #tpu.memory_space<vmem>>, vector<1x1x128xf32>
    %415 = vector.shape_cast %414 : vector<1x1x128xf32> to vector<1x128xf32>
    %c1_200 = arith.constant 1 : index
    %c0_201 = arith.constant 0 : index
    %c0_202 = arith.constant 0 : index
    %416 = vector.load %arg12[%c1_200, %c0_201, %c0_202] : memref<2x128x32xf32, #tpu.memory_space<vmem>>, vector<1x128x32xf32>
    %417 = vector.shape_cast %416 : vector<1x128x32xf32> to vector<128x32xf32>
    %c1_203 = arith.constant 1 : index
    %c0_204 = arith.constant 0 : index
    %c0_205 = arith.constant 0 : index
    %418 = vector.load %arg13[%c1_203, %c0_204, %c0_205] : memref<2x1x32xf32, #tpu.memory_space<vmem>>, vector<1x1x32xf32>
    %419 = vector.shape_cast %418 : vector<1x1x32xf32> to vector<1x32xf32>
    %cst_206 = arith.constant dense<0.000000e+00> : vector<7xf32>
    %420 = vector.multi_reduction <add>, %407, %cst_206 [1] : vector<7x32xf32> to vector<7xf32>
    %421 = vector.shape_cast %420 : vector<7xf32> to vector<7x1xf32>
    %cst_207 = arith.constant 3.200000e+01 : f32
    %422 = vector.broadcast %cst_207 : f32 to vector<7x1xf32>
    %423 = arith.divf %421, %422 : vector<7x1xf32>
    %424 = vector.broadcast %423 : vector<7x1xf32> to vector<7x32xf32>
    %425 = arith.subf %407, %424 : vector<7x32xf32>
    %426 = arith.mulf %425, %425 : vector<7x32xf32>
    %cst_208 = arith.constant dense<0.000000e+00> : vector<7xf32>
    %427 = vector.multi_reduction <add>, %426, %cst_208 [1] : vector<7x32xf32> to vector<7xf32>
    %428 = vector.shape_cast %427 : vector<7xf32> to vector<7x1xf32>
    %cst_209 = arith.constant 3.200000e+01 : f32
    %429 = vector.broadcast %cst_209 : f32 to vector<7x1xf32>
    %430 = arith.divf %428, %429 : vector<7x1xf32>
    %431 = vector.broadcast %423 : vector<7x1xf32> to vector<7x32xf32>
    %432 = arith.subf %407, %431 : vector<7x32xf32>
    %cst_210 = arith.constant 6.100000e-05 : f32
    %433 = vector.broadcast %cst_210 : f32 to vector<7x1xf32>
    %434 = arith.addf %430, %433 : vector<7x1xf32>
    %435 = math.rsqrt %434 : vector<7x1xf32>
    %436 = vector.broadcast %435 : vector<7x1xf32> to vector<7x32xf32>
    %437 = arith.mulf %432, %436 : vector<7x32xf32>
    %438 = vector.broadcast %409 : vector<1x32xf32> to vector<7x32xf32>
    %439 = arith.mulf %437, %438 : vector<7x32xf32>
    %440 = vector.broadcast %411 : vector<1x32xf32> to vector<7x32xf32>
    %441 = arith.addf %439, %440 : vector<7x32xf32>
    %cst_211 = arith.constant dense<0.000000e+00> : vector<7x128xf32>
    %442 = tpu.matmul %441, %413, %cst_211 {dimension_numbers = #tpu.dot_dimension_numbers<[1], [0], [0], [1], [0, 0, 1, 1], [], []>} : vector<7x32xf32>, vector<32x128xf32>, vector<7x128xf32> -> vector<7x128xf32>
    %443 = vector.broadcast %415 : vector<1x128xf32> to vector<7x128xf32>
    %444 = arith.addf %442, %443 : vector<7x128xf32>
    %445 = arith.negf %444 : vector<7x128xf32>
    %446 = math.exp %445 : vector<7x128xf32>
    %cst_212 = arith.constant 1.000000e+00 : f32
    %447 = vector.broadcast %cst_212 : f32 to vector<7x128xf32>
    %448 = arith.addf %447, %446 : vector<7x128xf32>
    %449 = arith.divf %447, %448 : vector<7x128xf32>
    %450 = arith.mulf %444, %449 : vector<7x128xf32>
    %cst_213 = arith.constant dense<0.000000e+00> : vector<7x32xf32>
    %451 = tpu.matmul %450, %417, %cst_213 {dimension_numbers = #tpu.dot_dimension_numbers<[1], [0], [0], [1], [0, 0, 1, 1], [], []>} : vector<7x128xf32>, vector<128x32xf32>, vector<7x32xf32> -> vector<7x32xf32>
    %452 = vector.broadcast %419 : vector<1x32xf32> to vector<7x32xf32>
    %453 = arith.addf %451, %452 : vector<7x32xf32>
    %cst_214 = arith.constant 5.000000e-01 : f32
    %454 = vector.broadcast %cst_214 : f32 to vector<7x32xf32>
    %455 = arith.mulf %454, %453 : vector<7x32xf32>
    %456 = arith.addf %407, %455 : vector<7x32xf32>
    %c1_215 = arith.constant 1 : index
    %c0_216 = arith.constant 0 : index
    %c0_217 = arith.constant 0 : index
    %457 = vector.load %arg14[%c1_215, %c0_216, %c0_217] : memref<2x1x32xf32, #tpu.memory_space<vmem>>, vector<1x1x32xf32>
    %458 = vector.shape_cast %457 : vector<1x1x32xf32> to vector<1x32xf32>
    %c1_218 = arith.constant 1 : index
    %c0_219 = arith.constant 0 : index
    %c0_220 = arith.constant 0 : index
    %459 = vector.load %arg15[%c1_218, %c0_219, %c0_220] : memref<2x1x32xf32, #tpu.memory_space<vmem>>, vector<1x1x32xf32>
    %460 = vector.shape_cast %459 : vector<1x1x32xf32> to vector<1x32xf32>
    %cst_221 = arith.constant dense<0.000000e+00> : vector<7xf32>
    %461 = vector.multi_reduction <add>, %456, %cst_221 [1] : vector<7x32xf32> to vector<7xf32>
    %462 = vector.shape_cast %461 : vector<7xf32> to vector<7x1xf32>
    %cst_222 = arith.constant 3.200000e+01 : f32
    %463 = vector.broadcast %cst_222 : f32 to vector<7x1xf32>
    %464 = arith.divf %462, %463 : vector<7x1xf32>
    %465 = vector.broadcast %464 : vector<7x1xf32> to vector<7x32xf32>
    %466 = arith.subf %456, %465 : vector<7x32xf32>
    %467 = arith.mulf %466, %466 : vector<7x32xf32>
    %cst_223 = arith.constant dense<0.000000e+00> : vector<7xf32>
    %468 = vector.multi_reduction <add>, %467, %cst_223 [1] : vector<7x32xf32> to vector<7xf32>
    %469 = vector.shape_cast %468 : vector<7xf32> to vector<7x1xf32>
    %cst_224 = arith.constant 3.200000e+01 : f32
    %470 = vector.broadcast %cst_224 : f32 to vector<7x1xf32>
    %471 = arith.divf %469, %470 : vector<7x1xf32>
    %472 = vector.broadcast %464 : vector<7x1xf32> to vector<7x32xf32>
    %473 = arith.subf %456, %472 : vector<7x32xf32>
    %cst_225 = arith.constant 6.100000e-05 : f32
    %474 = vector.broadcast %cst_225 : f32 to vector<7x1xf32>
    %475 = arith.addf %471, %474 : vector<7x1xf32>
    %476 = math.rsqrt %475 : vector<7x1xf32>
    %477 = vector.broadcast %476 : vector<7x1xf32> to vector<7x32xf32>
    %478 = arith.mulf %473, %477 : vector<7x32xf32>
    %479 = vector.broadcast %458 : vector<1x32xf32> to vector<7x32xf32>
    %480 = arith.mulf %478, %479 : vector<7x32xf32>
    %481 = vector.broadcast %460 : vector<1x32xf32> to vector<7x32xf32>
    %482 = arith.addf %480, %481 : vector<7x32xf32>
    %c1_226 = arith.constant 1 : index
    %c0_227 = arith.constant 0 : index
    %c0_228 = arith.constant 0 : index
    %483 = vector.load %arg16[%c1_226, %c0_227, %c0_228] : memref<2x32x96xf32, #tpu.memory_space<vmem>>, vector<1x32x96xf32>
    %484 = vector.shape_cast %483 : vector<1x32x96xf32> to vector<32x96xf32>
    %cst_229 = arith.constant dense<0.000000e+00> : vector<7x96xf32>
    %485 = tpu.matmul %482, %484, %cst_229 {dimension_numbers = #tpu.dot_dimension_numbers<[1], [0], [0], [1], [0, 0, 1, 1], [], []>} : vector<7x32xf32>, vector<32x96xf32>, vector<7x96xf32> -> vector<7x96xf32>
    %c1_230 = arith.constant 1 : index
    %c0_231 = arith.constant 0 : index
    %c0_232 = arith.constant 0 : index
    %486 = vector.load %arg17[%c1_230, %c0_231, %c0_232] : memref<2x1x96xf32, #tpu.memory_space<vmem>>, vector<1x1x96xf32>
    %487 = vector.shape_cast %486 : vector<1x1x96xf32> to vector<1x96xf32>
    %488 = vector.broadcast %487 : vector<1x96xf32> to vector<7x96xf32>
    %489 = arith.addf %485, %488 : vector<7x96xf32>
    %c1_233 = arith.constant 1 : index
    %c0_234 = arith.constant 0 : index
    %c0_235 = arith.constant 0 : index
    %490 = vector.load %arg18[%c1_233, %c0_234, %c0_235] : memref<2x32x32xf32, #tpu.memory_space<vmem>>, vector<1x32x32xf32>
    %491 = vector.shape_cast %490 : vector<1x32x32xf32> to vector<32x32xf32>
    %cst_236 = arith.constant dense<0.000000e+00> : vector<7x32xf32>
    %492 = tpu.matmul %38, %491, %cst_236 {dimension_numbers = #tpu.dot_dimension_numbers<[1], [0], [0], [1], [0, 0, 1, 1], [], []>} : vector<7x32xf32>, vector<32x32xf32>, vector<7x32xf32> -> vector<7x32xf32>
    %493 = vector.extract_strided_slice %489 {offsets = [0, 0], sizes = [7, 32], strides = [1, 1]} : vector<7x96xf32> to vector<7x32xf32>
    %494 = vector.extract_strided_slice %489 {offsets = [0, 32], sizes = [7, 32], strides = [1, 1]} : vector<7x96xf32> to vector<7x32xf32>
    %495 = vector.extract_strided_slice %489 {offsets = [0, 64], sizes = [7, 32], strides = [1, 1]} : vector<7x96xf32> to vector<7x32xf32>
    %c1_237 = arith.constant 1 : index
    %c0_238 = arith.constant 0 : index
    %c0_239 = arith.constant 0 : index
    %496 = vector.load %arg19[%c1_237, %c0_238, %c0_239] : memref<2x1x32xf32, #tpu.memory_space<vmem>>, vector<1x1x32xf32>
    %497 = vector.shape_cast %496 : vector<1x1x32xf32> to vector<1x32xf32>
    %498 = vector.broadcast %497 : vector<1x32xf32> to vector<7x32xf32>
    %499 = arith.addf %493, %498 : vector<7x32xf32>
    %cst_240 = arith.constant 0.176776692 : f32
    %500 = vector.broadcast %cst_240 : f32 to vector<7x32xf32>
    %501 = arith.mulf %499, %500 : vector<7x32xf32>
    %c1_241 = arith.constant 1 : index
    %c0_242 = arith.constant 0 : index
    %c0_243 = arith.constant 0 : index
    %502 = vector.load %arg20[%c1_241, %c0_242, %c0_243] : memref<2x1x32xf32, #tpu.memory_space<vmem>>, vector<1x1x32xf32>
    %503 = vector.shape_cast %502 : vector<1x1x32xf32> to vector<1x32xf32>
    %504 = vector.broadcast %503 : vector<1x32xf32> to vector<7x32xf32>
    %505 = arith.addf %493, %504 : vector<7x32xf32>
    %cst_244 = arith.constant 0.176776692 : f32
    %506 = vector.broadcast %cst_244 : f32 to vector<7x32xf32>
    %507 = arith.mulf %505, %506 : vector<7x32xf32>
    %508 = vector.extract_strided_slice %501 {offsets = [0, 0], sizes = [7, 8], strides = [1, 1]} : vector<7x32xf32> to vector<7x8xf32>
    %509 = vector.extract_strided_slice %494 {offsets = [0, 0], sizes = [7, 8], strides = [1, 1]} : vector<7x32xf32> to vector<7x8xf32>
    %cst_245 = arith.constant dense<0.000000e+00> : vector<7x7xf32>
    %510 = tpu.matmul %508, %509, %cst_245 {dimension_numbers = #tpu.dot_dimension_numbers<[1], [1], [0], [0], [0, 0, 1, 0], [], []>} : vector<7x8xf32>, vector<7x8xf32>, vector<7x7xf32> -> vector<7x7xf32>
    %511 = vector.extract_strided_slice %507 {offsets = [0, 0], sizes = [7, 8], strides = [1, 1]} : vector<7x32xf32> to vector<7x8xf32>
    %512 = vector.extract_strided_slice %492 {offsets = [0, 0], sizes = [7, 8], strides = [1, 1]} : vector<7x32xf32> to vector<7x8xf32>
    %cst_246 = arith.constant dense<0.000000e+00> : vector<7x7xf32>
    %513 = tpu.matmul %511, %512, %cst_246 {dimension_numbers = #tpu.dot_dimension_numbers<[1], [1], [0], [0], [0, 0, 1, 0], [], []>} : vector<7x8xf32>, vector<7x8xf32>, vector<7x7xf32> -> vector<7x7xf32>
    %514 = vector.extract_strided_slice %501 {offsets = [0, 8], sizes = [7, 8], strides = [1, 1]} : vector<7x32xf32> to vector<7x8xf32>
    %515 = vector.extract_strided_slice %494 {offsets = [0, 8], sizes = [7, 8], strides = [1, 1]} : vector<7x32xf32> to vector<7x8xf32>
    %cst_247 = arith.constant dense<0.000000e+00> : vector<7x7xf32>
    %516 = tpu.matmul %514, %515, %cst_247 {dimension_numbers = #tpu.dot_dimension_numbers<[1], [1], [0], [0], [0, 0, 1, 0], [], []>} : vector<7x8xf32>, vector<7x8xf32>, vector<7x7xf32> -> vector<7x7xf32>
    %517 = vector.extract_strided_slice %507 {offsets = [0, 8], sizes = [7, 8], strides = [1, 1]} : vector<7x32xf32> to vector<7x8xf32>
    %518 = vector.extract_strided_slice %492 {offsets = [0, 8], sizes = [7, 8], strides = [1, 1]} : vector<7x32xf32> to vector<7x8xf32>
    %cst_248 = arith.constant dense<0.000000e+00> : vector<7x7xf32>
    %519 = tpu.matmul %517, %518, %cst_248 {dimension_numbers = #tpu.dot_dimension_numbers<[1], [1], [0], [0], [0, 0, 1, 0], [], []>} : vector<7x8xf32>, vector<7x8xf32>, vector<7x7xf32> -> vector<7x7xf32>
    %520 = vector.extract_strided_slice %501 {offsets = [0, 16], sizes = [7, 8], strides = [1, 1]} : vector<7x32xf32> to vector<7x8xf32>
    %521 = vector.extract_strided_slice %494 {offsets = [0, 16], sizes = [7, 8], strides = [1, 1]} : vector<7x32xf32> to vector<7x8xf32>
    %cst_249 = arith.constant dense<0.000000e+00> : vector<7x7xf32>
    %522 = tpu.matmul %520, %521, %cst_249 {dimension_numbers = #tpu.dot_dimension_numbers<[1], [1], [0], [0], [0, 0, 1, 0], [], []>} : vector<7x8xf32>, vector<7x8xf32>, vector<7x7xf32> -> vector<7x7xf32>
    %523 = vector.extract_strided_slice %507 {offsets = [0, 16], sizes = [7, 8], strides = [1, 1]} : vector<7x32xf32> to vector<7x8xf32>
    %524 = vector.extract_strided_slice %492 {offsets = [0, 16], sizes = [7, 8], strides = [1, 1]} : vector<7x32xf32> to vector<7x8xf32>
    %cst_250 = arith.constant dense<0.000000e+00> : vector<7x7xf32>
    %525 = tpu.matmul %523, %524, %cst_250 {dimension_numbers = #tpu.dot_dimension_numbers<[1], [1], [0], [0], [0, 0, 1, 0], [], []>} : vector<7x8xf32>, vector<7x8xf32>, vector<7x7xf32> -> vector<7x7xf32>
    %526 = vector.extract_strided_slice %501 {offsets = [0, 24], sizes = [7, 8], strides = [1, 1]} : vector<7x32xf32> to vector<7x8xf32>
    %527 = vector.extract_strided_slice %494 {offsets = [0, 24], sizes = [7, 8], strides = [1, 1]} : vector<7x32xf32> to vector<7x8xf32>
    %cst_251 = arith.constant dense<0.000000e+00> : vector<7x7xf32>
    %528 = tpu.matmul %526, %527, %cst_251 {dimension_numbers = #tpu.dot_dimension_numbers<[1], [1], [0], [0], [0, 0, 1, 0], [], []>} : vector<7x8xf32>, vector<7x8xf32>, vector<7x7xf32> -> vector<7x7xf32>
    %529 = vector.extract_strided_slice %507 {offsets = [0, 24], sizes = [7, 8], strides = [1, 1]} : vector<7x32xf32> to vector<7x8xf32>
    %530 = vector.extract_strided_slice %492 {offsets = [0, 24], sizes = [7, 8], strides = [1, 1]} : vector<7x32xf32> to vector<7x8xf32>
    %cst_252 = arith.constant dense<0.000000e+00> : vector<7x7xf32>
    %531 = tpu.matmul %529, %530, %cst_252 {dimension_numbers = #tpu.dot_dimension_numbers<[1], [1], [0], [0], [0, 0, 1, 0], [], []>} : vector<7x8xf32>, vector<7x8xf32>, vector<7x7xf32> -> vector<7x7xf32>
    %532 = vector.shape_cast %510 : vector<7x7xf32> to vector<1x7x7xf32>
    %533 = vector.shape_cast %516 : vector<7x7xf32> to vector<1x7x7xf32>
    %534 = vector.shape_cast %522 : vector<7x7xf32> to vector<1x7x7xf32>
    %535 = vector.shape_cast %528 : vector<7x7xf32> to vector<1x7x7xf32>
    %536 = tpu.concatenate %532, %533, %534, %535 in 0 : vector<1x7x7xf32>, vector<1x7x7xf32>, vector<1x7x7xf32>, vector<1x7x7xf32> -> vector<4x7x7xf32>
    %537 = vector.shape_cast %513 : vector<7x7xf32> to vector<1x7x7xf32>
    %538 = vector.shape_cast %519 : vector<7x7xf32> to vector<1x7x7xf32>
    %539 = vector.shape_cast %525 : vector<7x7xf32> to vector<1x7x7xf32>
    %540 = vector.shape_cast %531 : vector<7x7xf32> to vector<1x7x7xf32>
    %541 = tpu.concatenate %537, %538, %539, %540 in 0 : vector<1x7x7xf32>, vector<1x7x7xf32>, vector<1x7x7xf32>, vector<1x7x7xf32> -> vector<4x7x7xf32>
    %542 = vector.extract_strided_slice %541 {offsets = [0, 1, 0], sizes = [4, 6, 7], strides = [1, 1, 1]} : vector<4x7x7xf32> to vector<4x6x7xf32>
    %cst_253 = arith.constant 0.000000e+00 : f32
    %543 = vector.broadcast %cst_253 : f32 to vector<4x1x7xf32>
    %544 = tpu.concatenate %542, %543 in 1 : vector<4x6x7xf32>, vector<4x1x7xf32> -> vector<4x7x7xf32>
    %cst_254 = arith.constant 0.000000e+00 : f32
    %545 = vector.broadcast %cst_254 : f32 to vector<4x7x1xf32>
    %546 = tpu.concatenate %541, %545, %544 in 2 : vector<4x7x7xf32>, vector<4x7x1xf32>, vector<4x7x7xf32> -> vector<4x7x15xf32>
    %547 = vector.extract_strided_slice %546 {offsets = [0, 0, 6], sizes = [4, 1, 7], strides = [1, 1, 1]} : vector<4x7x15xf32> to vector<4x1x7xf32>
    %548 = vector.extract_strided_slice %546 {offsets = [0, 1, 5], sizes = [4, 1, 7], strides = [1, 1, 1]} : vector<4x7x15xf32> to vector<4x1x7xf32>
    %549 = vector.extract_strided_slice %546 {offsets = [0, 2, 4], sizes = [4, 1, 7], strides = [1, 1, 1]} : vector<4x7x15xf32> to vector<4x1x7xf32>
    %550 = vector.extract_strided_slice %546 {offsets = [0, 3, 3], sizes = [4, 1, 7], strides = [1, 1, 1]} : vector<4x7x15xf32> to vector<4x1x7xf32>
    %551 = vector.extract_strided_slice %546 {offsets = [0, 4, 2], sizes = [4, 1, 7], strides = [1, 1, 1]} : vector<4x7x15xf32> to vector<4x1x7xf32>
    %552 = vector.extract_strided_slice %546 {offsets = [0, 5, 1], sizes = [4, 1, 7], strides = [1, 1, 1]} : vector<4x7x15xf32> to vector<4x1x7xf32>
    %553 = vector.extract_strided_slice %546 {offsets = [0, 6, 0], sizes = [4, 1, 7], strides = [1, 1, 1]} : vector<4x7x15xf32> to vector<4x1x7xf32>
    %554 = tpu.concatenate %547, %548, %549, %550, %551, %552, %553 in 1 : vector<4x1x7xf32>, vector<4x1x7xf32>, vector<4x1x7xf32>, vector<4x1x7xf32>, vector<4x1x7xf32>, vector<4x1x7xf32>, vector<4x1x7xf32> -> vector<4x7x7xf32>
    %555 = arith.addf %536, %554 : vector<4x7x7xf32>
    %556 = vector.shape_cast %40 : vector<7x7xf32> to vector<1x7x7xf32>
    %557 = vector.broadcast %556 : vector<1x7x7xf32> to vector<4x7x7xf32>
    %558 = arith.addf %555, %557 : vector<4x7x7xf32>
    %cst_255 = arith.constant dense<0xFF800000> : vector<4x7xf32>
    %559 = vector.multi_reduction <maximumf>, %558, %cst_255 [2] : vector<4x7x7xf32> to vector<4x7xf32>
    %560 = vector.shape_cast %559 : vector<4x7xf32> to vector<4x7x1xf32>
    %561 = vector.broadcast %560 : vector<4x7x1xf32> to vector<4x7x7xf32>
    %562 = arith.subf %558, %561 : vector<4x7x7xf32>
    %563 = math.exp %562 : vector<4x7x7xf32>
    %cst_256 = arith.constant dense<0.000000e+00> : vector<4x7xf32>
    %564 = vector.multi_reduction <add>, %563, %cst_256 [2] : vector<4x7x7xf32> to vector<4x7xf32>
    %565 = vector.shape_cast %564 : vector<4x7xf32> to vector<4x7x1xf32>
    %566 = vector.broadcast %565 : vector<4x7x1xf32> to vector<4x7x7xf32>
    %567 = arith.divf %563, %566 : vector<4x7x7xf32>
    %568 = vector.extract_strided_slice %567 {offsets = [0, 0, 0], sizes = [1, 7, 7], strides = [1, 1, 1]} : vector<4x7x7xf32> to vector<1x7x7xf32>
    %569 = vector.shape_cast %568 : vector<1x7x7xf32> to vector<7x7xf32>
    %570 = vector.extract_strided_slice %495 {offsets = [0, 0], sizes = [7, 8], strides = [1, 1]} : vector<7x32xf32> to vector<7x8xf32>
    %cst_257 = arith.constant dense<0.000000e+00> : vector<7x8xf32>
    %571 = tpu.matmul %569, %570, %cst_257 {dimension_numbers = #tpu.dot_dimension_numbers<[1], [0], [0], [1], [0, 0, 1, 1], [], []>} : vector<7x7xf32>, vector<7x8xf32>, vector<7x8xf32> -> vector<7x8xf32>
    %572 = vector.extract_strided_slice %567 {offsets = [1, 0, 0], sizes = [1, 7, 7], strides = [1, 1, 1]} : vector<4x7x7xf32> to vector<1x7x7xf32>
    %573 = vector.shape_cast %572 : vector<1x7x7xf32> to vector<7x7xf32>
    %574 = vector.extract_strided_slice %495 {offsets = [0, 8], sizes = [7, 8], strides = [1, 1]} : vector<7x32xf32> to vector<7x8xf32>
    %cst_258 = arith.constant dense<0.000000e+00> : vector<7x8xf32>
    %575 = tpu.matmul %573, %574, %cst_258 {dimension_numbers = #tpu.dot_dimension_numbers<[1], [0], [0], [1], [0, 0, 1, 1], [], []>} : vector<7x7xf32>, vector<7x8xf32>, vector<7x8xf32> -> vector<7x8xf32>
    %576 = vector.extract_strided_slice %567 {offsets = [2, 0, 0], sizes = [1, 7, 7], strides = [1, 1, 1]} : vector<4x7x7xf32> to vector<1x7x7xf32>
    %577 = vector.shape_cast %576 : vector<1x7x7xf32> to vector<7x7xf32>
    %578 = vector.extract_strided_slice %495 {offsets = [0, 16], sizes = [7, 8], strides = [1, 1]} : vector<7x32xf32> to vector<7x8xf32>
    %cst_259 = arith.constant dense<0.000000e+00> : vector<7x8xf32>
    %579 = tpu.matmul %577, %578, %cst_259 {dimension_numbers = #tpu.dot_dimension_numbers<[1], [0], [0], [1], [0, 0, 1, 1], [], []>} : vector<7x7xf32>, vector<7x8xf32>, vector<7x8xf32> -> vector<7x8xf32>
    %580 = vector.extract_strided_slice %567 {offsets = [3, 0, 0], sizes = [1, 7, 7], strides = [1, 1, 1]} : vector<4x7x7xf32> to vector<1x7x7xf32>
    %581 = vector.shape_cast %580 : vector<1x7x7xf32> to vector<7x7xf32>
    %582 = vector.extract_strided_slice %495 {offsets = [0, 24], sizes = [7, 8], strides = [1, 1]} : vector<7x32xf32> to vector<7x8xf32>
    %cst_260 = arith.constant dense<0.000000e+00> : vector<7x8xf32>
    %583 = tpu.matmul %581, %582, %cst_260 {dimension_numbers = #tpu.dot_dimension_numbers<[1], [0], [0], [1], [0, 0, 1, 1], [], []>} : vector<7x7xf32>, vector<7x8xf32>, vector<7x8xf32> -> vector<7x8xf32>
    %584 = tpu.concatenate %571, %575, %579, %583 in 1 : vector<7x8xf32>, vector<7x8xf32>, vector<7x8xf32>, vector<7x8xf32> -> vector<7x32xf32>
    %c1_261 = arith.constant 1 : index
    %c0_262 = arith.constant 0 : index
    %c0_263 = arith.constant 0 : index
    %585 = vector.load %arg21[%c1_261, %c0_262, %c0_263] : memref<2x32x32xf32, #tpu.memory_space<vmem>>, vector<1x32x32xf32>
    %586 = vector.shape_cast %585 : vector<1x32x32xf32> to vector<32x32xf32>
    %cst_264 = arith.constant dense<0.000000e+00> : vector<7x32xf32>
    %587 = tpu.matmul %584, %586, %cst_264 {dimension_numbers = #tpu.dot_dimension_numbers<[1], [0], [0], [1], [0, 0, 1, 1], [], []>} : vector<7x32xf32>, vector<32x32xf32>, vector<7x32xf32> -> vector<7x32xf32>
    %588 = arith.addf %456, %587 : vector<7x32xf32>
    %c1_265 = arith.constant 1 : index
    %c0_266 = arith.constant 0 : index
    %c0_267 = arith.constant 0 : index
    %589 = vector.load %arg22[%c1_265, %c0_266, %c0_267] : memref<2x1x32xf32, #tpu.memory_space<vmem>>, vector<1x1x32xf32>
    %590 = vector.shape_cast %589 : vector<1x1x32xf32> to vector<1x32xf32>
    %591 = vector.broadcast %590 : vector<1x32xf32> to vector<7x32xf32>
    %592 = arith.addf %588, %591 : vector<7x32xf32>
    %c1_268 = arith.constant 1 : index
    %c0_269 = arith.constant 0 : index
    %c0_270 = arith.constant 0 : index
    %593 = vector.load %arg23[%c1_268, %c0_269, %c0_270] : memref<2x1x32xf32, #tpu.memory_space<vmem>>, vector<1x1x32xf32>
    %594 = vector.shape_cast %593 : vector<1x1x32xf32> to vector<1x32xf32>
    %c1_271 = arith.constant 1 : index
    %c0_272 = arith.constant 0 : index
    %c0_273 = arith.constant 0 : index
    %595 = vector.load %arg24[%c1_271, %c0_272, %c0_273] : memref<2x1x32xf32, #tpu.memory_space<vmem>>, vector<1x1x32xf32>
    %596 = vector.shape_cast %595 : vector<1x1x32xf32> to vector<1x32xf32>
    %cst_274 = arith.constant dense<0.000000e+00> : vector<7xf32>
    %597 = vector.multi_reduction <add>, %592, %cst_274 [1] : vector<7x32xf32> to vector<7xf32>
    %598 = vector.shape_cast %597 : vector<7xf32> to vector<7x1xf32>
    %cst_275 = arith.constant 3.200000e+01 : f32
    %599 = vector.broadcast %cst_275 : f32 to vector<7x1xf32>
    %600 = arith.divf %598, %599 : vector<7x1xf32>
    %601 = vector.broadcast %600 : vector<7x1xf32> to vector<7x32xf32>
    %602 = arith.subf %592, %601 : vector<7x32xf32>
    %603 = arith.mulf %602, %602 : vector<7x32xf32>
    %cst_276 = arith.constant dense<0.000000e+00> : vector<7xf32>
    %604 = vector.multi_reduction <add>, %603, %cst_276 [1] : vector<7x32xf32> to vector<7xf32>
    %605 = vector.shape_cast %604 : vector<7xf32> to vector<7x1xf32>
    %cst_277 = arith.constant 3.200000e+01 : f32
    %606 = vector.broadcast %cst_277 : f32 to vector<7x1xf32>
    %607 = arith.divf %605, %606 : vector<7x1xf32>
    %608 = vector.broadcast %600 : vector<7x1xf32> to vector<7x32xf32>
    %609 = arith.subf %592, %608 : vector<7x32xf32>
    %cst_278 = arith.constant 6.100000e-05 : f32
    %610 = vector.broadcast %cst_278 : f32 to vector<7x1xf32>
    %611 = arith.addf %607, %610 : vector<7x1xf32>
    %612 = math.rsqrt %611 : vector<7x1xf32>
    %613 = vector.broadcast %612 : vector<7x1xf32> to vector<7x32xf32>
    %614 = arith.mulf %609, %613 : vector<7x32xf32>
    %615 = vector.broadcast %594 : vector<1x32xf32> to vector<7x32xf32>
    %616 = arith.mulf %614, %615 : vector<7x32xf32>
    %617 = vector.broadcast %596 : vector<1x32xf32> to vector<7x32xf32>
    %618 = arith.addf %616, %617 : vector<7x32xf32>
    %c1_279 = arith.constant 1 : index
    %c0_280 = arith.constant 0 : index
    %c0_281 = arith.constant 0 : index
    %619 = vector.load %arg25[%c1_279, %c0_280, %c0_281] : memref<2x32x64xf32, #tpu.memory_space<vmem>>, vector<1x32x64xf32>
    %620 = vector.shape_cast %619 : vector<1x32x64xf32> to vector<32x64xf32>
    %cst_282 = arith.constant dense<0.000000e+00> : vector<7x64xf32>
    %621 = tpu.matmul %618, %620, %cst_282 {dimension_numbers = #tpu.dot_dimension_numbers<[1], [0], [0], [1], [0, 0, 1, 1], [], []>} : vector<7x32xf32>, vector<32x64xf32>, vector<7x64xf32> -> vector<7x64xf32>
    %c1_283 = arith.constant 1 : index
    %c0_284 = arith.constant 0 : index
    %c0_285 = arith.constant 0 : index
    %622 = vector.load %arg26[%c1_283, %c0_284, %c0_285] : memref<2x1x64xf32, #tpu.memory_space<vmem>>, vector<1x1x64xf32>
    %623 = vector.shape_cast %622 : vector<1x1x64xf32> to vector<1x64xf32>
    %624 = vector.broadcast %623 : vector<1x64xf32> to vector<7x64xf32>
    %625 = arith.addf %621, %624 : vector<7x64xf32>
    %626 = vector.extract_strided_slice %625 {offsets = [0, 0], sizes = [7, 32], strides = [1, 1]} : vector<7x64xf32> to vector<7x32xf32>
    %627 = vector.extract_strided_slice %625 {offsets = [0, 32], sizes = [7, 32], strides = [1, 1]} : vector<7x64xf32> to vector<7x32xf32>
    %628 = arith.negf %627 : vector<7x32xf32>
    %629 = math.exp %628 : vector<7x32xf32>
    %cst_286 = arith.constant 1.000000e+00 : f32
    %630 = vector.broadcast %cst_286 : f32 to vector<7x32xf32>
    %631 = arith.addf %630, %629 : vector<7x32xf32>
    %632 = arith.divf %630, %631 : vector<7x32xf32>
    %633 = arith.mulf %626, %632 : vector<7x32xf32>
    %cst_287 = arith.constant 0.000000e+00 : f32
    %634 = vector.broadcast %cst_287 : f32 to vector<3x32xf32>
    %635 = tpu.concatenate %634, %633, %634 in 0 : vector<3x32xf32>, vector<7x32xf32>, vector<3x32xf32> -> vector<13x32xf32>
    %c1_288 = arith.constant 1 : index
    %c0_289 = arith.constant 0 : index
    %c0_290 = arith.constant 0 : index
    %636 = vector.load %arg27[%c1_288, %c0_289, %c0_290] : memref<2x7x32xf32, #tpu.memory_space<vmem>>, vector<1x7x32xf32>
    %637 = vector.shape_cast %636 : vector<1x7x32xf32> to vector<7x32xf32>
    %cst_291 = arith.constant 0.000000e+00 : f32
    %638 = vector.broadcast %cst_291 : f32 to vector<7x32xf32>
    %c1_292 = arith.constant 1 : index
    %c0_293 = arith.constant 0 : index
    %c0_294 = arith.constant 0 : index
    %639 = vector.load %arg28[%c1_292, %c0_293, %c0_294] : memref<2x1x32xf32, #tpu.memory_space<vmem>>, vector<1x1x32xf32>
    %640 = vector.shape_cast %639 : vector<1x1x32xf32> to vector<1x32xf32>
    %641 = vector.broadcast %640 : vector<1x32xf32> to vector<7x32xf32>
    %642 = arith.addf %638, %641 : vector<7x32xf32>
    %643 = vector.extract_strided_slice %635 {offsets = [0, 0], sizes = [7, 32], strides = [1, 1]} : vector<13x32xf32> to vector<7x32xf32>
    %644 = vector.extract_strided_slice %637 {offsets = [0, 0], sizes = [1, 32], strides = [1, 1]} : vector<7x32xf32> to vector<1x32xf32>
    %645 = vector.broadcast %644 : vector<1x32xf32> to vector<7x32xf32>
    %646 = arith.mulf %643, %645 : vector<7x32xf32>
    %647 = arith.addf %642, %646 : vector<7x32xf32>
    %648 = vector.extract_strided_slice %635 {offsets = [1, 0], sizes = [7, 32], strides = [1, 1]} : vector<13x32xf32> to vector<7x32xf32>
    %649 = vector.extract_strided_slice %637 {offsets = [1, 0], sizes = [1, 32], strides = [1, 1]} : vector<7x32xf32> to vector<1x32xf32>
    %650 = vector.broadcast %649 : vector<1x32xf32> to vector<7x32xf32>
    %651 = arith.mulf %648, %650 : vector<7x32xf32>
    %652 = arith.addf %647, %651 : vector<7x32xf32>
    %653 = vector.extract_strided_slice %635 {offsets = [2, 0], sizes = [7, 32], strides = [1, 1]} : vector<13x32xf32> to vector<7x32xf32>
    %654 = vector.extract_strided_slice %637 {offsets = [2, 0], sizes = [1, 32], strides = [1, 1]} : vector<7x32xf32> to vector<1x32xf32>
    %655 = vector.broadcast %654 : vector<1x32xf32> to vector<7x32xf32>
    %656 = arith.mulf %653, %655 : vector<7x32xf32>
    %657 = arith.addf %652, %656 : vector<7x32xf32>
    %658 = vector.extract_strided_slice %635 {offsets = [3, 0], sizes = [7, 32], strides = [1, 1]} : vector<13x32xf32> to vector<7x32xf32>
    %659 = vector.extract_strided_slice %637 {offsets = [3, 0], sizes = [1, 32], strides = [1, 1]} : vector<7x32xf32> to vector<1x32xf32>
    %660 = vector.broadcast %659 : vector<1x32xf32> to vector<7x32xf32>
    %661 = arith.mulf %658, %660 : vector<7x32xf32>
    %662 = arith.addf %657, %661 : vector<7x32xf32>
    %663 = vector.extract_strided_slice %635 {offsets = [4, 0], sizes = [7, 32], strides = [1, 1]} : vector<13x32xf32> to vector<7x32xf32>
    %664 = vector.extract_strided_slice %637 {offsets = [4, 0], sizes = [1, 32], strides = [1, 1]} : vector<7x32xf32> to vector<1x32xf32>
    %665 = vector.broadcast %664 : vector<1x32xf32> to vector<7x32xf32>
    %666 = arith.mulf %663, %665 : vector<7x32xf32>
    %667 = arith.addf %662, %666 : vector<7x32xf32>
    %668 = vector.extract_strided_slice %635 {offsets = [5, 0], sizes = [7, 32], strides = [1, 1]} : vector<13x32xf32> to vector<7x32xf32>
    %669 = vector.extract_strided_slice %637 {offsets = [5, 0], sizes = [1, 32], strides = [1, 1]} : vector<7x32xf32> to vector<1x32xf32>
    %670 = vector.broadcast %669 : vector<1x32xf32> to vector<7x32xf32>
    %671 = arith.mulf %668, %670 : vector<7x32xf32>
    %672 = arith.addf %667, %671 : vector<7x32xf32>
    %673 = vector.extract_strided_slice %635 {offsets = [6, 0], sizes = [7, 32], strides = [1, 1]} : vector<13x32xf32> to vector<7x32xf32>
    %674 = vector.extract_strided_slice %637 {offsets = [6, 0], sizes = [1, 32], strides = [1, 1]} : vector<7x32xf32> to vector<1x32xf32>
    %675 = vector.broadcast %674 : vector<1x32xf32> to vector<7x32xf32>
    %676 = arith.mulf %673, %675 : vector<7x32xf32>
    %677 = arith.addf %672, %676 : vector<7x32xf32>
    %c1_295 = arith.constant 1 : index
    %c0_296 = arith.constant 0 : index
    %c0_297 = arith.constant 0 : index
    %678 = vector.load %arg29[%c1_295, %c0_296, %c0_297] : memref<2x1x32xf32, #tpu.memory_space<vmem>>, vector<1x1x32xf32>
    %679 = vector.shape_cast %678 : vector<1x1x32xf32> to vector<1x32xf32>
    %680 = vector.broadcast %679 : vector<1x32xf32> to vector<7x32xf32>
    %681 = arith.mulf %677, %680 : vector<7x32xf32>
    %c1_298 = arith.constant 1 : index
    %c0_299 = arith.constant 0 : index
    %c0_300 = arith.constant 0 : index
    %682 = vector.load %arg30[%c1_298, %c0_299, %c0_300] : memref<2x1x32xf32, #tpu.memory_space<vmem>>, vector<1x1x32xf32>
    %683 = vector.shape_cast %682 : vector<1x1x32xf32> to vector<1x32xf32>
    %684 = vector.broadcast %683 : vector<1x32xf32> to vector<7x32xf32>
    %685 = arith.addf %681, %684 : vector<7x32xf32>
    %686 = arith.negf %685 : vector<7x32xf32>
    %687 = math.exp %686 : vector<7x32xf32>
    %cst_301 = arith.constant 1.000000e+00 : f32
    %688 = vector.broadcast %cst_301 : f32 to vector<7x32xf32>
    %689 = arith.addf %688, %687 : vector<7x32xf32>
    %690 = arith.divf %688, %689 : vector<7x32xf32>
    %691 = arith.mulf %685, %690 : vector<7x32xf32>
    %c1_302 = arith.constant 1 : index
    %c0_303 = arith.constant 0 : index
    %c0_304 = arith.constant 0 : index
    %692 = vector.load %arg31[%c1_302, %c0_303, %c0_304] : memref<2x32x32xf32, #tpu.memory_space<vmem>>, vector<1x32x32xf32>
    %693 = vector.shape_cast %692 : vector<1x32x32xf32> to vector<32x32xf32>
    %cst_305 = arith.constant dense<0.000000e+00> : vector<7x32xf32>
    %694 = tpu.matmul %691, %693, %cst_305 {dimension_numbers = #tpu.dot_dimension_numbers<[1], [0], [0], [1], [0, 0, 1, 1], [], []>} : vector<7x32xf32>, vector<32x32xf32>, vector<7x32xf32> -> vector<7x32xf32>
    %695 = arith.addf %592, %694 : vector<7x32xf32>
    %c1_306 = arith.constant 1 : index
    %c0_307 = arith.constant 0 : index
    %c0_308 = arith.constant 0 : index
    %696 = vector.load %arg32[%c1_306, %c0_307, %c0_308] : memref<2x1x32xf32, #tpu.memory_space<vmem>>, vector<1x1x32xf32>
    %697 = vector.shape_cast %696 : vector<1x1x32xf32> to vector<1x32xf32>
    %698 = vector.broadcast %697 : vector<1x32xf32> to vector<7x32xf32>
    %699 = arith.addf %695, %698 : vector<7x32xf32>
    %c1_309 = arith.constant 1 : index
    %c0_310 = arith.constant 0 : index
    %c0_311 = arith.constant 0 : index
    %700 = vector.load %arg33[%c1_309, %c0_310, %c0_311] : memref<2x1x32xf32, #tpu.memory_space<vmem>>, vector<1x1x32xf32>
    %701 = vector.shape_cast %700 : vector<1x1x32xf32> to vector<1x32xf32>
    %c1_312 = arith.constant 1 : index
    %c0_313 = arith.constant 0 : index
    %c0_314 = arith.constant 0 : index
    %702 = vector.load %arg34[%c1_312, %c0_313, %c0_314] : memref<2x1x32xf32, #tpu.memory_space<vmem>>, vector<1x1x32xf32>
    %703 = vector.shape_cast %702 : vector<1x1x32xf32> to vector<1x32xf32>
    %c1_315 = arith.constant 1 : index
    %c0_316 = arith.constant 0 : index
    %c0_317 = arith.constant 0 : index
    %704 = vector.load %arg35[%c1_315, %c0_316, %c0_317] : memref<2x32x128xf32, #tpu.memory_space<vmem>>, vector<1x32x128xf32>
    %705 = vector.shape_cast %704 : vector<1x32x128xf32> to vector<32x128xf32>
    %c1_318 = arith.constant 1 : index
    %c0_319 = arith.constant 0 : index
    %c0_320 = arith.constant 0 : index
    %706 = vector.load %arg36[%c1_318, %c0_319, %c0_320] : memref<2x1x128xf32, #tpu.memory_space<vmem>>, vector<1x1x128xf32>
    %707 = vector.shape_cast %706 : vector<1x1x128xf32> to vector<1x128xf32>
    %c1_321 = arith.constant 1 : index
    %c0_322 = arith.constant 0 : index
    %c0_323 = arith.constant 0 : index
    %708 = vector.load %arg37[%c1_321, %c0_322, %c0_323] : memref<2x128x32xf32, #tpu.memory_space<vmem>>, vector<1x128x32xf32>
    %709 = vector.shape_cast %708 : vector<1x128x32xf32> to vector<128x32xf32>
    %c1_324 = arith.constant 1 : index
    %c0_325 = arith.constant 0 : index
    %c0_326 = arith.constant 0 : index
    %710 = vector.load %arg38[%c1_324, %c0_325, %c0_326] : memref<2x1x32xf32, #tpu.memory_space<vmem>>, vector<1x1x32xf32>
    %711 = vector.shape_cast %710 : vector<1x1x32xf32> to vector<1x32xf32>
    %cst_327 = arith.constant dense<0.000000e+00> : vector<7xf32>
    %712 = vector.multi_reduction <add>, %699, %cst_327 [1] : vector<7x32xf32> to vector<7xf32>
    %713 = vector.shape_cast %712 : vector<7xf32> to vector<7x1xf32>
    %cst_328 = arith.constant 3.200000e+01 : f32
    %714 = vector.broadcast %cst_328 : f32 to vector<7x1xf32>
    %715 = arith.divf %713, %714 : vector<7x1xf32>
    %716 = vector.broadcast %715 : vector<7x1xf32> to vector<7x32xf32>
    %717 = arith.subf %699, %716 : vector<7x32xf32>
    %718 = arith.mulf %717, %717 : vector<7x32xf32>
    %cst_329 = arith.constant dense<0.000000e+00> : vector<7xf32>
    %719 = vector.multi_reduction <add>, %718, %cst_329 [1] : vector<7x32xf32> to vector<7xf32>
    %720 = vector.shape_cast %719 : vector<7xf32> to vector<7x1xf32>
    %cst_330 = arith.constant 3.200000e+01 : f32
    %721 = vector.broadcast %cst_330 : f32 to vector<7x1xf32>
    %722 = arith.divf %720, %721 : vector<7x1xf32>
    %723 = vector.broadcast %715 : vector<7x1xf32> to vector<7x32xf32>
    %724 = arith.subf %699, %723 : vector<7x32xf32>
    %cst_331 = arith.constant 6.100000e-05 : f32
    %725 = vector.broadcast %cst_331 : f32 to vector<7x1xf32>
    %726 = arith.addf %722, %725 : vector<7x1xf32>
    %727 = math.rsqrt %726 : vector<7x1xf32>
    %728 = vector.broadcast %727 : vector<7x1xf32> to vector<7x32xf32>
    %729 = arith.mulf %724, %728 : vector<7x32xf32>
    %730 = vector.broadcast %701 : vector<1x32xf32> to vector<7x32xf32>
    %731 = arith.mulf %729, %730 : vector<7x32xf32>
    %732 = vector.broadcast %703 : vector<1x32xf32> to vector<7x32xf32>
    %733 = arith.addf %731, %732 : vector<7x32xf32>
    %cst_332 = arith.constant dense<0.000000e+00> : vector<7x128xf32>
    %734 = tpu.matmul %733, %705, %cst_332 {dimension_numbers = #tpu.dot_dimension_numbers<[1], [0], [0], [1], [0, 0, 1, 1], [], []>} : vector<7x32xf32>, vector<32x128xf32>, vector<7x128xf32> -> vector<7x128xf32>
    %735 = vector.broadcast %707 : vector<1x128xf32> to vector<7x128xf32>
    %736 = arith.addf %734, %735 : vector<7x128xf32>
    %737 = arith.negf %736 : vector<7x128xf32>
    %738 = math.exp %737 : vector<7x128xf32>
    %cst_333 = arith.constant 1.000000e+00 : f32
    %739 = vector.broadcast %cst_333 : f32 to vector<7x128xf32>
    %740 = arith.addf %739, %738 : vector<7x128xf32>
    %741 = arith.divf %739, %740 : vector<7x128xf32>
    %742 = arith.mulf %736, %741 : vector<7x128xf32>
    %cst_334 = arith.constant dense<0.000000e+00> : vector<7x32xf32>
    %743 = tpu.matmul %742, %709, %cst_334 {dimension_numbers = #tpu.dot_dimension_numbers<[1], [0], [0], [1], [0, 0, 1, 1], [], []>} : vector<7x128xf32>, vector<128x32xf32>, vector<7x32xf32> -> vector<7x32xf32>
    %744 = vector.broadcast %711 : vector<1x32xf32> to vector<7x32xf32>
    %745 = arith.addf %743, %744 : vector<7x32xf32>
    %cst_335 = arith.constant 5.000000e-01 : f32
    %746 = vector.broadcast %cst_335 : f32 to vector<7x32xf32>
    %747 = arith.mulf %746, %745 : vector<7x32xf32>
    %748 = arith.addf %699, %747 : vector<7x32xf32>
    %c1_336 = arith.constant 1 : index
    %c0_337 = arith.constant 0 : index
    %c0_338 = arith.constant 0 : index
    %749 = vector.load %arg39[%c1_336, %c0_337, %c0_338] : memref<2x1x32xf32, #tpu.memory_space<vmem>>, vector<1x1x32xf32>
    %750 = vector.shape_cast %749 : vector<1x1x32xf32> to vector<1x32xf32>
    %c1_339 = arith.constant 1 : index
    %c0_340 = arith.constant 0 : index
    %c0_341 = arith.constant 0 : index
    %751 = vector.load %arg40[%c1_339, %c0_340, %c0_341] : memref<2x1x32xf32, #tpu.memory_space<vmem>>, vector<1x1x32xf32>
    %752 = vector.shape_cast %751 : vector<1x1x32xf32> to vector<1x32xf32>
    %cst_342 = arith.constant dense<0.000000e+00> : vector<7xf32>
    %753 = vector.multi_reduction <add>, %748, %cst_342 [1] : vector<7x32xf32> to vector<7xf32>
    %754 = vector.shape_cast %753 : vector<7xf32> to vector<7x1xf32>
    %cst_343 = arith.constant 3.200000e+01 : f32
    %755 = vector.broadcast %cst_343 : f32 to vector<7x1xf32>
    %756 = arith.divf %754, %755 : vector<7x1xf32>
    %757 = vector.broadcast %756 : vector<7x1xf32> to vector<7x32xf32>
    %758 = arith.subf %748, %757 : vector<7x32xf32>
    %759 = arith.mulf %758, %758 : vector<7x32xf32>
    %cst_344 = arith.constant dense<0.000000e+00> : vector<7xf32>
    %760 = vector.multi_reduction <add>, %759, %cst_344 [1] : vector<7x32xf32> to vector<7xf32>
    %761 = vector.shape_cast %760 : vector<7xf32> to vector<7x1xf32>
    %cst_345 = arith.constant 3.200000e+01 : f32
    %762 = vector.broadcast %cst_345 : f32 to vector<7x1xf32>
    %763 = arith.divf %761, %762 : vector<7x1xf32>
    %764 = vector.broadcast %756 : vector<7x1xf32> to vector<7x32xf32>
    %765 = arith.subf %748, %764 : vector<7x32xf32>
    %cst_346 = arith.constant 6.100000e-05 : f32
    %766 = vector.broadcast %cst_346 : f32 to vector<7x1xf32>
    %767 = arith.addf %763, %766 : vector<7x1xf32>
    %768 = math.rsqrt %767 : vector<7x1xf32>
    %769 = vector.broadcast %768 : vector<7x1xf32> to vector<7x32xf32>
    %770 = arith.mulf %765, %769 : vector<7x32xf32>
    %771 = vector.broadcast %750 : vector<1x32xf32> to vector<7x32xf32>
    %772 = arith.mulf %770, %771 : vector<7x32xf32>
    %773 = vector.broadcast %752 : vector<1x32xf32> to vector<7x32xf32>
    %774 = arith.addf %772, %773 : vector<7x32xf32>
    %c0_347 = arith.constant 0 : index
    %c0_348 = arith.constant 0 : index
    %c0_349 = arith.constant 0 : index
    %775 = vector.load %arg41[%c0_347, %c0_348, %c0_349] : memref<1x7x32xf32, #tpu.memory_space<vmem>>, vector<1x7x32xf32>
    %776 = vector.shape_cast %775 : vector<1x7x32xf32> to vector<7x32xf32>
    %777 = vector.shape_cast %774 : vector<7x32xf32> to vector<1x7x32xf32>
    tpu.vector_store %arg41[%c0_347, %c0_348, %c0_349], %777 {strides = array<i32>} : memref<1x7x32xf32, #tpu.memory_space<vmem>>, vector<1x7x32xf32>,
    return
  }
  func.func @transform_0(%arg0: i32) -> (i32, i32, i32) {
    %c0_i32 = arith.constant 0 : i32
    %c0_i32_0 = arith.constant 0 : i32
    %c0_i32_1 = arith.constant 0 : i32
    return %arg0, %c0_i32, %c0_i32_0 : i32, i32, i32
  }
  func.func @transform_1(%arg0: i32) -> (i32, i32) {
    %c0_i32 = arith.constant 0 : i32
    %c0_i32_0 = arith.constant 0 : i32
    %c0_i32_1 = arith.constant 0 : i32
    return %c0_i32, %c0_i32_0 : i32, i32
  }
  func.func @transform_2(%arg0: i32) -> (i32, i32, i32) {
    %c0_i32 = arith.constant 0 : i32
    %c0_i32_0 = arith.constant 0 : i32
    %c0_i32_1 = arith.constant 0 : i32
    return %arg0, %c0_i32, %c0_i32_0 : i32, i32, i32
  }
  func.func @transform_3(%arg0: i32) -> (i32, i32) {
    %c0_i32 = arith.constant 0 : i32
    %c0_i32_0 = arith.constant 0 : i32
    %c0_i32_1 = arith.constant 0 : i32
    return %c0_i32, %c0_i32_0 : i32, i32
  }
  func.func @transform_4(%arg0: i32) -> (i32, i32) {
    %c0_i32 = arith.constant 0 : i32
    %c0_i32_0 = arith.constant 0 : i32
    %c0_i32_1 = arith.constant 0 : i32
    return %c0_i32, %c0_i32_0 : i32, i32
  }
  func.func @transform_5(%arg0: i32) -> (i32, i32, i32) {
    %c0_i32 = arith.constant 0 : i32
    %c0_i32_0 = arith.constant 0 : i32
    %c0_i32_1 = arith.constant 0 : i32
    %c0_i32_2 = arith.constant 0 : i32
    return %c0_i32, %c0_i32_0, %c0_i32_1 : i32, i32, i32
  }
  func.func @transform_6(%arg0: i32) -> (i32, i32) {
    %c0_i32 = arith.constant 0 : i32
    %c0_i32_0 = arith.constant 0 : i32
    %c0_i32_1 = arith.constant 0 : i32
    return %c0_i32, %c0_i32_0 : i32, i32
  }
  func.func @transform_7(%arg0: i32) -> (i32, i32, i32) {
    %c0_i32 = arith.constant 0 : i32
    %c0_i32_0 = arith.constant 0 : i32
    %c0_i32_1 = arith.constant 0 : i32
    %c0_i32_2 = arith.constant 0 : i32
    return %c0_i32, %c0_i32_0, %c0_i32_1 : i32, i32, i32
  }
  func.func @transform_8(%arg0: i32) -> (i32, i32, i32) {
    %c0_i32 = arith.constant 0 : i32
    %c0_i32_0 = arith.constant 0 : i32
    %c0_i32_1 = arith.constant 0 : i32
    %c0_i32_2 = arith.constant 0 : i32
    return %c0_i32, %c0_i32_0, %c0_i32_1 : i32, i32, i32
  }
  func.func @transform_9(%arg0: i32) -> (i32, i32, i32) {
    %c0_i32 = arith.constant 0 : i32
    %c0_i32_0 = arith.constant 0 : i32
    %c0_i32_1 = arith.constant 0 : i32
    %c0_i32_2 = arith.constant 0 : i32
    return %c0_i32, %c0_i32_0, %c0_i32_1 : i32, i32, i32
  }
  func.func @transform_10(%arg0: i32) -> (i32, i32, i32) {
    %c0_i32 = arith.constant 0 : i32
    %c0_i32_0 = arith.constant 0 : i32
    %c0_i32_1 = arith.constant 0 : i32
    %c0_i32_2 = arith.constant 0 : i32
    return %c0_i32, %c0_i32_0, %c0_i32_1 : i32, i32, i32
  }
  func.func @transform_11(%arg0: i32) -> (i32, i32, i32) {
    %c0_i32 = arith.constant 0 : i32
    %c0_i32_0 = arith.constant 0 : i32
    %c0_i32_1 = arith.constant 0 : i32
    %c0_i32_2 = arith.constant 0 : i32
    return %c0_i32, %c0_i32_0, %c0_i32_1 : i32, i32, i32
  }
  func.func @transform_12(%arg0: i32) -> (i32, i32, i32) {
    %c0_i32 = arith.constant 0 : i32
    %c0_i32_0 = arith.constant 0 : i32
    %c0_i32_1 = arith.constant 0 : i32
    %c0_i32_2 = arith.constant 0 : i32
    return %c0_i32, %c0_i32_0, %c0_i32_1 : i32, i32, i32
  }
  func.func @transform_13(%arg0: i32) -> (i32, i32, i32) {
    %c0_i32 = arith.constant 0 : i32
    %c0_i32_0 = arith.constant 0 : i32
    %c0_i32_1 = arith.constant 0 : i32
    %c0_i32_2 = arith.constant 0 : i32
    return %c0_i32, %c0_i32_0, %c0_i32_1 : i32, i32, i32
  }
  func.func @transform_14(%arg0: i32) -> (i32, i32, i32) {
    %c0_i32 = arith.constant 0 : i32
    %c0_i32_0 = arith.constant 0 : i32
    %c0_i32_1 = arith.constant 0 : i32
    %c0_i32_2 = arith.constant 0 : i32
    return %c0_i32, %c0_i32_0, %c0_i32_1 : i32, i32, i32
  }
  func.func @transform_15(%arg0: i32) -> (i32, i32, i32) {
    %c0_i32 = arith.constant 0 : i32
    %c0_i32_0 = arith.constant 0 : i32
    %c0_i32_1 = arith.constant 0 : i32
    %c0_i32_2 = arith.constant 0 : i32
    return %c0_i32, %c0_i32_0, %c0_i32_1 : i32, i32, i32
  }
  func.func @transform_16(%arg0: i32) -> (i32, i32, i32) {
    %c0_i32 = arith.constant 0 : i32
    %c0_i32_0 = arith.constant 0 : i32
    %c0_i32_1 = arith.constant 0 : i32
    %c0_i32_2 = arith.constant 0 : i32
    return %c0_i32, %c0_i32_0, %c0_i32_1 : i32, i32, i32
  }
  func.func @transform_17(%arg0: i32) -> (i32, i32, i32) {
    %c0_i32 = arith.constant 0 : i32
    %c0_i32_0 = arith.constant 0 : i32
    %c0_i32_1 = arith.constant 0 : i32
    %c0_i32_2 = arith.constant 0 : i32
    return %c0_i32, %c0_i32_0, %c0_i32_1 : i32, i32, i32
  }
  func.func @transform_18(%arg0: i32) -> (i32, i32, i32) {
    %c0_i32 = arith.constant 0 : i32
    %c0_i32_0 = arith.constant 0 : i32
    %c0_i32_1 = arith.constant 0 : i32
    %c0_i32_2 = arith.constant 0 : i32
    return %c0_i32, %c0_i32_0, %c0_i32_1 : i32, i32, i32
  }
  func.func @transform_19(%arg0: i32) -> (i32, i32, i32) {
    %c0_i32 = arith.constant 0 : i32
    %c0_i32_0 = arith.constant 0 : i32
    %c0_i32_1 = arith.constant 0 : i32
    %c0_i32_2 = arith.constant 0 : i32
    return %c0_i32, %c0_i32_0, %c0_i32_1 : i32, i32, i32
  }
  func.func @transform_20(%arg0: i32) -> (i32, i32, i32) {
    %c0_i32 = arith.constant 0 : i32
    %c0_i32_0 = arith.constant 0 : i32
    %c0_i32_1 = arith.constant 0 : i32
    %c0_i32_2 = arith.constant 0 : i32
    return %c0_i32, %c0_i32_0, %c0_i32_1 : i32, i32, i32
  }
  func.func @transform_21(%arg0: i32) -> (i32, i32, i32) {
    %c0_i32 = arith.constant 0 : i32
    %c0_i32_0 = arith.constant 0 : i32
    %c0_i32_1 = arith.constant 0 : i32
    %c0_i32_2 = arith.constant 0 : i32
    return %c0_i32, %c0_i32_0, %c0_i32_1 : i32, i32, i32
  }
  func.func @transform_22(%arg0: i32) -> (i32, i32, i32) {
    %c0_i32 = arith.constant 0 : i32
    %c0_i32_0 = arith.constant 0 : i32
    %c0_i32_1 = arith.constant 0 : i32
    %c0_i32_2 = arith.constant 0 : i32
    return %c0_i32, %c0_i32_0, %c0_i32_1 : i32, i32, i32
  }
  func.func @transform_23(%arg0: i32) -> (i32, i32, i32) {
    %c0_i32 = arith.constant 0 : i32
    %c0_i32_0 = arith.constant 0 : i32
    %c0_i32_1 = arith.constant 0 : i32
    %c0_i32_2 = arith.constant 0 : i32
    return %c0_i32, %c0_i32_0, %c0_i32_1 : i32, i32, i32
  }
  func.func @transform_24(%arg0: i32) -> (i32, i32, i32) {
    %c0_i32 = arith.constant 0 : i32
    %c0_i32_0 = arith.constant 0 : i32
    %c0_i32_1 = arith.constant 0 : i32
    %c0_i32_2 = arith.constant 0 : i32
    return %c0_i32, %c0_i32_0, %c0_i32_1 : i32, i32, i32
  }
  func.func @transform_25(%arg0: i32) -> (i32, i32, i32) {
    %c0_i32 = arith.constant 0 : i32
    %c0_i32_0 = arith.constant 0 : i32
    %c0_i32_1 = arith.constant 0 : i32
    %c0_i32_2 = arith.constant 0 : i32
    return %c0_i32, %c0_i32_0, %c0_i32_1 : i32, i32, i32
  }
  func.func @transform_26(%arg0: i32) -> (i32, i32, i32) {
    %c0_i32 = arith.constant 0 : i32
    %c0_i32_0 = arith.constant 0 : i32
    %c0_i32_1 = arith.constant 0 : i32
    %c0_i32_2 = arith.constant 0 : i32
    return %c0_i32, %c0_i32_0, %c0_i32_1 : i32, i32, i32
  }
  func.func @transform_27(%arg0: i32) -> (i32, i32, i32) {
    %c0_i32 = arith.constant 0 : i32
    %c0_i32_0 = arith.constant 0 : i32
    %c0_i32_1 = arith.constant 0 : i32
    %c0_i32_2 = arith.constant 0 : i32
    return %c0_i32, %c0_i32_0, %c0_i32_1 : i32, i32, i32
  }
  func.func @transform_28(%arg0: i32) -> (i32, i32, i32) {
    %c0_i32 = arith.constant 0 : i32
    %c0_i32_0 = arith.constant 0 : i32
    %c0_i32_1 = arith.constant 0 : i32
    %c0_i32_2 = arith.constant 0 : i32
    return %c0_i32, %c0_i32_0, %c0_i32_1 : i32, i32, i32
  }
  func.func @transform_29(%arg0: i32) -> (i32, i32, i32) {
    %c0_i32 = arith.constant 0 : i32
    %c0_i32_0 = arith.constant 0 : i32
    %c0_i32_1 = arith.constant 0 : i32
    %c0_i32_2 = arith.constant 0 : i32
    return %c0_i32, %c0_i32_0, %c0_i32_1 : i32, i32, i32
  }
  func.func @transform_30(%arg0: i32) -> (i32, i32, i32) {
    %c0_i32 = arith.constant 0 : i32
    %c0_i32_0 = arith.constant 0 : i32
    %c0_i32_1 = arith.constant 0 : i32
    %c0_i32_2 = arith.constant 0 : i32
    return %c0_i32, %c0_i32_0, %c0_i32_1 : i32, i32, i32
  }
  func.func @transform_31(%arg0: i32) -> (i32, i32, i32) {
    %c0_i32 = arith.constant 0 : i32
    %c0_i32_0 = arith.constant 0 : i32
    %c0_i32_1 = arith.constant 0 : i32
    %c0_i32_2 = arith.constant 0 : i32
    return %c0_i32, %c0_i32_0, %c0_i32_1 : i32, i32, i32
  }
  func.func @transform_32(%arg0: i32) -> (i32, i32, i32) {
    %c0_i32 = arith.constant 0 : i32
    %c0_i32_0 = arith.constant 0 : i32
    %c0_i32_1 = arith.constant 0 : i32
    %c0_i32_2 = arith.constant 0 : i32
    return %c0_i32, %c0_i32_0, %c0_i32_1 : i32, i32, i32
  }
  func.func @transform_33(%arg0: i32) -> (i32, i32, i32) {
    %c0_i32 = arith.constant 0 : i32
    %c0_i32_0 = arith.constant 0 : i32
    %c0_i32_1 = arith.constant 0 : i32
    %c0_i32_2 = arith.constant 0 : i32
    return %c0_i32, %c0_i32_0, %c0_i32_1 : i32, i32, i32
  }
  func.func @transform_34(%arg0: i32) -> (i32, i32, i32) {
    %c0_i32 = arith.constant 0 : i32
    %c0_i32_0 = arith.constant 0 : i32
    %c0_i32_1 = arith.constant 0 : i32
    %c0_i32_2 = arith.constant 0 : i32
    return %c0_i32, %c0_i32_0, %c0_i32_1 : i32, i32, i32
  }
  func.func @transform_35(%arg0: i32) -> (i32, i32, i32) {
    %c0_i32 = arith.constant 0 : i32
    %c0_i32_0 = arith.constant 0 : i32
    %c0_i32_1 = arith.constant 0 : i32
    %c0_i32_2 = arith.constant 0 : i32
    return %c0_i32, %c0_i32_0, %c0_i32_1 : i32, i32, i32
  }
  func.func @transform_36(%arg0: i32) -> (i32, i32, i32) {
    %c0_i32 = arith.constant 0 : i32
    %c0_i32_0 = arith.constant 0 : i32
    %c0_i32_1 = arith.constant 0 : i32
    %c0_i32_2 = arith.constant 0 : i32
    return %c0_i32, %c0_i32_0, %c0_i32_1 : i32, i32, i32
  }
  func.func @transform_37(%arg0: i32) -> (i32, i32, i32) {
    %c0_i32 = arith.constant 0 : i32
    %c0_i32_0 = arith.constant 0 : i32
    %c0_i32_1 = arith.constant 0 : i32
    %c0_i32_2 = arith.constant 0 : i32
    return %c0_i32, %c0_i32_0, %c0_i32_1 : i32, i32, i32
  }
  func.func @transform_38(%arg0: i32) -> (i32, i32, i32) {
    %c0_i32 = arith.constant 0 : i32
    %c0_i32_0 = arith.constant 0 : i32
    %c0_i32_1 = arith.constant 0 : i32
    %c0_i32_2 = arith.constant 0 : i32
    return %c0_i32, %c0_i32_0, %c0_i32_1 : i32, i32, i32
  }
  func.func @transform_39(%arg0: i32) -> (i32, i32, i32) {
    %c0_i32 = arith.constant 0 : i32
    %c0_i32_0 = arith.constant 0 : i32
    %c0_i32_1 = arith.constant 0 : i32
    %c0_i32_2 = arith.constant 0 : i32
    return %c0_i32, %c0_i32_0, %c0_i32_1 : i32, i32, i32
  }
  func.func @transform_40(%arg0: i32) -> (i32, i32, i32) {
    %c0_i32 = arith.constant 0 : i32
    %c0_i32_0 = arith.constant 0 : i32
    %c0_i32_1 = arith.constant 0 : i32
    return %arg0, %c0_i32, %c0_i32_0 : i32, i32, i32
  }
}

</mosaic_0001>

<bundles_post_ra>
// kernel: conformer_forward.2
= control target key start
LH: loop header
LB: loop body
LE: loop exit
PB: predicated region body
PF: predicated region fallthrough
CT: control target
= control target key end

     0   :  { %vm133_vm0 = vcmask 1040384   ;;  %vm48_vm1 = vcmask 72704   ;;  %vm266_vm2 = vcmask 261120   ;;  %s618_s1 = inlined_call_operand.vmem [shape: f32[9,32], index: 1, kind: input, shape index: {}]   ;;  %s619_s0 = inlined_call_operand.vmem [shape: f32[224,9], index: 0, kind: input, shape index: {}]   ;;  %s620_s2 = inlined_call_operand.vmem [shape: f32[1,32], index: 2, kind: input, shape index: {}]   ;;  %s621_s3 = inlined_call_operand.vmem [shape: f32[224,32], index: 3, kind: output, shape index: {}]  }
   0x1   :  { %v43_v0 = vld [vmem:[%s618_s1 + $0x8] sm:$0x1]  ;;  %v42_v1 = vld [vmem:[%s618_s1] sm:$0xff]  ;;  %v28_v2 = vld [vmem:[%s619_s0 + $0x70] sm:$0xff] }
   0x2   :  { %329 = vmatpush.msk.msra.mxu2 %vm133_vm0, %v43_v0  ;;  %330 = vmatpush.msk.msra.mxu3 %vm133_vm0, %v43_v0  ;;  %v35_v3 = vld [vmem:[%s619_s0 + $0xa8] sm:$0xff]  ;;  %v14_v4 = vld [vmem:[%s619_s0] sm:$0xff]  ;;  %v21_v5 = vld [vmem:[%s619_s0 + $0x38] sm:$0xff] }
   0x3   :  { %299 = vmatpush.msk.msra.mxu0 %vm133_vm0, %v43_v0  ;;  %328 = vmatpush.msk.msra.mxu1 %vm133_vm0, %v43_v0  ;;  %v29_v6 = vld [vmem:[%s619_s0 + $0x78] sm:$0xff]  ;;  %v36_v7 = vld [vmem:[%s619_s0 + $0xb0] sm:$0xff]  ;;  %v15_v8 = vld [vmem:[%s619_s0 + $0x8] sm:$0xff] }
   0x4   :  { %332 = vmatpush.msra.mxu2 %v42_v1  ;;  %333 = vmatpush.msra.mxu3 %v42_v1  ;;  %v22_v9 = vld [vmem:[%s619_s0 + $0x40] sm:$0xff]  ;;  %v37_v11 = vld [vmem:[%s619_s0 + $0xb8] sm:$0xff]  ;;  %v16_v12 = vld [vmem:[%s619_s0 + $0x10] sm:$0xff] }
   0x5   :  { %314 = vmatmul.msk.f32.vlgmr.msra.gmra.mxu2 %vm48_vm1, %v28_v2  ;;  %321 = vmatmul.msk.f32.vlgmr.msra.gmra.mxu3 %vm48_vm1, %v35_v3  ;;  %v30_v10 = vld [vmem:[%s619_s0 + $0x80] sm:$0xff]  ;;  %v23_v13 = vld [vmem:[%s619_s0 + $0x48] sm:$0xff]  ;;  %v17_v16 = vld [vmem:[%s619_s0 + $0x18] sm:$0xff] }
   0x6   :  { %152 = vmatpush.msra.mxu0 %v42_v1  ;;  %331 = vmatpush.msra.mxu1 %v42_v1  ;;  %v31_v14 = vld [vmem:[%s619_s0 + $0x88] sm:$0xff]  ;;  %v38_v15 = vld [vmem:[%s619_s0 + $0xc0] sm:$0xff]  ;;  %v24_v17 = vld [vmem:[%s619_s0 + $0x50] sm:$0xff] }
   0x7   :  { %300 = vmatmul.msk.f32.vlgmr.msra.gmra.mxu0 %vm48_vm1, %v14_v4  ;;  %307 = vmatmul.msk.f32.vlgmr.msra.gmra.mxu1 %vm48_vm1, %v21_v5  ;;  %v32_v18 = vld [vmem:[%s619_s0 + $0x90] sm:$0xff]  ;;  %v39_v19 = vld [vmem:[%s619_s0 + $0xc8] sm:$0xff]  ;;  %v18_v20 = vld [vmem:[%s619_s0 + $0x20] sm:$0xff] }
   0x8   :  { %v25_v21 = vld [vmem:[%s619_s0 + $0x58] sm:$0xff]  ;;  %v40_v23 = vld [vmem:[%s619_s0 + $0xd0] sm:$0xff]  ;;  %v19_v24 = vld [vmem:[%s619_s0 + $0x28] sm:$0xff] }
   0x9   :  { %v33_v22 = vld [vmem:[%s619_s0 + $0x98] sm:$0xff]  ;;  %v26_v25 = vld [vmem:[%s619_s0 + $0x60] sm:$0xff]  ;;  %v20_v28 = vld [vmem:[%s619_s0 + $0x30] sm:$0xff] }
   0xa   :  { %v34_v26 = vld [vmem:[%s619_s0 + $0xa0] sm:$0xff]  ;;  %v41_v27 = vld [vmem:[%s619_s0 + $0xd8] sm:$0xff]  ;;  %v27_v29 = vld [vmem:[%s619_s0 + $0x68] sm:$0xff] }
   0xb   :  { %v476_v30 = vld [vmem:[%s620_s2] ss:$0 sm:$0xff] }
   0xd   :  { %315 = vmatmul.msk.f32.gmra.mxu2 %vm48_vm1, %v29_v6  ;;  %322 = vmatmul.msk.f32.gmra.mxu3 %vm48_vm1, %v36_v7 }
   0xf   :  { %301 = vmatmul.msk.f32.gmra.mxu0 %vm48_vm1, %v15_v8  ;;  %308 = vmatmul.msk.f32.gmra.mxu1 %vm48_vm1, %v22_v9 }
  0x15   :  { %316 = vmatmul.msk.f32.gmra.mxu2 %vm48_vm1, %v30_v10  ;;  %323 = vmatmul.msk.f32.gmra.mxu3 %vm48_vm1, %v37_v11 }
  0x17   :  { %302 = vmatmul.msk.f32.gmra.mxu0 %vm48_vm1, %v16_v12  ;;  %309 = vmatmul.msk.f32.gmra.mxu1 %vm48_vm1, %v23_v13 }
  0x1d   :  { %317 = vmatmul.msk.f32.gmra.mxu2 %vm48_vm1, %v31_v14  ;;  %324 = vmatmul.msk.f32.gmra.mxu3 %vm48_vm1, %v38_v15 }
  0x1f   :  { %303 = vmatmul.msk.f32.gmra.mxu0 %vm48_vm1, %v17_v16  ;;  %310 = vmatmul.msk.f32.gmra.mxu1 %vm48_vm1, %v24_v17 }
  0x25   :  { %318 = vmatmul.msk.f32.gmra.mxu2 %vm48_vm1, %v32_v18  ;;  %325 = vmatmul.msk.f32.gmra.mxu3 %vm48_vm1, %v39_v19 }
  0x27   :  { %304 = vmatmul.msk.f32.gmra.mxu0 %vm48_vm1, %v18_v20  ;;  %311 = vmatmul.msk.f32.gmra.mxu1 %vm48_vm1, %v25_v21 }
  0x2d   :  { %319 = vmatmul.msk.f32.gmra.mxu2 %vm48_vm1, %v33_v22  ;;  %326 = vmatmul.msk.f32.gmra.mxu3 %vm48_vm1, %v40_v23 }
  0x2f   :  { %305 = vmatmul.msk.f32.gmra.mxu0 %vm48_vm1, %v19_v24  ;;  %312 = vmatmul.msk.f32.gmra.mxu1 %vm48_vm1, %v26_v25 }
  0x35   :  { %320 = vmatmul.msk.f32.gmra.mxu2 %vm48_vm1, %v34_v26  ;;  %327 = vmatmul.msk.f32.gmra.mxu3 %vm48_vm1, %v41_v27 }
  0x37   :  { %306 = vmatmul.msk.f32.gmra.mxu0 %vm48_vm1, %v20_v28  ;;  %313 = vmatmul.msk.f32.gmra.mxu1 %vm48_vm1, %v27_v29 }
  0x84   :  { %v154_v31 = vpop.f32.mrf.mxu0  ;;  %v175_v32 = vpop.f32.mrf.mxu1 }
  0x85   :  { %v155_v33 = vadd.f32 %v476_v30, %v154_v31  ;;  %v176_v34 = vadd.f32 %v476_v30, %v175_v32 }
  0x87   :  { %v238_v35 = vmax.f32 %v155_v33, 0.0  ;;  %v245_v36 = vmax.f32 %v176_v34, 0.0 }
  0x88   :  { %v196_v37 = vpop.f32.mrf.mxu2  ;;  %v217_v38 = vpop.f32.mrf.mxu3 }
  0x89   :  { %267 = vst.msk [vmem:[%s621_s3] sm:$0xff] %vm266_vm2, %v238_v35  ;;  %v197_v39 = vadd.f32 %v476_v30, %v196_v37  ;;  %v218_v40 = vadd.f32 %v476_v30, %v217_v38 }
  0x8a   :  { %274 = vst.msk [vmem:[%s621_s3 + $0x38] sm:$0xff] %vm266_vm2, %v245_v36 }
  0x8b   :  { %v252_v41 = vmax.f32 %v197_v39, 0.0  ;;  %v259_v42 = vmax.f32 %v218_v40, 0.0 }
  0x8c   :  { %v157_v43 = vpop.f32.mrf.mxu0  ;;  %v178_v44 = vpop.f32.mrf.mxu1 }
  0x8d   :  { %281 = vst.msk [vmem:[%s621_s3 + $0x70] sm:$0xff] %vm266_vm2, %v252_v41  ;;  %v158_v45 = vadd.f32 %v476_v30, %v157_v43  ;;  %v179_v46 = vadd.f32 %v476_v30, %v178_v44 }
  0x8e   :  { %288 = vst.msk [vmem:[%s621_s3 + $0xa8] sm:$0xff] %vm266_vm2, %v259_v42 }
  0x8f   :  { %v239_v47 = vmax.f32 %v158_v45, 0.0  ;;  %v246_v48 = vmax.f32 %v179_v46, 0.0 }
  0x90   :  { %v199_v49 = vpop.f32.mrf.mxu2  ;;  %v220_v50 = vpop.f32.mrf.mxu3 }
  0x91   :  { %268 = vst.msk [vmem:[%s621_s3 + $0x8] sm:$0xff] %vm266_vm2, %v239_v47  ;;  %v200_v51 = vadd.f32 %v476_v30, %v199_v49  ;;  %v221_v52 = vadd.f32 %v476_v30, %v220_v50 }
  0x92   :  { %275 = vst.msk [vmem:[%s621_s3 + $0x40] sm:$0xff] %vm266_vm2, %v246_v48 }
  0x93   :  { %v253_v53 = vmax.f32 %v200_v51, 0.0  ;;  %v260_v54 = vmax.f32 %v221_v52, 0.0 }
  0x94   :  { %v160_v55 = vpop.f32.mrf.mxu0  ;;  %v181_v56 = vpop.f32.mrf.mxu1 }
  0x95   :  { %282 = vst.msk [vmem:[%s621_s3 + $0x78] sm:$0xff] %vm266_vm2, %v253_v53  ;;  %v161_v57 = vadd.f32 %v476_v30, %v160_v55  ;;  %v182_v58 = vadd.f32 %v476_v30, %v181_v56 }
  0x96   :  { %289 = vst.msk [vmem:[%s621_s3 + $0xb0] sm:$0xff] %vm266_vm2, %v260_v54 }
  0x97   :  { %v240_v59 = vmax.f32 %v161_v57, 0.0  ;;  %v247_v60 = vmax.f32 %v182_v58, 0.0 }
  0x98   :  { %v202_v61 = vpop.f32.mrf.mxu2  ;;  %v223_v62 = vpop.f32.mrf.mxu3 }
  0x99   :  { %269 = vst.msk [vmem:[%s621_s3 + $0x10] sm:$0xff] %vm266_vm2, %v240_v59  ;;  %v203_v63 = vadd.f32 %v476_v30, %v202_v61  ;;  %v224_v0 = vadd.f32 %v476_v30, %v223_v62 }
  0x9a   :  { %276 = vst.msk [vmem:[%s621_s3 + $0x48] sm:$0xff] %vm266_vm2, %v247_v60 }
  0x9b   :  { %v254_v1 = vmax.f32 %v203_v63, 0.0  ;;  %v261_v2 = vmax.f32 %v224_v0, 0.0 }
  0x9c   :  { %v163_v3 = vpop.f32.mrf.mxu0  ;;  %v184_v4 = vpop.f32.mrf.mxu1 }
  0x9d   :  { %283 = vst.msk [vmem:[%s621_s3 + $0x80] sm:$0xff] %vm266_vm2, %v254_v1  ;;  %v164_v5 = vadd.f32 %v476_v30, %v163_v3  ;;  %v185_v6 = vadd.f32 %v476_v30, %v184_v4 }
  0x9e   :  { %290 = vst.msk [vmem:[%s621_s3 + $0xb8] sm:$0xff] %vm266_vm2, %v261_v2 }
  0x9f   :  { %v241_v7 = vmax.f32 %v164_v5, 0.0  ;;  %v248_v8 = vmax.f32 %v185_v6, 0.0 }
  0xa0   :  { %v205_v9 = vpop.f32.mrf.mxu2  ;;  %v226_v10 = vpop.f32.mrf.mxu3 }
  0xa1   :  { %270 = vst.msk [vmem:[%s621_s3 + $0x18] sm:$0xff] %vm266_vm2, %v241_v7  ;;  %v206_v11 = vadd.f32 %v476_v30, %v205_v9  ;;  %v227_v12 = vadd.f32 %v476_v30, %v226_v10 }
  0xa2   :  { %277 = vst.msk [vmem:[%s621_s3 + $0x50] sm:$0xff] %vm266_vm2, %v248_v8 }
  0xa3   :  { %v255_v13 = vmax.f32 %v206_v11, 0.0  ;;  %v262_v14 = vmax.f32 %v227_v12, 0.0 }
  0xa4   :  { %v166_v15 = vpop.f32.mrf.mxu0  ;;  %v187_v16 = vpop.f32.mrf.mxu1 }
  0xa5   :  { %284 = vst.msk [vmem:[%s621_s3 + $0x88] sm:$0xff] %vm266_vm2, %v255_v13  ;;  %v167_v17 = vadd.f32 %v476_v30, %v166_v15  ;;  %v188_v18 = vadd.f32 %v476_v30, %v187_v16 }
  0xa6   :  { %291 = vst.msk [vmem:[%s621_s3 + $0xc0] sm:$0xff] %vm266_vm2, %v262_v14 }
  0xa7   :  { %v242_v19 = vmax.f32 %v167_v17, 0.0  ;;  %v249_v20 = vmax.f32 %v188_v18, 0.0 }
  0xa8   :  { %v208_v21 = vpop.f32.mrf.mxu2  ;;  %v229_v22 = vpop.f32.mrf.mxu3 }
  0xa9   :  { %271 = vst.msk [vmem:[%s621_s3 + $0x20] sm:$0xff] %vm266_vm2, %v242_v19  ;;  %v209_v23 = vadd.f32 %v476_v30, %v208_v21  ;;  %v230_v24 = vadd.f32 %v476_v30, %v229_v22 }
  0xaa   :  { %278 = vst.msk [vmem:[%s621_s3 + $0x58] sm:$0xff] %vm266_vm2, %v249_v20 }
  0xab   :  { %v256_v25 = vmax.f32 %v209_v23, 0.0  ;;  %v263_v26 = vmax.f32 %v230_v24, 0.0 }
  0xac   :  { %v169_v27 = vpop.f32.mrf.mxu0  ;;  %v190_v28 = vpop.f32.mrf.mxu1 }
  0xad   :  { %285 = vst.msk [vmem:[%s621_s3 + $0x90] sm:$0xff] %vm266_vm2, %v256_v25  ;;  %v170_v29 = vadd.f32 %v476_v30, %v169_v27  ;;  %v191_v31 = vadd.f32 %v476_v30, %v190_v28 }
  0xae   :  { %292 = vst.msk [vmem:[%s621_s3 + $0xc8] sm:$0xff] %vm266_vm2, %v263_v26 }
  0xaf   :  { %v243_v32 = vmax.f32 %v170_v29, 0.0  ;;  %v250_v33 = vmax.f32 %v191_v31, 0.0 }
  0xb0   :  { %v211_v34 = vpop.f32.mrf.mxu2  ;;  %v232_v35 = vpop.f32.mrf.mxu3 }
  0xb1   :  { %272 = vst.msk [vmem:[%s621_s3 + $0x28] sm:$0xff] %vm266_vm2, %v243_v32  ;;  %v212_v36 = vadd.f32 %v476_v30, %v211_v34  ;;  %v233_v37 = vadd.f32 %v476_v30, %v232_v35 }
  0xb2   :  { %279 = vst.msk [vmem:[%s621_s3 + $0x60] sm:$0xff] %vm266_vm2, %v250_v33 }
  0xb3   :  { %v257_v38 = vmax.f32 %v212_v36, 0.0  ;;  %v264_v39 = vmax.f32 %v233_v37, 0.0 }
  0xb4   :  { %v172_v40 = vpop.f32.mrf.mxu0  ;;  %v193_v41 = vpop.f32.mrf.mxu1 }
  0xb5   :  { %286 = vst.msk [vmem:[%s621_s3 + $0x98] sm:$0xff] %vm266_vm2, %v257_v38  ;;  %v173_v42 = vadd.f32 %v476_v30, %v172_v40  ;;  %v194_v43 = vadd.f32 %v476_v30, %v193_v41 }
  0xb6   :  { %293 = vst.msk [vmem:[%s621_s3 + $0xd0] sm:$0xff] %vm266_vm2, %v264_v39 }
  0xb7   :  { %v244_v44 = vmax.f32 %v173_v42, 0.0  ;;  %v251_v45 = vmax.f32 %v194_v43, 0.0 }
  0xb8   :  { %v214_v46 = vpop.f32.mrf.mxu2  ;;  %v235_v47 = vpop.f32.mrf.mxu3 }
  0xb9   :  { %273 = vst.msk [vmem:[%s621_s3 + $0x30] sm:$0xff] %vm266_vm2, %v244_v44  ;;  %v215_v48 = vadd.f32 %v476_v30, %v214_v46  ;;  %v236_v49 = vadd.f32 %v476_v30, %v235_v47 }
  0xba   :  { %280 = vst.msk [vmem:[%s621_s3 + $0x68] sm:$0xff] %vm266_vm2, %v251_v45 }
  0xbb   :  { %v258_v50 = vmax.f32 %v215_v48, 0.0  ;;  %v265_v51 = vmax.f32 %v236_v49, 0.0 }
  0xbd   :  { %287 = vst.msk [vmem:[%s621_s3 + $0xa0] sm:$0xff] %vm266_vm2, %v258_v50 }
  0xbe   :  { %294 = vst.msk [vmem:[%s621_s3 + $0xd8] sm:$0xff] %vm266_vm2, %v265_v51 }

// kernel: conformer_forward.3
= control target key start
LH: loop header
LB: loop body
LE: loop exit
PB: predicated region body
PF: predicated region fallthrough
CT: control target
= control target key end

     0   :  { %s4624_s6 = smov 1   ;;  %s4625_s10 = smov 2   ;;  %s5771_s0 = inlined_call_operand.smem [shape: u32[41], index: -1, kind: input, shape index: {}] }
   0x1   :  { %s4694_s5 = sld [smem:[%s5771_s0]]   ;;  %s4626_s14 = smov 3  }
   0x2   :  { %s4699_s9 = sld [smem:[%s5771_s0 + %s4624_s6]]   ;;  %s4627_s18 = smov 4  }
   0x3   :  { %s4704_s13 = sld [smem:[%s5771_s0 + %s4625_s10]]   ;;  %s4628_s22 = smov 5  }
   0x4   :  { %s4709_s17 = sld [smem:[%s5771_s0 + %s4626_s14]]   ;;  %s4629_s26 = smov 6  }
   0x5   :  { %s4714_s21 = sld [smem:[%s5771_s0 + %s4627_s18]]   ;;  %s4630_s30 = smov 7  }
   0x6   :  { %s4719_s25 = sld [smem:[%s5771_s0 + %s4628_s22]]   ;;  %s4631_s4 = smov 8  }
   0x7   :  { %5843 = sst [smem:[#allocation2_spill]] %s4694_s5  ;;  %s4632_s10 = smov 9  }
   0x8   :  { %5844 = sst [smem:[#allocation3_spill]] %s4699_s9  ;;  %s4633_s15 = smov 10  }
   0x9   :  { %5845 = sst [smem:[#allocation4_spill]] %s4704_s13  ;;  %s4634_s20 = smov 11  }
   0xa   :  { %5846 = sst [smem:[#allocation5_spill]] %s4709_s17  ;;  %s4636_s1 = smov 13  }
   0xb   :  { %5847 = sst [smem:[#allocation6_spill]] %s4714_s21  ;;  %s4637_s7 = smov 14  }
   0xc   :  { %5848 = sst [smem:[#allocation7_spill]] %s4719_s25  ;;  %s4639_s22 = smov 16  }
   0xd   :  { %s4724_s29 = sld [smem:[%s5771_s0 + %s4629_s26]]   ;;  %s4635_s26 = smov 12  }
   0xe   :  { %s4729_s3 = sld [smem:[%s5771_s0 + %s4630_s30]]   ;;  %s4640_s28 = smov 17  }
   0xf   :  { %s4734_s8 = sld [smem:[%s5771_s0 + %s4631_s4]]  }
  0x10   :  { %s4739_s14 = sld [smem:[%s5771_s0 + %s4632_s10]]  }
  0x11   :  { %s4744_s19 = sld [smem:[%s5771_s0 + %s4633_s15]]   ;;  %s4638_s15 = smov 15  }
  0x12   :  { %s4749_s24 = sld [smem:[%s5771_s0 + %s4634_s20]]  }
  0x13   :  { %5849 = sst [smem:[#allocation8_spill]] %s4724_s29 }
  0x14   :  { %5850 = sst [smem:[#allocation9_spill]] %s4729_s3 }
  0x15   :  { %5851 = sst [smem:[#allocation10_spill]] %s4734_s8 }
  0x16   :  { %5852 = sst [smem:[#allocation11_spill]] %s4739_s14 }
  0x17   :  { %s4754_s30 = sld [smem:[%s5771_s0 + %s4635_s26]]  }
  0x18   :  { %s4759_s6 = sld [smem:[%s5771_s0 + %s4636_s1]]  }
  0x19   :  { %s4764_s12 = sld [smem:[%s5771_s0 + %s4637_s7]]   ;;  %s4641_s7 = smov 18  }
  0x1a   :  { %s4769_s20 = sld [smem:[%s5771_s0 + %s4638_s15]]   ;;  %s4642_s15 = smov 19  }
  0x1b   :  { %s4774_s27 = sld [smem:[%s5771_s0 + %s4639_s22]]   ;;  %s4643_s22 = smov 20  }
  0x1c   :  { %s4779_s4 = sld [smem:[%s5771_s0 + %s4640_s28]]   ;;  %s4644_s28 = smov 21  }
  0x1d   :  { %s4784_s13 = sld [smem:[%s5771_s0 + %s4641_s7]]   ;;  %s4645_s7 = smov 22  }
  0x1e   :  { %5853 = sst [smem:[#allocation12_spill]] %s4759_s6 }
  0x1f   :  { %5854 = sst [smem:[#allocation13_spill]] %s4764_s12 }
  0x20   :  { %s4789_s9 = sld [smem:[%s5771_s0 + %s4642_s15]]   ;;  %s4646_s15 = smov 23  }
  0x21   :  { %5855 = sst [smem:[#allocation14_spill]] %s4774_s27 }
  0x22   :  { %5856 = sst [smem:[#allocation15_spill]] %s4779_s4 }
  0x23   :  { %5857 = sst [smem:[#allocation16_spill]] %s4784_s13 }
  0x24   :  { %s4794_s27 = sld [smem:[%s5771_s0 + %s4643_s22]]   ;;  %s4647_s22 = smov 24  }
  0x25   :  { %s4799_s12 = sld [smem:[%s5771_s0 + %s4644_s28]]   ;;  %s4648_s28 = smov 25  }
  0x26   :  { %5858 = sst [smem:[#allocation17_spill]] %s4789_s9 }
  0x27   :  { %s4804_s13 = sld [smem:[%s5771_s0 + %s4645_s7]]   ;;  %s4649_s7 = smov 26  }
  0x28   :  { %s4809_s9 = sld [smem:[%s5771_s0 + %s4646_s15]]   ;;  %s4650_s15 = smov 27  }
  0x2a   :  { %5859 = sst [smem:[#allocation18_spill]] %s4794_s27 }
  0x2b   :  { %5860 = sst [smem:[#allocation19_spill]] %s4799_s12 }
  0x2c   :  { %s4814_s27 = sld [smem:[%s5771_s0 + %s4647_s22]]   ;;  %s4651_s22 = smov 28  }
  0x2d   :  { %5861 = sst [smem:[#allocation20_spill]] %s4804_s13 }
  0x2e   :  { %5862 = sst [smem:[#allocation21_spill]] %s4809_s9 }
  0x2f   :  { %s4819_s12 = sld [smem:[%s5771_s0 + %s4648_s28]]   ;;  %s4652_s28 = smov 29  }
  0x30   :  { %s4824_s13 = sld [smem:[%s5771_s0 + %s4649_s7]]   ;;  %s4653_s7 = smov 30  }
  0x31   :  { %s4829_s9 = sld [smem:[%s5771_s0 + %s4650_s15]]   ;;  %s4654_s15 = smov 31  }
  0x32   :  { %5863 = sst [smem:[#allocation22_spill]] %s4814_s27 }
  0x33   :  { %s4834_s27 = sld [smem:[%s5771_s0 + %s4651_s22]]   ;;  %s4655_s22 = smov 32  }
  0x35   :  { %5864 = sst [smem:[#allocation23_spill]] %s4819_s12 }
  0x36   :  { %5865 = sst [smem:[#allocation24_spill]] %s4824_s13 }
  0x37   :  { %5866 = sst [smem:[#allocation25_spill]] %s4829_s9 }
  0x38   :  { %s4839_s12 = sld [smem:[%s5771_s0 + %s4652_s28]]   ;;  %s4656_s28 = smov 33  }
  0x39   :  { %5867 = sst [smem:[#allocation26_spill]] %s4834_s27 }
  0x3a   :  { %s4844_s13 = sld [smem:[%s5771_s0 + %s4653_s7]]   ;;  %s4657_s7 = smov 34  }
  0x3b   :  { %s4849_s9 = sld [smem:[%s5771_s0 + %s4654_s15]]   ;;  %s4658_s15 = smov 35  }
  0x3c   :  { %s4854_s27 = sld [smem:[%s5771_s0 + %s4655_s22]]   ;;  %s4659_s22 = smov 36  }
  0x3e   :  { %5868 = sst [smem:[#allocation27_spill]] %s4839_s12 }
  0x3f   :  { %s4859_s12 = sld [smem:[%s5771_s0 + %s4656_s28]]   ;;  %s4660_s28 = smov 37  }
  0x40   :  { %5869 = sst [smem:[#allocation28_spill]] %s4844_s13 }
  0x41   :  { %5870 = sst [smem:[#allocation29_spill]] %s4849_s9 }
  0x42   :  { %5871 = sst [smem:[#allocation30_spill]] %s4854_s27 }
  0x43   :  { %s4864_s13 = sld [smem:[%s5771_s0 + %s4657_s7]]   ;;  %s4661_s7 = smov 38  }
  0x44   :  { %s4869_s9 = sld [smem:[%s5771_s0 + %s4658_s15]]   ;;  %s4662_s15 = smov 39  }
  0x45   :  { %5872 = sst [smem:[#allocation31_spill]] %s4859_s12 }
  0x46   :  { %s4874_s27 = sld [smem:[%s5771_s0 + %s4659_s22]]   ;;  %s4663_s22 = smov 40  }
  0x47   :  { %s4879_s12 = sld [smem:[%s5771_s0 + %s4660_s28]]   ;;  %s4896_s28 = smov 0  }
  0x49   :  { %5873 = sst [smem:[#allocation32_spill]] %s4864_s13 }
  0x4a   :  { %5874 = sst [smem:[#allocation33_spill]] %s4869_s9 }
  0x4b   :  { %s4884_s13 = sld [smem:[%s5771_s0 + %s4661_s7]]  }
  0x4c   :  { %5875 = sst [smem:[#allocation34_spill]] %s4874_s27 }
  0x4d   :  { %s4889_s9 = sld [smem:[%s5771_s0 + %s4662_s15]]  }
  0x4e   :  { %s4894_s27 = sld [smem:[%s5771_s0 + %s4663_s22]]  }
  0x54   :  { %5876 = sst [smem:[#allocation35_spill]] %s4894_s27 }
  0x55 LB: > { %s5877_s14 = sld [smem:[#allocation11_spill]]  ;;  %s4221_s1 = sadd.s32 4294967295, %s4622_s28   ;;  %s4622_s28 = sphi %s4896_s28, %s91_s28  }
  0x56   : > { %s5878_s6 = sld [smem:[#allocation12_spill]]  ;;  %p4225_p0 = scmp.ge.s32.totalorder %s4622_s28, 1 }
  0x57   : > { %s5879_s8 = sld [smem:[#allocation10_spill]]  ;;  %p1112_p1 = scmp.lt.s32.totalorder %s4622_s28, 3 }
  0x58   : > { %s5880_s4 = sld [smem:[#allocation15_spill]] }
  0x59   : > { %s5881_s3 = sld [smem:[#allocation9_spill]]  ;;  %p1113_p2 = pnand %p4225_p0, %p1112_p1 }
  0x5a   : > { %s5882_s25 = sld [smem:[#allocation7_spill]] }
  0x5b   : > { %s5883_s17 = sld [smem:[#allocation5_spill]]  ;;  %1116 = sbr.rel (%p1113_p2) target bundleno = 8282 (0x205a), region = 180 }
  0x5c   : > { %5884 = sst [smem:[#allocation36_spill]] %s4622_s28 }
  0x60   : > { %p1213_p3 = scmp.lt.s32.totalorder %s4221_s1, 1  ;;  %s5886_s5 = sld [smem:[#allocation2_spill]]  ;;  %vm1273_vm0 = vcmask 261120   ;;  %v4234_v43 = vld [vmem:[%s5882_s25 + $0x38] sm:$0xff]  ;;  %v4233_v44 = vld [vmem:[%s5882_s25 + $0x30] sm:$0xff]  ;;  %v4232_v46 = vld [vmem:[%s5882_s25 + $0x28] sm:$0xff] }
  0x61   : > { %v4905_v0 = vld [vmem:[%s5883_s17 + $0xf8] sm:$0xff]  ;;  %v4908_v1 = vld [vmem:[%s5883_s17 + $0xf0] sm:$0xff]  ;;  %v4926_v5 = vld [vmem:[%s5883_s17 + $0xe8] sm:$0xff]  ;;  %s5794_s7 = smov 96   ;;  %s5807_s10 = smov 64   ;;  %vm1350_vm1 = vcmask 785408  }
  0x62   : > { %v4911_v2 = vld [vmem:[%s5883_s17 + $0x118] sm:$0xff]  ;;  %1297 = vmatpush.msra.mxu1 %v4905_v0  ;;  %v4919_v4 = vld [vmem:[%s5883_s17 + $0x110] sm:$0xff]  ;;  %s5951_s1 = smov (!%p1213_p3, %s4221_s1), 1  ;;  %v4932_v7 = vld [vmem:[%s5883_s17 + $0x108] sm:$0xff]  ;;  %s5887_s21 = sld [smem:[#allocation6_spill]]  ;;  %vm1477_vm2 = vcmask 523264  }
  0x63   : > { %1329 = vmatpush.msra.mxu2 %v4911_v2  ;;  %v4916_v3 = vld [vmem:[%s5883_s17 + $0x78] sm:$0xff]  ;;  %5885 = sst [smem:[#allocation37_spill]] %s5951_s1  ;;  %v4929_v6 = vld [vmem:[%s5883_s17 + $0x70] sm:$0xff]  ;;  %v4937_v8 = vld [vmem:[%s5883_s17 + $0x68] sm:$0xff]  ;;  %s4399_s0 = smul.u32 56, %s5951_s1  ;;  %vm1605_vm3 = vcmask 260096  }
  0x64   : > { %1277 = vmatpush.msra.mxu0 %v4916_v3  ;;  %1357 = vmatpush.msra.mxu3 %v4916_v3  ;;  %v4943_v9 = vld [vmem:[%s5883_s17 + $0xe0] sm:$0xff]  ;;  %v4959_v12 = vld [vmem:[%s5883_s17 + $0xd8] sm:$0xff]  ;;  %v4974_v17 = vld [vmem:[%s5883_s17 + $0xd0] sm:$0xff]  ;;  %s5888_s29 = sld [smem:[#allocation8_spill]]  ;;  %vm1819_vm15 = vcmask 64512   ;;  %s5801_s23 = smov 120  }
  0x65   : > { %1298 = vmatpush.msra.mxu1 %v4908_v1  ;;  %1330 = vmatpush.msra.mxu2 %v4919_v4  ;;  %v4946_v10 = vld [vmem:[%s5883_s17 + $0x100] sm:$0xff]  ;;  %v4968_v15 = vld [vmem:[%s5883_s17 + $0x58] sm:$0xff]  ;;  %v4979_v18 = vld [vmem:[%s5883_s17 + $0x50] sm:$0xff]  ;;  %s5889_s11 = sld [smem:[#allocation13_spill]]  ;;  %s5799_s26 = smov 112  }
  0x66   : > { %1278 = vmatpush.msra.mxu0 %v4929_v6  ;;  %1358 = vmatpush.msra.mxu3 %v4929_v6  ;;  %v4951_v11 = vld [vmem:[%s5883_s17 + $0x60] sm:$0xff]  ;;  %s4954_s2 = scalar_lea.vmem %s5886_s5, %s4399_s0  ;;  %v4984_v19 = vld [vmem:[%s5883_s17 + $0xc8] sm:$0xff]  ;;  %v4997_v22 = vld [vmem:[%s5883_s17 + $0xb8] sm:$0xff]  ;;  %s5890_s15 = sld [smem:[#allocation3_spill]] }
  0x67   : > { %1299 = vmatpush.msra.mxu1 %v4926_v5  ;;  %1331 = vmatpush.msra.mxu2 %v4932_v7  ;;  %v4962_v13 = vld [vmem:[%s4954_s2 + $0x10] sm:$0x7f]  ;;  %v1229_v14 = vld [vmem:[%s4954_s2 + $0x18] sm:$0x7f]  ;;  %v4989_v20 = vld [vmem:[%s5883_s17 + $0xc0] sm:$0xff]  ;;  %s5891_s16 = sld [smem:[#allocation14_spill]] }
  0x68   : > { %1279 = vmatpush.msra.mxu0 %v4937_v8  ;;  %1359 = vmatpush.msra.mxu3 %v4937_v8  ;;  %v4470_v16 = vpack.i.bf16 %v1229_v14, %v4962_v13  ;;  %v4992_v21 = vld [vmem:[%s5883_s17 + $0x48] sm:$0xff]  ;;  %v5000_v23 = vld [vmem:[%s5883_s17 + $0x40] sm:$0xff]  ;;  %v5010_v25 = vld [vmem:[%s5883_s17 + $0xb0] sm:$0xff]  ;;  %s5892_s18 = sld [smem:[#allocation17_spill]]  ;;  %s5796_s0 = smov 88  }
  0x69   : > { %1300 = vmatpush.msra.mxu1 %v4943_v9  ;;  %1332 = vmatpush.msra.mxu2 %v4946_v10  ;;  %v5003_v24 = vld [vmem:[%s4954_s2 + $0x20] sm:$0x7f]  ;;  %v5013_v26 = vld [vmem:[%s5883_s17 + $0x38] sm:$0xff]  ;;  %v5020_v27 = vld [vmem:[%s5883_s17 + $0xa8] sm:$0xff]  ;;  %s5893_s22 = sld [smem:[#allocation16_spill]]  ;;  %s5905_s28 = smov 96  }
  0x6a   : > { %1280 = vmatpush.msra.mxu0 %v4951_v11  ;;  %1360 = vmatpush.msra.mxu3 %v4951_v11  ;;  %v5023_v28 = vld [vmem:[%s5883_s17 + $0x30] sm:$0xff]  ;;  %v5031_v29 = vld [vmem:[%s5883_s17 + $0xa0] sm:$0xff]  ;;  %v5034_v30 = vld [vmem:[%s5883_s17 + $0x28] sm:$0xff]  ;;  %s5898_s5 = sld [smem:[#allocation19_spill]] }
  0x6b   : > { %1301 = vmatpush.msra.mxu1 %v4959_v12  ;;  %1377 = vmatpush.msrb.mxu2 %v4905_v0  ;;  %v5041_v31 = vld [vmem:[%s5883_s17 + $0x98] sm:$0xff]  ;;  %v5044_v32 = vld [vmem:[%s5883_s17 + $0x20] sm:$0xff]  ;;  %v5051_v33 = vld [vmem:[%s5883_s17 + $0x90] sm:$0xff]  ;;  %s5906_s27 = sld [smem:[#allocation25_spill]] }
  0x6c   : > { %4471 = vrot.lane.b32.xlu0 %v4470_v16, %s5794_s7  ;;  %1281 = vmatpush.msra.mxu0 %v4968_v15  ;;  %v5054_v34 = vld [vmem:[%s5883_s17 + $0x18] sm:$0xff]  ;;  %v5061_v35 = vld [vmem:[%s5883_s17 + $0x88] sm:$0xff]  ;;  %v5064_v36 = vld [vmem:[%s5883_s17 + $0x10] sm:$0xff] }
  0x6d   : > { %1302 = vmatpush.msra.mxu1 %v4974_v17  ;;  %1361 = vmatpush.msra.mxu3 %v4968_v15  ;;  %v5075_v37 = vld [vmem:[%s5883_s17 + $0x80] sm:$0xff]  ;;  %v1234_v38 = vld [vmem:[%s5883_s17 + $0x8] sm:$0xff]  ;;  %v1232_v42 = vld [vmem:[%s4954_s2 + $0x30] sm:$0x7f] }
  0x6e   : > { %1378 = vmatpush.msrb.mxu2 %v4908_v1  ;;  %1282 = vmatpush.msra.mxu0 %v4979_v18  ;;  %v1227_v39 = vld [vmem:[%s4954_s2 + $0x8] sm:$0x7f]  ;;  %v1233_v40 = vld [vmem:[%s5883_s17] sm:$0xff]  ;;  %v1341_v55 = vld [vmem:[%s5882_s25 + $0x18] sm:$0xff]  ;;  %s5901_s17 = sld [smem:[#allocation21_spill]] }
  0x6f   : > { %1303 = vmatpush.msra.mxu1 %v4984_v19  ;;  %1362 = vmatpush.msra.mxu3 %v4979_v18  ;;  %v1226_v41 = vld [vmem:[%s4954_s2] sm:$0x7f]  ;;  %v1231_v45 = vld [vmem:[%s4954_s2 + $0x28] sm:$0x7f]  ;;  %v1340_v56 = vld [vmem:[%s5882_s25 + $0x10] sm:$0xff]  ;;  %s5798_s2 = smov 72  }
  0x70   : > { %1379 = vmatpush.msrb.mxu2 %v4926_v5  ;;  %1283 = vmatpush.msra.mxu0 %v4992_v21  ;;  %v4231_v47 = vld [vmem:[%s5882_s25 + $0x20] sm:$0xff]  ;;  %v4475_v48 = vpack.i.bf16 %v1231_v45, %v5003_v24  ;;  %v4241_v16 = vld [vmem:[%s5882_s25 + $0x58] sm:$0xff] }
  0x71   : > { %1304 = vmatpush.msra.mxu1 %v4989_v20  ;;  %1363 = vmatpush.msra.mxu3 %v4992_v21  ;;  %v4480_v58 = vld [vmem:[%s5887_s21] ss:$0 sm:$0xff]  ;;  %s5902_s21 = sld [smem:[#allocation23_spill]] }
  0x72   : > { %1380 = vmatpush.msrb.mxu2 %v4943_v9  ;;  %1284 = vmatpush.msra.mxu0 %v5000_v23 }
  0x73   : > { %1305 = vmatpush.msra.mxu1 %v4997_v22  ;;  %1364 = vmatpush.msra.mxu3 %v5000_v23 }
  0x74   : > { %1348 = vrot.lane.b32.xlu0 %v5003_v24, %s5794_s7  ;;  %1381 = vmatpush.msrb.mxu2 %v4959_v12 }
  0x75   : > { %1306 = vmatpush.msra.mxu1 %v5010_v25  ;;  %1285 = vmatpush.msra.mxu0 %v5013_v26 }
  0x76   : > { %1365 = vmatpush.msra.mxu3 %v5013_v26  ;;  %1382 = vmatpush.msrb.mxu2 %v4974_v17 }
  0x77   : > { %1307 = vmatpush.msra.mxu1 %v5020_v27  ;;  %1286 = vmatpush.msra.mxu0 %v5023_v28 }
  0x78   : > { %1366 = vmatpush.msra.mxu3 %v5023_v28  ;;  %1383 = vmatpush.msrb.mxu2 %v4984_v19 }
  0x79   : > { %1308 = vmatpush.msra.mxu1 %v5031_v29  ;;  %1287 = vmatpush.msra.mxu0 %v5034_v30 }
  0x7a   : > { %1367 = vmatpush.msra.mxu3 %v5034_v30  ;;  %1384 = vmatpush.msrb.mxu2 %v4989_v20 }
  0x7b   : > { %1309 = vmatpush.msra.mxu1 %v5041_v31  ;;  %1288 = vmatpush.msra.mxu0 %v5044_v32 }
  0x7c   : > { %1368 = vmatpush.msra.mxu3 %v5044_v32  ;;  %1385 = vmatpush.msrb.mxu2 %v4997_v22 }
  0x7d   : > { %1310 = vmatpush.msra.mxu1 %v5051_v33  ;;  %1289 = vmatpush.msra.mxu0 %v5054_v34 }
  0x7e   : > { %1369 = vmatpush.msra.mxu3 %v5054_v34  ;;  %1386 = vmatpush.msrb.mxu2 %v5010_v25 }
  0x7f   : > { %1311 = vmatpush.msra.mxu1 %v5061_v35  ;;  %1290 = vmatpush.msra.mxu0 %v5064_v36 }
  0x80   : > { %1370 = vmatpush.msra.mxu3 %v5064_v36  ;;  %1387 = vmatpush.msrb.mxu2 %v5020_v27 }
  0x81   : > { %1312 = vmatpush.msra.mxu1 %v5075_v37  ;;  %1291 = vmatpush.msra.mxu0 %v1234_v38 }
  0x82   : > { %1388 = vmatpush.msrb.mxu2 %v5031_v29  ;;  %1313 = vmatmul.f32.vlgmr.msra.gmra.mxu1 %v1227_v39 }
  0x83   : > { %1409 = vmatpush.msrb.mxu1 %v4911_v2  ;;  %1371 = vmatpush.msra.mxu3 %v1234_v38 }
  0x84   : > { %1389 = vmatpush.msrb.mxu2 %v5041_v31  ;;  %1292 = vmatpush.msra.mxu0 %v1233_v40 }
  0x85   : > { %1410 = vmatpush.msrb.mxu1 %v4919_v4  ;;  %4229 = vmatmul.msk.f32.vlgmr.msra.gmra.mxu2 %vm1273_vm0, %v4962_v13 }
  0x86   : > { %1390 = vmatpush.msrb.mxu2 %v5051_v33  ;;  %1372 = vmatpush.msra.mxu3 %v1233_v40 }
  0x87   : > { %1411 = vmatpush.msrb.mxu1 %v4932_v7  ;;  %1293 = vmatmul.f32.vlgmr.msra.gmra.mxu0 %v1226_v41 }
  0x88   : > { %1391 = vmatpush.msrb.mxu2 %v5061_v35  ;;  %1484 = vmatpush.msrb.mxu0 %v4916_v3  ;;  %v1338_v3 = vld [vmem:[%s5882_s25] sm:$0xff] }
  0x89   : > { %1412 = vmatpush.msrb.mxu1 %v4946_v10  ;;  %1475 = vrot.lane.b32.xlu1 %v1232_v42, %s5807_s10 }
  0x8a   : > { %1392 = vmatpush.msrb.mxu2 %v5075_v37  ;;  %1485 = vmatpush.msrb.mxu0 %v4929_v6 }
  0x8b   : > { %1438 = vmatpush.msra.mxu1 %v4234_v43  ;;  %1461 = vmatpush.msrb.mxu3 %v1341_v55 }
  0x8c   : > { %1536 = vmatpush.msra.mxu2 %v4911_v2  ;;  %1486 = vmatpush.msrb.mxu0 %v4937_v8 }
  0x8d   : > { %1439 = vmatpush.msra.mxu1 %v4233_v44  ;;  %1462 = vmatpush.msrb.mxu3 %v1340_v56 }
  0x8e   : > { %1537 = vmatpush.msra.mxu2 %v4919_v4  ;;  %1487 = vmatpush.msrb.mxu0 %v4951_v11 }
  0x8f   : > { %1440 = vmatpush.msra.mxu1 %v4232_v46 }
  0x90   : > { %1538 = vmatpush.msra.mxu2 %v4932_v7  ;;  %1488 = vmatpush.msrb.mxu0 %v4968_v15 }
  0x91   : > { %1441 = vmatpush.msra.mxu1 %v4231_v47  ;;  %4476 = vrot.lane.b32.xlu1 %v4475_v48, %s5807_s10  ;;  %v1586_v47 = vld [vmem:[%s5877_s14 + $0x18] sm:$0xff]  ;;  %v1585_v48 = vld [vmem:[%s5877_s14 + $0x10] sm:$0xff]  ;;  %s5813_s10 = smov 6  }
  0x92   : > { %1539 = vmatpush.msra.mxu2 %v4946_v10  ;;  %1489 = vmatpush.msrb.mxu0 %v4979_v18  ;;  %v4239_v18 = vld [vmem:[%s5882_s25 + $0x48] sm:$0xff] }
  0x94   : > { %1490 = vmatpush.msrb.mxu0 %v4992_v21 }
  0x96   : > { %1491 = vmatpush.msrb.mxu0 %v5000_v23 }
  0x98   : > { %1492 = vmatpush.msrb.mxu0 %v5013_v26 }
  0x9a   : > { %1493 = vmatpush.msrb.mxu0 %v5023_v28 }
  0x9c   : > { %1494 = vmatpush.msrb.mxu0 %v5034_v30  ;;  %v4481_v30 = vld [vmem:[%s5888_s29] ss:$0 sm:$0xff]  ;;  %s5904_s29 = sld [smem:[#allocation24_spill]] }
  0x9e   : > { %1495 = vmatpush.msrb.mxu0 %v5044_v32 }
  0xa0   : > { %1496 = vmatpush.msrb.mxu0 %v5054_v34 }
  0xa2   : > { %1497 = vmatpush.msrb.mxu0 %v5064_v36 }
  0xa4   : > { %1498 = vmatpush.msrb.mxu0 %v1234_v38 }
  0xa6   : > { %1499 = vmatpush.msrb.mxu0 %v1233_v40 }
  0xde   : > { %v4472_v49 = vpop.permute.xlu0 %4471 }
  0xdf   : > { %v4474_v50 = vunpack.i.h.bf16 %v4472_v49  ;;  %v4473_v51 = vunpack.i.l.bf16 %v4472_v49  ;;  %v1584_v49 = vld [vmem:[%s5877_s14 + $0x8] sm:$0xff] }
  0xe1   : > { %v1351_v52 = vsel %vm1350_vm1, %v4473_v51, %v4474_v50 }
  0xe2   : > { %1373 = vmatmul.f32.vlgmr.msra.gmra.mxu3 %v1351_v52 }
  0xe6   : > { %v1349_v53 = vpop.permute.xlu0 %1348 }
  0xe7   : > { %4230 = vmatmul.msk.f32.vlgmr.msrb.gmra.mxu1 %vm1273_vm0, %v1349_v53  ;;  %v1352_v54 = vsel %vm1350_vm1, %v4474_v50, %v1349_v53  ;;  %v1583_v50 = vld [vmem:[%s5877_s14] sm:$0xff]  ;;  %vm2051_vm1 = vcmask 1045504  }
  0xe8   : > { %1393 = vmatmul.f32.vlgmr.msrb.gmra.mxu2 %v1352_v54  ;;  %1504 = vmatpush.msrb.mxu1 %v4905_v0 }
  0xe9   : > { %1661 = vmatpush.msrb.mxu2 %v1586_v47 }
  0xea   : > { %1505 = vmatpush.msrb.mxu1 %v4908_v1  ;;  %v1339_v1 = vld [vmem:[%s5882_s25 + $0x8] sm:$0xff] }
  0xeb   : > { %1463 = vmatpush.msrb.mxu3 %v1339_v1  ;;  %1662 = vmatpush.msrb.mxu2 %v1585_v48  ;;  %v1749_v48 = vld [vmem:[%s4769_s20 + $0x18] sm:$0xff] }
  0xec   : > { %1506 = vmatpush.msrb.mxu1 %v4926_v5 }
  0xed   : > { %1464 = vmatpush.msrb.mxu3 %v1338_v3  ;;  %1663 = vmatpush.msrb.mxu2 %v1584_v49  ;;  %v1602_v3 = vld [vmem:[%s4749_s24 + $0x70] sm:$0xff]  ;;  %v1747_v49 = vld [vmem:[%s4769_s20 + $0x8] sm:$0xff] }
  0xee   : > { %1507 = vmatpush.msrb.mxu1 %v4943_v9 }
  0xef   : > { %1565 = vmatpush.msra.mxu3 %v4241_v16  ;;  %1664 = vmatpush.msrb.mxu2 %v1583_v50  ;;  %v4484_v16 = vld [vmem:[%s4744_s19] ss:$0 sm:$0xff] }
  0xf0   : > { %1508 = vmatpush.msrb.mxu1 %v4959_v12  ;;  %v1746_v50 = vld [vmem:[%s4769_s20] sm:$0xff] }
  0xf2   : > { %1509 = vmatpush.msrb.mxu1 %v4974_v17  ;;  %v4240_v17 = vld [vmem:[%s5882_s25 + $0x50] sm:$0xff] }
  0xf3   : > { %1566 = vmatpush.msra.mxu3 %v4240_v17  ;;  %v1589_v17 = vld [vmem:[%s4749_s24 + $0x8] sm:$0xff] }
  0xf4   : > { %1510 = vmatpush.msrb.mxu1 %v4984_v19  ;;  %v4238_v19 = vld [vmem:[%s5882_s25 + $0x40] sm:$0xff]  ;;  %s5903_s25 = sld [smem:[#allocation28_spill]] }
  0xf5   : > { %1567 = vmatpush.msra.mxu3 %v4239_v18  ;;  %v1588_v18 = vld [vmem:[%s4749_s24] sm:$0xff] }
  0xf6   : > { %1511 = vmatpush.msrb.mxu1 %v4989_v20 }
  0xf7   : > { %1568 = vmatpush.msra.mxu3 %v4238_v19 }
  0xf8   : > { %1512 = vmatpush.msrb.mxu1 %v4997_v22 }
  0xfa   : > { %1513 = vmatpush.msrb.mxu1 %v5010_v25 }
  0xfb   : > { %v1476_v57 = vpop.permute.xlu1 %1475 }
  0xfc   : > { %1514 = vmatpush.msrb.mxu1 %v5020_v27  ;;  %4237 = vmatmul.msk.f32.vlgmr.msra.gmra.mxu2 %vm1273_vm0, %v1476_v57 }
  0xfd   : > { %1769 = vmatpush.msra.mxu2 %v1749_v48 }
  0xfe   : > { %1515 = vmatpush.msrb.mxu1 %v5031_v29 }
  0xff   : > { %v1314_v61 = vpop.f32.mrf.mxu1 }
 0x100   : > { %1516 = vmatpush.msrb.mxu1 %v5041_v31 }
 0x102   : > { %1517 = vmatpush.msrb.mxu1 %v5051_v33 }
 0x103   : > { %v4477_v4 = vpop.permute.xlu1 %4476 }
 0x104   : > { %1518 = vmatpush.msrb.mxu1 %v5061_v35  ;;  %v1294_v59 = vpop.f32.mrf.mxu0  ;;  %v4478_v5 = vunpack.i.l.bf16 %v4477_v4  ;;  %v4479_v6 = vunpack.i.h.bf16 %v4477_v4  ;;  %v4666_v35 = vmov 32.0   ;;  %v1601_v4 = vld [vmem:[%s4749_s24 + $0x68] sm:$0xff] }
 0x105   : > { %v1295_v60 = vadd.f32 %v4480_v58, %v1294_v59  ;;  %4528 = vrcp.f32 %v4666_v35 }
 0x106   : > { %1519 = vmatpush.msrb.mxu1 %v5075_v37  ;;  %v1478_v7 = vsel %vm1477_vm2, %v4478_v5, %v4479_v6  ;;  %v1479_v15 = vsel %vm1477_vm2, %v4479_v6, %v1476_v57  ;;  %v1600_v5 = vld [vmem:[%s4749_s24 + $0x60] sm:$0xff]  ;;  %v1599_v6 = vld [vmem:[%s4749_s24 + $0x58] sm:$0xff]  ;;  %vm2072_vm2 = vcmask 56320  }
 0x107   : > { %v1315_v62 = vadd.f32 %v1314_v61, %v1295_v60  ;;  %1500 = vmatmul.f32.vlgmr.msrb.gmra.mxu0 %v1478_v7  ;;  %v4482_v60 = vld [vmem:[%s5881_s3] ss:$0 sm:$0xff]  ;;  %v1598_v7 = vld [vmem:[%s4749_s24 + $0x50] sm:$0xff] }
 0x108   : > { %v1334_v63 = vpop.f32.mrf.mxu2 }
 0x109   : > { %v1335_v0 = vadd.f32 %v1334_v63, %v1315_v62  ;;  %v4483_v63 = vld [vmem:[%s5879_s8] ss:$0 sm:$0xff] }
 0x10b   : > { %v1337_v2 = vmax.f32 %v1335_v0, 0.0  ;;  %v4529_v36 = vpop.eup %4528 }
 0x10c   : > { %v1610_v37 = vmul.f32 32.0, %v4529_v36  ;;  %vm1614_vm4 = vweird.f32 %v4529_v36 }
 0x10d   : > { %4236 = vmatmul.msk.f32.vlgmr.msrb.gmra.mxu3 %vm1273_vm0, %v1337_v2  ;;  %v1603_v2 = vld [vmem:[%s4749_s24 + $0x78] sm:$0xff] }
 0x10e   : > { %v1611_v38 = vsub.f32 1.0, %v1610_v37  ;;  %1692 = vmatpush.msrb.mxu3 %v1603_v2 }
 0x110   : > { %v1612_v39 = vmul.f32 %v4529_v36, %v1611_v38  ;;  %1693 = vmatpush.msrb.mxu3 %v1602_v3  ;;  %v4487_v3 = vld [vmem:[%s5889_s11] ss:$0 sm:$0xff] }
 0x112   : > { %v1613_v40 = vadd.f32 %v4529_v36, %v1612_v39  ;;  %1694 = vmatpush.msrb.mxu3 %v1601_v4 }
 0x114   : > { %v5159_v41 = vsel %vm1614_vm4, %v4529_v36, %v1613_v40  ;;  %1695 = vmatpush.msrb.mxu3 %v1600_v5  ;;  %v4485_v36 = vld [vmem:[%s4754_s30] ss:$0 sm:$0xff]  ;;  %vm2157_vm4 = vcmask 1040384  }
 0x116   : > { %1696 = vmatpush.msrb.mxu3 %v1599_v6  ;;  %v1579_v6 = vld [vmem:[%s5890_s15] sm:$0x7f] }
 0x118   : > { %1697 = vmatpush.msrb.mxu3 %v1598_v7  ;;  %v4488_v7 = vld [vmem:[%s5891_s16] ss:$0 sm:$0xff] }
 0x164   : > { %v1414_v12 = vpop.f32.mrf.mxu1 }
 0x165   : > { %v1374_v8 = vpop.f32.mrf.mxu3 }
 0x166   : > { %v1375_v9 = vadd.f32 %v4480_v58, %v1374_v8  ;;  %v1597_v8 = vld [vmem:[%s4749_s24 + $0x48] sm:$0xff] }
 0x167   : > { %1698 = vmatpush.msrb.mxu3 %v1597_v8  ;;  %v4489_v8 = vld [vmem:[%s5892_s18] ss:$0 sm:$0xff] }
 0x16b   : > { %v1394_v10 = vpop.f32.mrf.mxu2 }
 0x16c   : > { %v1395_v11 = vadd.f32 %v1394_v10, %v1375_v9  ;;  %v1596_v9 = vld [vmem:[%s4749_s24 + $0x40] sm:$0xff]  ;;  %v1595_v10 = vld [vmem:[%s4749_s24 + $0x38] sm:$0xff] }
 0x16d   : > { %1699 = vmatpush.msrb.mxu3 %v1596_v9 }
 0x16e   : > { %v1415_v13 = vadd.f32 %v1414_v12, %v1395_v11  ;;  %v1594_v11 = vld [vmem:[%s4749_s24 + $0x30] sm:$0xff]  ;;  %v1593_v12 = vld [vmem:[%s4749_s24 + $0x28] sm:$0xff] }
 0x16f   : > { %1700 = vmatpush.msrb.mxu3 %v1595_v10 }
 0x170   : > { %v1417_v14 = vmax.f32 %v1415_v13, 0.0  ;;  %v1592_v13 = vld [vmem:[%s4749_s24 + $0x20] sm:$0xff] }
 0x171   : > { %1701 = vmatpush.msrb.mxu3 %v1594_v11 }
 0x172   : > { %4235 = vmatmul.msk.f32.vlgmr.msra.gmra.mxu1 %vm1273_vm0, %v1417_v14  ;;  %v1591_v14 = vld [vmem:[%s4749_s24 + $0x18] sm:$0xff] }
 0x173   : > { %1702 = vmatpush.msrb.mxu3 %v1593_v12 }
 0x175   : > { %1703 = vmatpush.msrb.mxu3 %v1592_v13 }
 0x177   : > { %1704 = vmatpush.msrb.mxu3 %v1591_v14  ;;  %v4490_v14 = vld [vmem:[%s5893_s22] ss:$0 sm:$0xff] }
 0x17a   : > { %1520 = vmatmul.f32.vlgmr.msrb.gmra.mxu1 %v1479_v15  ;;  %v1590_v15 = vld [vmem:[%s4749_s24 + $0x10] sm:$0xff] }
 0x17b   : > { %1705 = vmatpush.msrb.mxu3 %v1590_v15 }
 0x17d   : > { %1706 = vmatpush.msrb.mxu3 %v1589_v17 }
 0x17f   : > { %v1541_v25 = vpop.f32.mrf.mxu2  ;;  %1707 = vmatpush.msrb.mxu3 %v1588_v18 }
 0x184   : > { %v1501_v21 = vpop.f32.mrf.mxu0 }
 0x185   : > { %v1502_v22 = vadd.f32 %v4480_v58, %v1501_v21 }
 0x190   : > { %v1466_v28 = vpop.f32.mrf.mxu3 }
 0x1ef   : > { %v1443_v20 = vpop.f32.mrf.mxu1 }
 0x1f0   : > { %v1467_v29 = vadd.f32 %v1466_v28, %v1443_v20 }
 0x1f7   : > { %v1521_v23 = vpop.f32.mrf.mxu1 }
 0x1f8   : > { %v1522_v24 = vadd.f32 %v1521_v23, %v1502_v22 }
 0x1fa   : > { %v1542_v26 = vadd.f32 %v1541_v25, %v1522_v24 }
 0x1fc   : > { %v1544_v27 = vmax.f32 %v1542_v26, 0.0 }
 0x1fe   : > { %4242 = vmatmul.msk.f32.vlgmr.msra.gmra.mxu3 %vm1273_vm0, %v1544_v27 }
 0x281   : > { %v1570_v31 = vpop.f32.mrf.mxu3 }
 0x282   : > { %v1573_v32 = vadd.f32 %v1570_v31, %v1467_v29 }
 0x284   : > { %v5155_v33 = vadd.f32 %v4481_v30, %v1573_v32 }
 0x286   : > { %v1606_v34 = vsel %vm1605_vm3, %v5155_v33, 0.0 }
 0x287   : > { %1607 = vadd.xlane.f32.xlu2 %v1606_v34 }
 0x2fa   : > { %v1608_v42 = vpop.xlane.xlu2 %1607 }
 0x2fb   : > { %v1616_v43 = vmul.f32 %v5159_v41, %v1608_v42 }
 0x2fd   : > { %v1617_v44 = vsub.f32 %v5155_v33, %v1616_v43 }
 0x2ff   : > { %v1618_v45 = vmul.f32 %v1617_v44, %v1617_v44 }
 0x301   : > { %v1619_v46 = vsel %vm1605_vm3, %v1618_v45, 0.0 }
 0x302   : > { %1620 = vadd.xlane.f32.xlu2 %v1619_v46 }
 0x375   : > { %v1621_v51 = vpop.xlane.xlu2 %1620 }
 0x376   : > { %v1622_v52 = vmul.f32 %v1621_v51, %v5159_v41  ;;  %v1780_v51 = vld [vmem:[%s5880_s4 + $0x18] sm:$0xff] }
 0x378   : > { %v1623_v53 = vadd.f32 6.1e-05, %v1622_v52  ;;  %v1779_v52 = vld [vmem:[%s5880_s4 + $0x10] sm:$0xff] }
 0x37a   : > { %4530 = vrsqrt.f32 %v1623_v53  ;;  %vm1630_vm6 = vweird.f32 %v1623_v53 }
 0x380   : > { %v4531_v54 = vpop.eup %4530 }
 0x381   : > { %v1625_v55 = vmul.f32 %v4531_v54, %v1623_v53  ;;  %vm1631_vm5 = vweird.f32 %v4531_v54  ;;  %v1778_v53 = vld [vmem:[%s5880_s4 + $0x8] sm:$0xff] }
 0x382   : > { %vm1632_vm7 = vmor %vm1630_vm6, %vm1631_vm5  ;;  %vm2162_vm5 = vcmask 1041408   ;;  %vm2167_vm6 = vcmask 1042432  }
 0x383   : > { %v1626_v56 = vmul.f32 %v4531_v54, %v1625_v55 }
 0x385   : > { %v1627_v57 = vmul.f32 0.5, %v1626_v56  ;;  %v1777_v56 = vld [vmem:[%s5880_s4] sm:$0xff] }
 0x387   : > { %v1628_v58 = vsub.f32 1.5, %v1627_v57 }
 0x389   : > { %v1629_v59 = vmul.f32 %v4531_v54, %v1628_v58 }
 0x38b   : > { %v1633_v61 = vsel %vm1632_vm7, %v4531_v54, %v1629_v59  ;;  %vm5842_vm7 = vcmask 1043456  }
 0x38c   : > { %v1634_v62 = vmul.f32 %v1633_v61, %v1617_v44 }
 0x38e   : > { %v1638_v0 = vmul.f32 %v4482_v60, %v1634_v62 }
 0x390   : > { %v1642_v1 = vadd.f32 %v4483_v63, %v1638_v0  ;;  %v4486_v0 = vld [vmem:[%s5878_s6] ss:$0 sm:$0xff] }
 0x392   : > { %4243 = vmatmul.msk.f32.vlgmr.msrb.gmra.mxu2 %vm1273_vm0, %v1642_v1 }
 0x415   : > { %v1666_v19 = vpop.f32.mrf.mxu2 }
 0x416   : > { %v1667_v20 = vadd.f32 %v4484_v16, %v1666_v19 }
 0x418   : > { %v4244_v21 = vmul.f32 -1.442695, %v1667_v20 }
 0x41a   : > { %4532 = vpow2.f32 %v4244_v21 }
 0x420   : > { %v4533_v22 = vpop.eup %4532 }
 0x421   : > { %v1672_v23 = vadd.f32 1.0, %v4533_v22 }
 0x423   : > { %4534 = vrcp.f32 %v1672_v23  ;;  %v1684_v27 = vand.u32 2147483648, %v1672_v23  ;;  %v1682_v29 = vand.u32 2147483647, %v1672_v23  ;;  %vm1678_vm9 = vweird.f32 %v1672_v23 }
 0x425   : > { %v1685_v31 = vor.u32 1.1754944e-38, %v1684_v27  ;;  %vm1683_vm11 = vcmp.eq.f32.partialorder %v1682_v29, 8.507059e+37 }
 0x429   : > { %v4535_v24 = vpop.eup %4534 }
 0x42a   : > { %v1674_v25 = vmul.f32 %v4535_v24, %v1672_v23  ;;  %vm1679_vm8 = vweird.f32 %v4535_v24 }
 0x42b   : > { %vm1680_vm10 = vmor %vm1678_vm9, %vm1679_vm8  ;;  %vm2177_vm8 = vcmask 1044480   ;;  %vm2210_vm9 = vcmask 55296  }
 0x42c   : > { %v1675_v26 = vsub.f32 1.0, %v1674_v25 }
 0x42e   : > { %v1676_v28 = vmul.f32 %v4535_v24, %v1675_v26 }
 0x430   : > { %v1677_v30 = vadd.f32 %v4535_v24, %v1676_v28 }
 0x432   : > { %v1681_v32 = vsel %vm1680_vm10, %v4535_v24, %v1677_v30 }
 0x433   : > { %v1686_v34 = vsel %vm1683_vm11, %v1685_v31, %v1681_v32 }
 0x434   : > { %v1688_v35 = vmul.f32 %v1686_v34, %v1667_v20 }
 0x436   : > { %1708 = vmatmul.f32.vlgmr.msrb.gmra.mxu3 %v1688_v35 }
 0x4b9   : > { %v1709_v37 = vpop.f32.mrf.mxu3 }
 0x4ba   : > { %v1710_v38 = vadd.f32 %v4485_v36, %v1709_v37 }
 0x4bc   : > { %v1712_v39 = vmul.f32 0.5, %v1710_v38 }
 0x4be   : > { %v5191_v40 = vadd.f32 %v1712_v39, %v5155_v33  ;;  %v1748_v33 = vld [vmem:[%s4769_s20 + $0x10] sm:$0xff] }
 0x4bf   : > { %1770 = vmatpush.msra.mxu2 %v1748_v33 }
 0x4c0   : > { %v1716_v42 = vsel %vm1605_vm3, %v5191_v40, 0.0 }
 0x4c1   : > { %1717 = vadd.xlane.f32.xlu0 %v1716_v42  ;;  %1771 = vmatpush.msra.mxu2 %v1747_v49 }
 0x4c3   : > { %1772 = vmatpush.msra.mxu2 %v1746_v50 }
 0x4c5   : > { %1796 = vmatpush.msrb.mxu2 %v1780_v51 }
 0x4c7   : > { %1797 = vmatpush.msrb.mxu2 %v1779_v52 }
 0x4c9   : > { %1798 = vmatpush.msrb.mxu2 %v1778_v53 }
 0x4cb   : > { %1799 = vmatpush.msrb.mxu2 %v1777_v56 }
 0x534   : > { %v1718_v43 = vpop.xlane.xlu0 %1717 }
 0x535   : > { %v1719_v44 = vmul.f32 %v1718_v43, %v5159_v41 }
 0x537   : > { %v1720_v45 = vsub.f32 %v5191_v40, %v1719_v44 }
 0x539   : > { %v1721_v46 = vmul.f32 %v1720_v45, %v1720_v45 }
 0x53b   : > { %v1722_v47 = vsel %vm1605_vm3, %v1721_v46, 0.0 }
 0x53c   : > { %1723 = vadd.xlane.f32.xlu1 %v1722_v47 }
 0x5af   : > { %v1724_v54 = vpop.xlane.xlu1 %1723 }
 0x5b0   : > { %v1725_v55 = vmul.f32 %v1724_v54, %v5159_v41 }
 0x5b2   : > { %v1726_v57 = vadd.f32 6.1e-05, %v1725_v55 }
 0x5b4   : > { %4536 = vrsqrt.f32 %v1726_v57  ;;  %vm1733_vm13 = vweird.f32 %v1726_v57 }
 0x5ba   : > { %v4537_v58 = vpop.eup %4536 }
 0x5bb   : > { %v1728_v59 = vmul.f32 %v4537_v58, %v1726_v57  ;;  %vm1734_vm12 = vweird.f32 %v4537_v58 }
 0x5bc   : > { %vm1735_vm14 = vmor %vm1733_vm13, %vm1734_vm12 }
 0x5bd   : > { %v1729_v60 = vmul.f32 %v4537_v58, %v1728_v59 }
 0x5bf   : > { %v1730_v61 = vmul.f32 0.5, %v1729_v60 }
 0x5c1   : > { %v1731_v62 = vsub.f32 1.5, %v1730_v61 }
 0x5c3   : > { %v1732_v63 = vmul.f32 %v4537_v58, %v1731_v62 }
 0x5c5   : > { %v1736_v1 = vsel %vm1735_vm14, %v4537_v58, %v1732_v63  ;;  %vm5822_vm14 = vcmask 1046528  }
 0x5c6   : > { %v1737_v2 = vmul.f32 %v1736_v1, %v1720_v45 }
 0x5c8   : > { %v1741_v4 = vmul.f32 %v4486_v0, %v1737_v2 }
 0x5ca   : > { %v1745_v5 = vadd.f32 %v4487_v3, %v1741_v4 }
 0x5cc   : > { %4245 = vmatmul.msk.f32.vlgmr.msra.gmra.mxu2 %vm1273_vm0, %v1745_v5 }
 0x5d4   : > { %4246 = vmatmul.msk.f32.vlgmr.msrb.gmra.mxu2 %vm1273_vm0, %v1579_v6 }
 0x64f   : > { %v1774_v9 = vpop.f32.mrf.mxu2 }
 0x650   : > { %v5214_v10 = vadd.f32 %v4488_v7, %v1774_v9 }
 0x652   : > { %1817 = vrot.lane.b32.xlu2 %v5214_v10, %s5794_s7  ;;  %v1814_v11 = vadd.f32 %v4489_v8, %v5214_v10  ;;  %v1808_v15 = vadd.f32 %v4490_v14, %v5214_v10  ;;  %s5803_s7 = smov 104  }
 0x654   : > { %v1815_v12 = vmul.f32 0.17677669, %v1814_v11  ;;  %v1809_v16 = vmul.f32 0.17677669, %v1808_v15 }
 0x656   : > { %1899 = vrot.lane.b32.xlu1 %v1815_v12, %s5801_s23 }
 0x657   : > { %v1801_v13 = vpop.f32.mrf.mxu2 }
 0x658   : > { %1957 = vrot.lane.b32.xlu0 %v1801_v13, %s5799_s26  ;;  %4249 = vmatpush.xpose.msk.msra.mxu1 %vm1819_vm15, %v1801_v13 }
 0x65a   : > { %1873 = vrot.lane.b32.xlu2 %v5214_v10, %s5796_s0  ;;  %s5797_s0 = smov 80  }
 0x65b   : > { %4250 = vmatmul.msk.f32.vlgmr.msra.gmra.mxu1 %vm1819_vm15, %v1815_v12 }
 0x65e   : > { %1985 = vrot.lane.b32.xlu1 %v5214_v10, %s5798_s2  ;;  %s5811_s2 = smov 1  }
 0x660   : > { %2011 = vrot.lane.b32.xlu0 %v1815_v12, %s5803_s7 }
 0x662   : > { %1871 = vrot.lane.b32.xlu2 %v1809_v16, %s5801_s23 }
 0x668   : > { %1927 = vrot.lane.b32.xlu0 %v1809_v16, %s5799_s26 }
 0x66a   : > { %1901 = vrot.lane.b32.xlu2 %v1801_v13, %s5801_s23  ;;  %s5826_s23 = smov 3  }
 0x672   : > { %1955 = vrot.lane.b32.xlu2 %v1815_v12, %s5799_s26  ;;  %s5815_s26 = smov 2  }
 0x67a   : > { %2013 = vrot.lane.b32.xlu2 %v1801_v13, %s5803_s7 }
 0x682   : > { %1929 = vrot.lane.b32.xlu2 %v5214_v10, %s5797_s0  ;;  %s5805_s0 = smov 8  }
 0x68a   : > { %1983 = vrot.lane.b32.xlu2 %v1809_v16, %s5803_s7  ;;  %s5809_s7 = smov 4  }
 0x6ac   : > { %v1818_v17 = vpop.permute.xlu2 %1817 }
 0x6ad   : > { %4247 = vmatpush.xpose.msk.msra.mxu2 %vm1819_vm15, %v1818_v17 }
 0x6b0   : > { %4248 = vmatmul.msk.f32.vlgmr.msra.gmra.mxu2 %vm1819_vm15, %v1809_v16 }
 0x6b4   : > { %v1874_v18 = vpop.permute.xlu2 %1873 }
 0x6b5   : > { %4251 = vmatpush.xpose.msk.msrb.mxu2 %vm1819_vm15, %v1874_v18 }
 0x6bc   : > { %v1872_v19 = vpop.permute.xlu2 %1871 }
 0x6bd   : > { %4252 = vmatmul.msk.f32.vlgmr.msrb.gmra.mxu2 %vm1819_vm15, %v1872_v19 }
 0x6c4   : > { %v1902_v20 = vpop.permute.xlu2 %1901 }
 0x6c5   : > { %4253 = vmatpush.xpose.msk.msra.mxu3 %vm1819_vm15, %v1902_v20 }
 0x6c8   : > { %v1900_v21 = vpop.permute.xlu1 %1899 }
 0x6c9   : > { %4254 = vmatmul.msk.f32.vlgmr.msra.gmra.mxu3 %vm1819_vm15, %v1900_v21 }
 0x6ca   : > { %v1958_v22 = vpop.permute.xlu0 %1957 }
 0x6cb   : > { %4257 = vmatpush.xpose.msk.msra.mxu2 %vm1819_vm15, %v1958_v22 }
 0x6cc   : > { %v1956_v23 = vpop.permute.xlu2 %1955 }
 0x6ce   : > { %4258 = vmatmul.msk.f32.vlgmr.msra.gmra.mxu2 %vm1819_vm15, %v1956_v23 }
 0x6d0   : > { %v1986_v24 = vpop.permute.xlu1 %1985 }
 0x6d1   : > { %4259 = vmatpush.xpose.msk.msrb.mxu3 %vm1819_vm15, %v1986_v24 }
 0x6d2   : > { %v2012_v26 = vpop.permute.xlu0 %2011 }
 0x6d4   : > { %v2014_v25 = vpop.permute.xlu2 %2013 }
 0x6d5   : > { %4261 = vmatpush.xpose.msk.msra.mxu0 %vm1819_vm15, %v2014_v25 }
 0x6d8   : > { %4262 = vmatmul.msk.f32.vlgmr.msra.gmra.mxu0 %vm1819_vm15, %v2012_v26  ;;  %v1868_v36 = vpop.f32.mrf.mxu1 }
 0x6d9   : > { %v2043_v39 = vrot.slane %v1868_v36, 1  ;;  %v2073_v56 = vsel %vm2072_vm2, %v1868_v36, 0.0 }
 0x6da   : > { %v1928_v28 = vpop.permute.xlu0 %1927 }
 0x6db   : > { %v2052_v45 = vsel %vm2051_vm1, %v2043_v39, 0.0 }
 0x6dc   : > { %v1930_v27 = vpop.permute.xlu2 %1929 }
 0x6dd   : > { %4255 = vmatpush.xpose.msk.msrb.mxu1 %vm1819_vm15, %v1930_v27 }
 0x6e0   : > { %4256 = vmatmul.msk.f32.vlgmr.msrb.gmra.mxu1 %vm1819_vm15, %v1928_v28 }
 0x6e4   : > { %v1984_v29 = vpop.permute.xlu2 %1983 }
 0x6e5   : > { %4260 = vmatmul.msk.f32.vlgmr.msrb.gmra.mxu3 %vm1819_vm15, %v1984_v29 }
 0x733   : > { %v5252_v30 = vpop.f32.mrf.mxu2 }
 0x740   : > { %v5254_v31 = vpop.f32.mrf.mxu2 }
 0x74c   : > { %v1924_v32 = vpop.f32.mrf.mxu3 }
 0x74d   : > { %v2044_v34 = vrot.slane %v1924_v32, 1  ;;  %v2074_v49 = vsel %vm2072_vm2, %v1924_v32, 0.0 }
 0x74f   : > { %v2053_v35 = vsel %vm2051_vm1, %v2044_v34, 0.0 }
 0x750   : > { %2062 = vrot.lane.b32.xlu1 %v2053_v35, %s5805_s0 }
 0x751   : > { %v1980_v37 = vpop.f32.mrf.mxu2 }
 0x752   : > { %v2045_v38 = vrot.slane %v1980_v37, 1  ;;  %v2075_v53 = vsel %vm2072_vm2, %v1980_v37, 0.0 }
 0x754   : > { %v2054_v42 = vsel %vm2051_vm1, %v2045_v38, 0.0 }
 0x755   : > { %v2036_v43 = vpop.f32.mrf.mxu0  ;;  %2064 = vrot.lane.b32.xlu0 %v2054_v42, %s5805_s0 }
 0x756   : > { %v2046_v44 = vrot.slane %v2036_v43, 1  ;;  %v2076_v47 = vsel %vm2072_vm2, %v2036_v43, 0.0 }
 0x758   : > { %2060 = vrot.lane.b32.xlu1 %v2052_v45, %s5805_s0  ;;  %v2055_v46 = vsel %vm2051_vm1, %v2046_v44, 0.0 }
 0x759   : > { %2066 = vrot.lane.b32.xlu2 %v2055_v46, %s5805_s0  ;;  %s5824_s0 = smov 5  }
 0x75d   : > { %v1952_v44 = vpop.f32.mrf.mxu1 }
 0x7b3   : > { %v2067_v48 = vpop.permute.xlu2 %2066 }
 0x7b4   : > { %v5266_v33 = vsel %vm1819_vm15, %v2076_v47, %v2067_v48 }
 0x7b5   : > { %2091 = vrot.lane.b32.xlu0 %v5266_v33, %s5811_s2 }
 0x7c2   : > { %v2063_v50 = vpop.permute.xlu1 %2062 }
 0x7c3   : > { %v2078_v51 = vsel %vm1819_vm15, %v2074_v49, %v2063_v50 }
 0x7c4   : > { %2087 = vrot.lane.b32.xlu1 %v2078_v51, %s5811_s2  ;;  %2099 = vrot.lane.b32.xlu2 %v2078_v51, %s5815_s26 }
 0x7c5   : > { %2111 = vrot.lane.b32.xlu0 %v2078_v51, %s5826_s23 }
 0x7c7   : > { %v2065_v52 = vpop.permute.xlu0 %2064 }
 0x7c8   : > { %v2079_v54 = vsel %vm1819_vm15, %v2075_v53, %v2065_v52 }
 0x7ca   : > { %v2061_v55 = vpop.permute.xlu1 %2060 }
 0x7cb   : > { %v5294_v57 = vsel %vm1819_vm15, %v2073_v56, %v2061_v55 }
 0x7cc   : > { %2123 = vrot.lane.b32.xlu1 %v2078_v51, %s5809_s7  ;;  %2135 = vrot.lane.b32.xlu2 %v2078_v51, %s5824_s0 }
 0x7cd   : > { %2089 = vrot.lane.b32.xlu0 %v2079_v54, %s5811_s2 }
 0x7d4   : > { %2147 = vrot.lane.b32.xlu2 %v2078_v51, %s5813_s10  ;;  %2101 = vrot.lane.b32.xlu1 %v2079_v54, %s5815_s26 }
 0x7d5   : > { %2125 = vrot.lane.b32.xlu0 %v2079_v54, %s5809_s7 }
 0x7dc   : > { %2113 = vrot.lane.b32.xlu2 %v2079_v54, %s5826_s23  ;;  %2115 = vrot.lane.b32.xlu1 %v5266_v33, %s5826_s23 }
 0x7dd   : > { %2137 = vrot.lane.b32.xlu0 %v2079_v54, %s5824_s0 }
 0x7e4   : > { %2103 = vrot.lane.b32.xlu2 %v5266_v33, %s5815_s26  ;;  %2149 = vrot.lane.b32.xlu1 %v2079_v54, %s5813_s10 }
 0x7e5   : > { %2127 = vrot.lane.b32.xlu0 %v5266_v33, %s5809_s7 }
 0x7ec   : > { %2139 = vrot.lane.b32.xlu2 %v5266_v33, %s5824_s0  ;;  %2151 = vrot.lane.b32.xlu1 %v5266_v33, %s5813_s10 }
 0x7ed   : > { %2085 = vrot.lane.b32.xlu0 %v5294_v57, %s5811_s2  ;;  %s5894_s2 = sld [smem:[#allocation4_spill]] }
 0x7f4   : > { %2109 = vrot.lane.b32.xlu2 %v5294_v57, %s5826_s23  ;;  %2097 = vrot.lane.b32.xlu1 %v5294_v57, %s5815_s26  ;;  %s5829_s23 = smov 24  }
 0x7fc   : > { %2121 = vrot.lane.b32.xlu1 %v5294_v57, %s5809_s7  ;;  %s5818_s7 = smov 122  }
 0x81e   : > { %v2100_v58 = vpop.permute.xlu2 %2099 }
 0x826   : > { %v2136_v60 = vpop.permute.xlu2 %2135 }
 0x827   : > { %v2092_v59 = vpop.permute.xlu0 %2091 }
 0x828   : > { %v2161_v22 = vsel %vm2157_vm4, %v5266_v33, %v2092_v59 }
 0x82e   : > { %v2148_v3 = vpop.permute.xlu2 %2147 }
 0x836   : > { %v2088_v61 = vpop.permute.xlu1 %2087  ;;  %v2114_v11 = vpop.permute.xlu2 %2113 }
 0x837   : > { %v2112_v62 = vpop.permute.xlu0 %2111  ;;  %v2159_v63 = vsel %vm2157_vm4, %v2078_v51, %v2088_v61 }
 0x838   : > { %v2164_v0 = vsel %vm2162_vm5, %v2159_v63, %v2100_v58 }
 0x839   : > { %v2169_v1 = vsel %vm2167_vm6, %v2164_v0, %v2112_v62 }
 0x83e   : > { %v2124_v2 = vpop.permute.xlu1 %2123  ;;  %v2104_v17 = vpop.permute.xlu2 %2103 }
 0x83f   : > { %v2174_v4 = vsel %vm5842_vm7, %v2169_v1, %v2124_v2  ;;  %v2090_v5 = vpop.permute.xlu0 %2089  ;;  %v2166_v24 = vsel %vm2162_vm5, %v2161_v22, %v2104_v17 }
 0x840   : > { %v2179_v6 = vsel %vm2177_vm8, %v2174_v4, %v2136_v60  ;;  %v2160_v12 = vsel %vm2157_vm4, %v2079_v54, %v2090_v5 }
 0x841   : > { %v2183_v7 = vsel %vm2051_vm1, %v2179_v6, %v2148_v3 }
 0x842   : > { %2192 = vrot.lane.b32.xlu2 %v2183_v7, %s5818_s7 }
 0x846   : > { %v2102_v8 = vpop.permute.xlu1 %2101  ;;  %v2140_v27 = vpop.permute.xlu2 %2139 }
 0x847   : > { %v2126_v9 = vpop.permute.xlu0 %2125  ;;  %v2165_v14 = vsel %vm2162_vm5, %v2160_v12, %v2102_v8 }
 0x848   : > { %v2170_v16 = vsel %vm2167_vm6, %v2165_v14, %v2114_v11 }
 0x849   : > { %v2175_v18 = vsel %vm5842_vm7, %v2170_v16, %v2126_v9 }
 0x84a   : > { %2145 = vrot.lane.b32.xlu2 %v5294_v57, %s5813_s10  ;;  %s5817_s10 = sshll.u32 %s5951_s1, 3  ;;  %s5907_s1 = sld [smem:[#allocation26_spill]] }
 0x84b   : > { %s5338_s26 = scalar_lea.vmem %s5894_s2, %s5817_s10  ;;  %s5820_s2 = smov 56  }
 0x84c   : > { %v1580_v36 = vld [vmem:[%s5338_s26] sm:$0x7f]  ;;  %s5895_s10 = smov 64  }
 0x84e   : > { %v2116_v13 = vpop.permute.xlu1 %2115  ;;  %v2110_v34 = vpop.permute.xlu2 %2109 }
 0x84f   : > { %v2138_v15 = vpop.permute.xlu0 %2137  ;;  %v2171_v25 = vsel %vm2167_vm6, %v2166_v24, %v2116_v13 }
 0x850   : > { %v2180_v19 = vsel %vm2177_vm8, %v2175_v18, %v2138_v15 }
 0x856   : > { %v2150_v20 = vpop.permute.xlu1 %2149 }
 0x857   : > { %v2184_v21 = vsel %vm2051_vm1, %v2180_v19, %v2150_v20  ;;  %v2128_v23 = vpop.permute.xlu0 %2127 }
 0x858   : > { %2194 = vrot.lane.b32.xlu0 %v2184_v21, %s5818_s7  ;;  %v2176_v26 = vsel %vm5842_vm7, %v2171_v25, %v2128_v23 }
 0x859   : > { %v2181_v29 = vsel %vm2177_vm8, %v2176_v26, %v2140_v27 }
 0x85e   : > { %v2152_v28 = vpop.permute.xlu1 %2151 }
 0x85f   : > { %v2185_v32 = vsel %vm2051_vm1, %v2181_v29, %v2152_v28  ;;  %v2086_v42 = vpop.permute.xlu0 %2085 }
 0x860   : > { %2133 = vrot.lane.b32.xlu0 %v5294_v57, %s5824_s0  ;;  %2196 = vrot.lane.b32.xlu1 %v2185_v32, %s5818_s7  ;;  %v2158_v47 = vsel %vm2157_vm4, %v5294_v57, %v2086_v42  ;;  %v2008_v57 = vpop.f32.mrf.mxu3  ;;  %s5828_s0 = smov 16  }
 0x866   : > { %v2098_v43 = vpop.permute.xlu1 %2097 }
 0x867   : > { %v2163_v33 = vsel %vm2162_vm5, %v2158_v47, %v2098_v43 }
 0x86e   : > { %v2122_v49 = vpop.permute.xlu1 %2121 }
 0x89c   : > { %v2193_v35 = vpop.permute.xlu2 %2192 }
 0x89d   : > { %v2203_v37 = vadd.f32 %v2193_v35, %v5254_v31  ;;  %v2168_v31 = vsel %vm2167_vm6, %v2163_v33, %v2110_v34 }
 0x89e   : > { %v2173_v51 = vsel %vm5842_vm7, %v2168_v31, %v2122_v49 }
 0x89f   : > { %v2207_v38 = vadd.f32 %v2203_v37, %v1580_v36 }
 0x8a1   : > { %v2214_v39 = vsel %vm2210_vm9, %v2207_v38, -inf }
 0x8a2   : > { %2215 = vmax.xlane.f32.xlu0 %v2214_v39 }
 0x8a4   : > { %v2146_v53 = vpop.permute.xlu2 %2145 }
 0x8ca   : > { %v2195_v45 = vpop.permute.xlu0 %2194 }
 0x8cb   : > { %v2204_v46 = vadd.f32 %v2195_v45, %v1952_v44 }
 0x8cd   : > { %v2208_v48 = vadd.f32 %v2204_v46, %v1580_v36 }
 0x8cf   : > { %v2217_v50 = vsel %vm2210_vm9, %v2208_v48, -inf }
 0x8d0   : > { %2218 = vmax.xlane.f32.xlu1 %v2217_v50 }
 0x8d2   : > { %v2134_v52 = vpop.permute.xlu0 %2133  ;;  %v2197_v56 = vpop.permute.xlu1 %2196 }
 0x8d3   : > { %v2178_v54 = vsel %vm2177_vm8, %v2173_v51, %v2134_v52  ;;  %v2205_v58 = vadd.f32 %v2197_v56, %v2008_v57 }
 0x8d4   : > { %v2182_v55 = vsel %vm2051_vm1, %v2178_v54, %v2146_v53 }
 0x8d5   : > { %2190 = vrot.lane.b32.xlu2 %v2182_v55, %s5818_s7  ;;  %v2209_v59 = vadd.f32 %v2205_v58, %v1580_v36  ;;  %s5823_s7 = smov 48  }
 0x8d7   : > { %v2220_v60 = vsel %vm2210_vm9, %v2209_v59, -inf }
 0x8fe   : > { %2221 = vmax.xlane.f32.xlu2 %v2220_v60 }
 0x915   : > { %v2216_v61 = vpop.xlane.xlu0 %2215 }
 0x916   : > { %v2224_v62 = vsub.f32 %v2207_v38, %v2216_v61 }
 0x918   : > { %v2229_v63 = vmul.f32 1.442695, %v2224_v62 }
 0x91a   : > { %4538 = vpow2.f32 %v2229_v63 }
 0x920   : > { %v4539_v0 = vpop.eup %4538 }
 0x921   : > { %v2238_v1 = vsel %vm2210_vm9, %v4539_v0, 0.0 }
 0x922   : > { %2239 = vadd.xlane.f32.xlu1 %v2238_v1 }
 0x92f   : > { %v2191_v2 = vpop.permute.xlu2 %2190 }
 0x930   : > { %v2202_v3 = vadd.f32 %v2191_v2, %v5252_v30 }
 0x932   : > { %v2206_v4 = vadd.f32 %v2202_v3, %v1580_v36 }
 0x934   : > { %v2211_v5 = vsel %vm2210_vm9, %v2206_v4, -inf }
 0x935   : > { %2212 = vmax.xlane.f32.xlu0 %v2211_v5 }
 0x93b   : > { %2335 = vrot.lane.b32.xlu1 %v5214_v10, %s5820_s2  ;;  %s5821_s2 = smov 40  }
 0x943   : > { %v2219_v6 = vpop.xlane.xlu1 %2218  ;;  %2307 = vrot.lane.b32.xlu1 %v5214_v10, %s5895_s10 }
 0x944   : > { %v2225_v7 = vsub.f32 %v2208_v48, %v2219_v6 }
 0x946   : > { %v2231_v8 = vmul.f32 1.442695, %v2225_v7 }
 0x948   : > { %4540 = vpow2.f32 %v2231_v8 }
 0x94e   : > { %v4541_v9 = vpop.eup %4540 }
 0x94f   : > { %v2241_v11 = vsel %vm2210_vm9, %v4541_v9, 0.0 }
 0x950   : > { %2242 = vadd.xlane.f32.xlu0 %v2241_v11 }
 0x964   : > { %2362 = vrot.lane.b32.xlu0 %v5214_v10, %s5823_s7  ;;  %s5897_s7 = sld [smem:[#allocation18_spill]] }
 0x971   : > { %v2222_v30 = vpop.xlane.xlu2 %2221 }
 0x972   : > { %v2226_v12 = vsub.f32 %v2209_v59, %v2222_v30 }
 0x974   : > { %v2233_v13 = vmul.f32 1.442695, %v2226_v12 }
 0x976   : > { %4542 = vpow2.f32 %v2233_v13 }
 0x97c   : > { %v5363_v14 = vpop.eup %4542 }
 0x97d   : > { %v2244_v15 = vsel %vm2210_vm9, %v5363_v14, 0.0 }
 0x97e   : > { %2245 = vadd.xlane.f32.xlu2 %v2244_v15  ;;  %v2435_v15 = vld [vmem:[%s5897_s7 + $0x10] sm:$0xff] }
 0x995   : > { %v2240_v16 = vpop.xlane.xlu1 %2239 }
 0x996   : > { %4544 = vrcp.f32 %v2240_v16  ;;  %2389 = vrot.lane.b32.xlu2 %v5214_v10, %s5821_s2  ;;  %v2273_v22 = vand.u32 2147483648, %v2240_v16  ;;  %vm2267_vm11 = vweird.f32 %v2240_v16  ;;  %v2271_v23 = vand.u32 2147483647, %v2240_v16  ;;  %s5896_s2 = smov 8  }
 0x998   : > { %v2274_v25 = vor.u32 1.1754944e-38, %v2273_v22  ;;  %vm2272_vm13 = vcmp.eq.f32.partialorder %v2271_v23, 8.507059e+37 }
 0x99c   : > { %v4545_v17 = vpop.eup %4544 }
 0x99d   : > { %v2263_v18 = vmul.f32 %v4545_v17, %v2240_v16  ;;  %vm2268_vm10 = vweird.f32 %v4545_v17  ;;  %v2434_v16 = vld [vmem:[%s5897_s7 + $0x8] sm:$0xff] }
 0x99e   : > { %vm2269_vm12 = vmor %vm2267_vm11, %vm2268_vm10 }
 0x99f   : > { %v2264_v19 = vsub.f32 1.0, %v2263_v18 }
 0x9a1   : > { %v2265_v20 = vmul.f32 %v4545_v17, %v2264_v19 }
 0x9a3   : > { %v2266_v21 = vadd.f32 %v4545_v17, %v2265_v20 }
 0x9a5   : > { %v2270_v24 = vsel %vm2269_vm12, %v4545_v17, %v2266_v21  ;;  %v2433_v17 = vld [vmem:[%s5897_s7] sm:$0xff] }
 0x9a6   : > { %v2275_v28 = vsel %vm2272_vm13, %v2274_v25, %v2270_v24  ;;  %v4491_v25 = vld [vmem:[%s5898_s5] ss:$0 sm:$0xff] }
 0x9a7   : > { %v2276_v32 = vmul.f32 %v4539_v0, %v2275_v28 }
 0x9a8   : > { %v2213_v26 = vpop.xlane.xlu0 %2212 }
 0x9a9   : > { %v2223_v27 = vsub.f32 %v2206_v4, %v2213_v26 }
 0x9ab   : > { %v2227_v29 = vmul.f32 1.442695, %v2223_v27 }
 0x9ad   : > { %4546 = vpow2.f32 %v2227_v29  ;;  %v2336_v10 = vpop.permute.xlu1 %2335 }
 0x9ae   : > { %4265 = vmatpush.msk.msrb.mxu2 %vm5822_vm14, %v2336_v10 }
 0x9af   : > { %4266 = vmatmul.msk.f32.vlgmr.msrb.gmra.mxu2 %vm2072_vm2, %v2276_v32 }
 0x9b3   : > { %v5371_v34 = vpop.eup %4546 }
 0x9b4   : > { %v2235_v35 = vsel %vm2210_vm9, %v5371_v34, 0.0 }
 0x9b5   : > { %v2308_v36 = vpop.permute.xlu1 %2307  ;;  %2236 = vadd.xlane.f32.xlu0 %v2235_v35 }
 0x9b6   : > { %4263 = vmatpush.msk.msra.mxu1 %vm5822_vm14, %v2308_v36 }
 0x9c3   : > { %v2243_v37 = vpop.xlane.xlu0 %2242 }
 0x9c4   : > { %4548 = vrcp.f32 %v2243_v37  ;;  %v2288_v43 = vand.u32 2147483648, %v2243_v37  ;;  %v2286_v45 = vand.u32 2147483647, %v2243_v37  ;;  %vm2282_vm11 = vweird.f32 %v2243_v37 }
 0x9c6   : > { %v2289_v47 = vor.u32 1.1754944e-38, %v2288_v43  ;;  %vm2287_vm13 = vcmp.eq.f32.partialorder %v2286_v45, 8.507059e+37 }
 0x9ca   : > { %v4549_v38 = vpop.eup %4548 }
 0x9cb   : > { %v2278_v39 = vmul.f32 %v4549_v38, %v2243_v37  ;;  %vm2283_vm10 = vweird.f32 %v4549_v38 }
 0x9cc   : > { %vm2284_vm12 = vmor %vm2282_vm11, %vm2283_vm10 }
 0x9cd   : > { %v2279_v42 = vsub.f32 1.0, %v2278_v39 }
 0x9cf   : > { %v2280_v44 = vmul.f32 %v4549_v38, %v2279_v42 }
 0x9d1   : > { %v2281_v46 = vadd.f32 %v4549_v38, %v2280_v44 }
 0x9d3   : > { %v2285_v48 = vsel %vm2284_vm12, %v4549_v38, %v2281_v46 }
 0x9d4   : > { %v2290_v33 = vsel %vm2287_vm13, %v2289_v47, %v2285_v48 }
 0x9d5   : > { %v2291_v49 = vmul.f32 %v4541_v9, %v2290_v33 }
 0x9d6   : > { %v2363_v50 = vpop.permute.xlu0 %2362 }
 0x9d7   : > { %4267 = vmatpush.msk.msra.mxu3 %vm5822_vm14, %v2363_v50 }
 0x9d8   : > { %4268 = vmatmul.msk.f32.vlgmr.msra.gmra.mxu3 %vm2072_vm2, %v2291_v49 }
 0x9f1   : > { %v2246_v31 = vpop.xlane.xlu2 %2245 }
 0x9f2   : > { %4550 = vrcp.f32 %v2246_v31  ;;  %v2303_v55 = vand.u32 2147483648, %v2246_v31  ;;  %v2301_v57 = vand.u32 2147483647, %v2246_v31  ;;  %vm2297_vm11 = vweird.f32 %v2246_v31 }
 0x9f4   : > { %v2304_v59 = vor.u32 1.1754944e-38, %v2303_v55  ;;  %vm2302_vm13 = vcmp.eq.f32.partialorder %v2301_v57, 8.507059e+37  ;;  %v4494_v55 = vld [vmem:[%s5902_s21] ss:$0 sm:$0xff] }
 0x9f8   : > { %v4551_v51 = vpop.eup %4550 }
 0x9f9   : > { %v2293_v52 = vmul.f32 %v4551_v51, %v2246_v31  ;;  %v2390_v53 = vpop.permute.xlu2 %2389  ;;  %vm2298_vm10 = vweird.f32 %v4551_v51 }
 0x9fa   : > { %4269 = vmatpush.msk.msrb.mxu0 %vm5822_vm14, %v2390_v53  ;;  %vm2299_vm12 = vmor %vm2297_vm11, %vm2298_vm10 }
 0x9fb   : > { %v2294_v54 = vsub.f32 1.0, %v2293_v52  ;;  %v4493_v52 = vld [vmem:[%s5901_s17] ss:$0 sm:$0xff] }
 0x9fd   : > { %v2295_v56 = vmul.f32 %v4551_v51, %v2294_v54 }
 0x9ff   : > { %v2296_v58 = vadd.f32 %v4551_v51, %v2295_v56 }
 0xa01   : > { %v2300_v60 = vsel %vm2299_vm12, %v4551_v51, %v2296_v58 }
 0xa02   : > { %v2305_v61 = vsel %vm2302_vm13, %v2304_v59, %v2300_v60  ;;  %vm5832_vm13 = vcmask 195584  }
 0xa03   : > { %v2306_v62 = vmul.f32 %v5363_v14, %v2305_v61  ;;  %v2436_v14 = vld [vmem:[%s5897_s7 + $0x18] sm:$0xff] }
 0xa04   : > { %2452 = vmatpush.msrb.mxu1 %v2436_v14 }
 0xa05   : > { %4270 = vmatmul.msk.f32.vlgmr.msrb.gmra.mxu0 %vm2072_vm2, %v2306_v62 }
 0xa06   : > { %2453 = vmatpush.msrb.mxu1 %v2435_v15 }
 0xa08   : > { %2454 = vmatpush.msrb.mxu1 %v2434_v16 }
 0xa0a   : > { %2455 = vmatpush.msrb.mxu1 %v2433_v17 }
 0xa28   : > { %v2237_v63 = vpop.xlane.xlu0 %2236 }
 0xa29   : > { %4552 = vrcp.f32 %v2237_v63  ;;  %v2258_v4 = vand.u32 2147483648, %v2237_v63  ;;  %v2256_v6 = vand.u32 2147483647, %v2237_v63  ;;  %vm2252_vm10 = vweird.f32 %v2237_v63 }
 0xa2b   : > { %v2259_v8 = vor.u32 1.1754944e-38, %v2258_v4  ;;  %vm2257_vm12 = vcmp.eq.f32.partialorder %v2256_v6, 8.507059e+37 }
 0xa2f   : > { %v4553_v0 = vpop.eup %4552 }
 0xa30   : > { %v2248_v1 = vmul.f32 %v4553_v0, %v2237_v63  ;;  %vm2253_vm14 = vweird.f32 %v4553_v0 }
 0xa31   : > { %vm2254_vm11 = vmor %vm2252_vm10, %vm2253_vm14  ;;  %vm2429_vm14 = vcmask 130048  }
 0xa32   : > { %v2249_v2 = vsub.f32 1.0, %v2248_v1  ;;  %v2359_v3 = vpop.f32.mrf.mxu2 }
 0xa33   : > { %2417 = vrot.lane.b32.xlu2 %v2359_v3, %s5896_s2 }
 0xa34   : > { %v2250_v5 = vmul.f32 %v4553_v0, %v2249_v2 }
 0xa36   : > { %v2251_v7 = vadd.f32 %v4553_v0, %v2250_v5 }
 0xa38   : > { %v2255_v9 = vsel %vm2254_vm11, %v4553_v0, %v2251_v7  ;;  %v2656_v7 = vld [vmem:[%s5903_s25 + $0x18] sm:$0xff] }
 0xa39   : > { %v2260_v11 = vsel %vm2257_vm12, %v2259_v8, %v2255_v9  ;;  %v2655_v8 = vld [vmem:[%s5903_s25 + $0x10] sm:$0xff]  ;;  %2672 = vmatpush.msrb.mxu3 %v2656_v7  ;;  %v2654_v9 = vld [vmem:[%s5903_s25 + $0x8] sm:$0xff] }
 0xa3a   : > { %v2261_v30 = vmul.f32 %v5371_v34, %v2260_v11  ;;  %v2653_v11 = vld [vmem:[%s5903_s25] sm:$0xff]  ;;  %s5913_s25 = sld [smem:[#allocation34_spill]] }
 0xa3b   : > { %2673 = vmatpush.msrb.mxu3 %v2655_v8 }
 0xa3c   : > { %4264 = vmatmul.msk.f32.vlgmr.msra.gmra.mxu1 %vm2072_vm2, %v2261_v30  ;;  %v2558_v30 = vld [vmem:[%s5904_s29] sm:$0x7f]  ;;  %s5909_s29 = sld [smem:[#allocation29_spill]] }
 0xa3d   : > { %2674 = vmatpush.msrb.mxu3 %v2654_v9  ;;  %v2564_v14 = vperm.slane %v2558_v30, 0  ;;  %v2567_v15 = vperm.slane %v2558_v30, 1  ;;  %v2573_v16 = vperm.slane %v2558_v30, 2  ;;  %v2583_v17 = vperm.slane %v2558_v30, 3 }
 0xa3f   : > { %2675 = vmatpush.msrb.mxu3 %v2653_v11 }
 0xa5b   : > { %v2386_v12 = vpop.f32.mrf.mxu3 }
 0xa5c   : > { %2421 = vrot.lane.b32.xlu1 %v2386_v12, %s5828_s0  ;;  %s5899_s0 = sld [smem:[#allocation22_spill]] }
 0xa62   : > { %v2501_v37 = vld [vmem:[%s5899_s0 + $0x18] sm:$0xff]  ;;  %v2500_v38 = vld [vmem:[%s5899_s0 + $0x10] sm:$0xff]  ;;  %v2498_v39 = vld [vmem:[%s5899_s0] sm:$0xff] }
 0xa63   : > { %2521 = vmatpush.msra.mxu2 %v2501_v37 }
 0xa65   : > { %2522 = vmatpush.msra.mxu2 %v2500_v38 }
 0xa82   : > { %v2413_v13 = vpop.f32.mrf.mxu0 }
 0xa83   : > { %2425 = vrot.lane.b32.xlu2 %v2413_v13, %s5829_s23  ;;  %s5900_s23 = sld [smem:[#allocation20_spill]] }
 0xa89   : > { %v4492_v50 = vld [vmem:[%s5900_s23] ss:$0 sm:$0xff] }
 0xa8d   : > { %v2418_v18 = vpop.permute.xlu2 %2417 }
 0xab9   : > { %v2332_v19 = vpop.f32.mrf.mxu1 }
 0xaba   : > { %v2428_v21 = vsel %vm1819_vm15, %v2332_v19, %v2418_v18  ;;  %v2593_v18 = vperm.slane %v2558_v30, 4 }
 0xace   : > { %v2422_v20 = vpop.permute.xlu1 %2421 }
 0xacf   : > { %v2430_v22 = vsel %vm2429_vm14, %v2428_v21, %v2422_v20  ;;  %v4495_v20 = vld [vmem:[%s5906_s27] ss:$0 sm:$0xff]  ;;  %v2603_v21 = vperm.slane %v2558_v30, 5  ;;  %s5908_s27 = sld [smem:[#allocation27_spill]] }
 0xadd   : > { %v2426_v23 = vpop.permute.xlu2 %2425 }
 0xade   : > { %v2432_v24 = vsel %vm5832_vm13, %v2430_v22, %v2426_v23  ;;  %v2613_v22 = vperm.slane %v2558_v30, 6 }
 0xadf   : > { %4271 = vmatmul.msk.f32.vlgmr.msrb.gmra.mxu1 %vm1273_vm0, %v2432_v24 }
 0xb5c   : > { %v2457_v26 = vpop.f32.mrf.mxu1 }
 0xb5d   : > { %v2460_v27 = vadd.f32 %v2457_v26, %v5191_v40  ;;  %v2499_v40 = vld [vmem:[%s5899_s0 + $0x8] sm:$0xff] }
 0xb5e   : > { %2523 = vmatpush.msra.mxu2 %v2499_v40 }
 0xb5f   : > { %v5396_v28 = vadd.f32 %v4491_v25, %v2460_v27 }
 0xb60   : > { %2524 = vmatpush.msra.mxu2 %v2498_v39 }
 0xb61   : > { %v2468_v29 = vsel %vm1605_vm3, %v5396_v28, 0.0 }
 0xb62   : > { %2469 = vadd.xlane.f32.xlu1 %v2468_v29 }
 0xbd5   : > { %v2470_v10 = vpop.xlane.xlu1 %2469 }
 0xbd6   : > { %v2471_v32 = vmul.f32 %v2470_v10, %v5159_v41 }
 0xbd8   : > { %v2472_v34 = vsub.f32 %v5396_v28, %v2471_v32 }
 0xbda   : > { %v2473_v35 = vmul.f32 %v2472_v34, %v2472_v34 }
 0xbdc   : > { %v2474_v36 = vsel %vm1605_vm3, %v2473_v35, 0.0 }
 0xbdd   : > { %2475 = vadd.xlane.f32.xlu2 %v2474_v36 }
 0xc50   : > { %v2476_v42 = vpop.xlane.xlu2 %2475 }
 0xc51   : > { %v2477_v43 = vmul.f32 %v2476_v42, %v5159_v41 }
 0xc53   : > { %v2478_v44 = vadd.f32 6.1e-05, %v2477_v43 }
 0xc55   : > { %4554 = vrsqrt.f32 %v2478_v44  ;;  %vm2485_vm11 = vweird.f32 %v2478_v44 }
 0xc5b   : > { %v4555_v45 = vpop.eup %4554 }
 0xc5c   : > { %v2480_v46 = vmul.f32 %v4555_v45, %v2478_v44  ;;  %vm2486_vm10 = vweird.f32 %v4555_v45 }
 0xc5d   : > { %vm2487_vm12 = vmor %vm2485_vm11, %vm2486_vm10 }
 0xc5e   : > { %v2481_v47 = vmul.f32 %v4555_v45, %v2480_v46 }
 0xc60   : > { %v2482_v48 = vmul.f32 0.5, %v2481_v47 }
 0xc62   : > { %v2483_v33 = vsub.f32 1.5, %v2482_v48 }
 0xc64   : > { %v2484_v49 = vmul.f32 %v4555_v45, %v2483_v33 }
 0xc66   : > { %v2488_v31 = vsel %vm2487_vm12, %v4555_v45, %v2484_v49 }
 0xc67   : > { %v2489_v51 = vmul.f32 %v2488_v31, %v2472_v34 }
 0xc69   : > { %v2493_v53 = vmul.f32 %v4492_v50, %v2489_v51 }
 0xc6b   : > { %v2497_v54 = vadd.f32 %v4493_v52, %v2493_v53 }
 0xc6d   : > { %4272 = vmatmul.msk.f32.vlgmr.msra.gmra.mxu2 %vm1273_vm0, %v2497_v54 }
 0xcf0   : > { %v2526_v56 = vpop.f32.mrf.mxu2 }
 0xcf1   : > { %v2527_v57 = vadd.f32 %v4494_v55, %v2526_v56 }
 0xcf3   : > { %v4273_v58 = vmul.f32 -1.442695, %v2527_v57 }
 0xcf5   : > { %4556 = vpow2.f32 %v4273_v58 }
 0xcfb   : > { %v4557_v59 = vpop.eup %4556 }
 0xcfc   : > { %v2532_v60 = vadd.f32 1.0, %v4557_v59 }
 0xcfe   : > { %4558 = vrcp.f32 %v2532_v60  ;;  %v2544_v0 = vand.u32 2147483648, %v2532_v60  ;;  %v2542_v2 = vand.u32 2147483647, %v2532_v60  ;;  %vm2538_vm11 = vweird.f32 %v2532_v60 }
 0xd00   : > { %v2545_v4 = vor.u32 1.1754944e-38, %v2544_v0  ;;  %vm2543_vm13 = vcmp.eq.f32.partialorder %v2542_v2, 8.507059e+37 }
 0xd04   : > { %v4559_v61 = vpop.eup %4558 }
 0xd05   : > { %v2534_v62 = vmul.f32 %v4559_v61, %v2532_v60  ;;  %vm2539_vm10 = vweird.f32 %v4559_v61  ;;  %v4496_v60 = vld [vmem:[%s5907_s1] ss:$0 sm:$0xff]  ;;  %s5912_s1 = sld [smem:[#allocation31_spill]] }
 0xd06   : > { %vm2540_vm12 = vmor %vm2538_vm11, %vm2539_vm10 }
 0xd07   : > { %v2535_v63 = vsub.f32 1.0, %v2534_v62 }
 0xd09   : > { %v2536_v1 = vmul.f32 %v4559_v61, %v2535_v63  ;;  %v4497_v63 = vld [vmem:[%s5908_s27] ss:$0 sm:$0xff]  ;;  %s5910_s27 = sld [smem:[#allocation32_spill]] }
 0xd0b   : > { %v2537_v3 = vadd.f32 %v4559_v61, %v2536_v1 }
 0xd0d   : > { %v2541_v5 = vsel %vm2540_vm12, %v4559_v61, %v2537_v3 }
 0xd0e   : > { %v2546_v6 = vsel %vm2543_vm13, %v2545_v4, %v2541_v5 }
 0xd0f   : > { %2549 = vrot.lane.b32.xlu0 %v2546_v6, %s5905_s28 }
 0xd81   : > { %v2550_v12 = vpop.permute.xlu0 %2549 }
 0xd82   : > { %v2552_v13 = vmul.f32 %v2550_v12, %v2527_v57 }
 0xd84   : > { %v2554_v19 = vrot.slane %v2552_v13, 5 }
 0xd86   : > { %v2556_v23 = vsel %vm2167_vm6, 0.0, %v2554_v19  ;;  %v2557_v24 = vsel %vm2162_vm5, %v2554_v19, 0.0 }
 0xd87   : > { %v2565_v25 = vmul.f32 %v2564_v14, %v2556_v23  ;;  %v2568_v26 = vmul.f32 %v2567_v15, %v2556_v23  ;;  %v2574_v27 = vmul.f32 %v2573_v16, %v2556_v23  ;;  %v2575_v29 = vmul.f32 %v2573_v16, %v2557_v24  ;;  %v4498_v16 = vld [vmem:[%s5909_s29] ss:$0 sm:$0xff]  ;;  %s5911_s29 = sld [smem:[#allocation30_spill]] }
 0xd88   : > { %v2584_v10 = vmul.f32 %v2583_v17, %v2556_v23  ;;  %v2585_v32 = vmul.f32 %v2583_v17, %v2557_v24  ;;  %v2594_v34 = vmul.f32 %v2593_v18, %v2556_v23  ;;  %v2595_v35 = vmul.f32 %v2593_v18, %v2557_v24 }
 0xd89   : > { %v2566_v36 = vadd.f32 %v4495_v20, %v2565_v25  ;;  %v2570_v37 = vrot.slane %v2568_v26, 1  ;;  %v2578_v38 = vrot.slane %v2574_v27, 2  ;;  %v2579_v40 = vrot.slane %v2575_v29, 2  ;;  %v2691_v26 = vld [vmem:[%s5910_s27 + $0x18] sm:$0xff]  ;;  %v2690_v27 = vld [vmem:[%s5910_s27 + $0x10] sm:$0xff]  ;;  %v2689_v29 = vld [vmem:[%s5910_s27 + $0x8] sm:$0xff] }
 0xd8a   : > { %v2588_v39 = vrot.slane %v2584_v10, 3  ;;  %v2589_v42 = vrot.slane %v2585_v32, 3  ;;  %v2604_v45 = vmul.f32 %v2603_v21, %v2556_v23  ;;  %v2605_v46 = vmul.f32 %v2603_v21, %v2557_v24  ;;  %2758 = vmatpush.msra.mxu0 %v2691_v26 }
 0xd8b   : > { %v2572_v43 = vadd.f32 %v2570_v37, %v2566_v36  ;;  %v2580_v44 = vsel %vm2051_vm1, %v2578_v38, %v2579_v40  ;;  %v2598_v47 = vrot.slane %v2594_v34, 4  ;;  %v2599_v48 = vrot.slane %v2595_v35, 4 }
 0xd8c   : > { %v2614_v33 = vmul.f32 %v2613_v22, %v2556_v23  ;;  %v2615_v49 = vmul.f32 %v2613_v22, %v2557_v24  ;;  %v2590_v31 = vsel %vm2177_vm8, %v2588_v39, %v2589_v42  ;;  %v2608_v51 = vrot.slane %v2604_v45, 5  ;;  %2759 = vmatpush.msra.mxu0 %v2690_v27  ;;  %v4500_v45 = vld [vmem:[%s5912_s1] ss:$0 sm:$0xff] }
 0xd8d   : > { %v2582_v50 = vadd.f32 %v2580_v44, %v2572_v43  ;;  %v2609_v52 = vrot.slane %v2605_v46, 5  ;;  %v2600_v54 = vsel %vm5842_vm7, %v2598_v47, %v2599_v48  ;;  %v4499_v42 = vld [vmem:[%s5911_s29] ss:$0 sm:$0xff]  ;;  %v2708_v48 = vld [vmem:[%s5913_s25 + $0x78] sm:$0xff]  ;;  %s5914_s29 = sld [smem:[#allocation33_spill]] }
 0xd8e   : > { %v2618_v55 = vrot.slane %v2614_v33, 6  ;;  %v2619_v56 = vrot.slane %v2615_v49, 6  ;;  %2760 = vmatpush.msra.mxu0 %v2689_v29  ;;  %2789 = vmatpush.msra.mxu1 %v2708_v48  ;;  %v2707_v33 = vld [vmem:[%s5913_s25 + $0x70] sm:$0xff]  ;;  %v2706_v49 = vld [vmem:[%s5913_s25 + $0x68] sm:$0xff] }
 0xd8f   : > { %v2592_v53 = vadd.f32 %v2590_v31, %v2582_v50  ;;  %v2610_v58 = vsel %vm2167_vm6, %v2608_v51, %v2609_v52  ;;  %v2705_v50 = vld [vmem:[%s5913_s25 + $0x60] sm:$0xff]  ;;  %v2704_v31 = vld [vmem:[%s5913_s25 + $0x58] sm:$0xff]  ;;  %v2703_v51 = vld [vmem:[%s5913_s25 + $0x50] sm:$0xff] }
 0xd90   : > { %v2620_v61 = vsel %vm2162_vm5, %v2618_v55, %v2619_v56  ;;  %2790 = vmatpush.msra.mxu1 %v2707_v33  ;;  %v2702_v52 = vld [vmem:[%s5913_s25 + $0x48] sm:$0xff]  ;;  %v2699_v55 = vld [vmem:[%s5913_s25 + $0x30] sm:$0xff] }
 0xd91   : > { %v2602_v57 = vadd.f32 %v2600_v54, %v2592_v53  ;;  %v2701_v53 = vld [vmem:[%s5913_s25 + $0x40] sm:$0xff]  ;;  %v2700_v54 = vld [vmem:[%s5913_s25 + $0x38] sm:$0xff]  ;;  %v2698_v56 = vld [vmem:[%s5913_s25 + $0x28] sm:$0xff] }
 0xd92   : > { %2791 = vmatpush.msra.mxu1 %v2706_v49  ;;  %v4283_v49 = vld [vmem:[%s5877_s14 + $0x38] sm:$0xff] }
 0xd93   : > { %v2612_v59 = vadd.f32 %v2610_v58, %v2602_v57  ;;  %v2697_v57 = vld [vmem:[%s5913_s25 + $0x20] sm:$0xff]  ;;  %2921 = vmatpush.msrb.mxu2 %v4283_v49 }
 0xd94   : > { %2792 = vmatpush.msra.mxu1 %v2705_v50  ;;  %v4501_v58 = vld [vmem:[%s5914_s29] ss:$0 sm:$0xff]  ;;  %v4282_v50 = vld [vmem:[%s5877_s14 + $0x30] sm:$0xff] }
 0xd95   : > { %v2622_v62 = vadd.f32 %v2620_v61, %v2612_v59  ;;  %v2696_v59 = vld [vmem:[%s5913_s25 + $0x18] sm:$0xff]  ;;  %2922 = vmatpush.msrb.mxu2 %v4282_v50 }
 0xd96   : > { %2793 = vmatpush.msra.mxu1 %v2704_v31  ;;  %v4281_v31 = vld [vmem:[%s5877_s14 + $0x28] sm:$0xff] }
 0xd97   : > { %v2627_v0 = vmul.f32 %v4496_v60, %v2622_v62  ;;  %v2695_v60 = vld [vmem:[%s5913_s25 + $0x10] sm:$0xff]  ;;  %v2694_v62 = vld [vmem:[%s5913_s25 + $0x8] sm:$0xff]  ;;  %2923 = vmatpush.msrb.mxu2 %v4281_v31 }
 0xd98   : > { %2794 = vmatpush.msra.mxu1 %v2703_v51  ;;  %v4280_v51 = vld [vmem:[%s5877_s14 + $0x20] sm:$0xff]  ;;  %v4313_v31 = vld [vmem:[%s5880_s4 + $0x28] sm:$0xff]  ;;  %s5920_s14 = smov 80  }
 0xd99   : > { %v2632_v1 = vadd.f32 %v4497_v63, %v2627_v0  ;;  %v2693_v0 = vld [vmem:[%s5913_s25] sm:$0xff]  ;;  %2924 = vmatpush.msrb.mxu2 %v4280_v51 }
 0xd9a   : > { %2795 = vmatpush.msra.mxu1 %v2702_v52  ;;  %v4312_v51 = vld [vmem:[%s5880_s4 + $0x20] sm:$0xff] }
 0xd9b   : > { %v4274_v2 = vmul.f32 -1.442695, %v2632_v1 }
 0xd9c   : > { %2796 = vmatpush.msra.mxu1 %v2701_v53 }
 0xd9d   : > { %4560 = vpow2.f32 %v4274_v2 }
 0xd9e   : > { %2797 = vmatpush.msra.mxu1 %v2700_v54 }
 0xda0   : > { %2798 = vmatpush.msra.mxu1 %v2699_v55 }
 0xda2   : > { %2799 = vmatpush.msra.mxu1 %v2698_v56 }
 0xda3   : > { %v4561_v3 = vpop.eup %4560 }
 0xda4   : > { %v2636_v4 = vadd.f32 1.0, %v4561_v3  ;;  %2800 = vmatpush.msra.mxu1 %v2697_v57 }
 0xda6   : > { %4562 = vrcp.f32 %v2636_v4  ;;  %v2648_v8 = vand.u32 2147483648, %v2636_v4  ;;  %v2646_v11 = vand.u32 2147483647, %v2636_v4  ;;  %vm2642_vm10 = vweird.f32 %v2636_v4  ;;  %2801 = vmatpush.msra.mxu1 %v2696_v59 }
 0xda8   : > { %v2649_v12 = vor.u32 1.1754944e-38, %v2648_v8  ;;  %vm2647_vm12 = vcmp.eq.f32.partialorder %v2646_v11, 8.507059e+37  ;;  %2802 = vmatpush.msra.mxu1 %v2695_v60 }
 0xdaa   : > { %2803 = vmatpush.msra.mxu1 %v2694_v62 }
 0xdac   : > { %v4563_v5 = vpop.eup %4562  ;;  %2804 = vmatpush.msra.mxu1 %v2693_v0  ;;  %v4506_v0 = vld [vmem:[%s5879_s8 + $0x1] ss:$0 sm:$0xff]  ;;  %s5917_s8 = smov 112  }
 0xdad   : > { %v2638_v6 = vmul.f32 %v4563_v5, %v2636_v4  ;;  %vm2643_vm13 = vweird.f32 %v4563_v5 }
 0xdae   : > { %vm2644_vm11 = vmor %vm2642_vm10, %vm2643_vm13 }
 0xdaf   : > { %v2639_v7 = vsub.f32 1.0, %v2638_v6 }
 0xdb1   : > { %v2640_v9 = vmul.f32 %v4563_v5, %v2639_v7 }
 0xdb3   : > { %v2641_v30 = vadd.f32 %v4563_v5, %v2640_v9 }
 0xdb5   : > { %v2645_v13 = vsel %vm2644_vm11, %v4563_v5, %v2641_v30 }
 0xdb6   : > { %v2650_v14 = vsel %vm2647_vm12, %v2649_v12, %v2645_v13 }
 0xdb7   : > { %v2652_v15 = vmul.f32 %v2650_v14, %v2632_v1 }
 0xdb9   : > { %4275 = vmatmul.msk.f32.vlgmr.msrb.gmra.mxu3 %vm1273_vm0, %v2652_v15  ;;  %v4502_v15 = vld [vmem:[%s4879_s12] ss:$0 sm:$0xff] }
 0xe3c   : > { %v2677_v17 = vpop.f32.mrf.mxu3 }
 0xe3d   : > { %v2680_v18 = vadd.f32 %v2677_v17, %v5396_v28  ;;  %v2688_v28 = vld [vmem:[%s5910_s27] sm:$0xff] }
 0xe3e   : > { %2761 = vmatpush.msra.mxu0 %v2688_v28 }
 0xe3f   : > { %v5431_v19 = vadd.f32 %v4498_v16, %v2680_v18 }
 0xe41   : > { %v2710_v20 = vsel %vm1605_vm3, %v5431_v19, 0.0 }
 0xe42   : > { %2711 = vadd.xlane.f32.xlu1 %v2710_v20 }
 0xeb5   : > { %v2712_v21 = vpop.xlane.xlu1 %2711 }
 0xeb6   : > { %v2713_v22 = vmul.f32 %v2712_v21, %v5159_v41 }
 0xeb8   : > { %v2714_v23 = vsub.f32 %v5431_v19, %v2713_v22 }
 0xeba   : > { %v2715_v24 = vmul.f32 %v2714_v23, %v2714_v23 }
 0xebc   : > { %v2716_v25 = vsel %vm1605_vm3, %v2715_v24, 0.0 }
 0xebd   : > { %2717 = vadd.xlane.f32.xlu0 %v2716_v25 }
 0xf30   : > { %v2718_v10 = vpop.xlane.xlu0 %2717 }
 0xf31   : > { %v2719_v32 = vmul.f32 %v2718_v10, %v5159_v41 }
 0xf33   : > { %v2720_v34 = vadd.f32 6.1e-05, %v2719_v32 }
 0xf35   : > { %4564 = vrsqrt.f32 %v2720_v34  ;;  %vm2727_vm10 = vweird.f32 %v2720_v34 }
 0xf3b   : > { %v4565_v35 = vpop.eup %4564 }
 0xf3c   : > { %v2722_v36 = vmul.f32 %v4565_v35, %v2720_v34  ;;  %vm2728_vm13 = vweird.f32 %v4565_v35 }
 0xf3d   : > { %vm2729_vm11 = vmor %vm2727_vm10, %vm2728_vm13 }
 0xf3e   : > { %v2723_v37 = vmul.f32 %v4565_v35, %v2722_v36 }
 0xf40   : > { %v2724_v38 = vmul.f32 0.5, %v2723_v37  ;;  %v4503_v37 = vld [vmem:[%s4884_s13] ss:$0 sm:$0xff] }
 0xf42   : > { %v2725_v40 = vsub.f32 1.5, %v2724_v38 }
 0xf44   : > { %v2726_v39 = vmul.f32 %v4565_v35, %v2725_v40 }
 0xf46   : > { %v2730_v43 = vsel %vm2729_vm11, %v4565_v35, %v2726_v39  ;;  %v4504_v39 = vld [vmem:[%s4889_s9] ss:$0 sm:$0xff] }
 0xf47   : > { %v2731_v44 = vmul.f32 %v2730_v43, %v2714_v23 }
 0xf49   : > { %v2735_v46 = vmul.f32 %v4499_v42, %v2731_v44 }
 0xf4b   : > { %v2739_v47 = vadd.f32 %v4500_v45, %v2735_v46 }
 0xf4d   : > { %4276 = vmatmul.msk.f32.vlgmr.msra.gmra.mxu0 %vm1273_vm0, %v2739_v47 }
 0xfca   : > { %v2763_v61 = vpop.f32.mrf.mxu0 }
 0xfcb   : > { %v2764_v63 = vadd.f32 %v4501_v58, %v2763_v61  ;;  %v4505_v61 = vld [vmem:[%s5881_s3 + $0x1] ss:$0 sm:$0xff]  ;;  %s5915_s3 = smov 104  }
 0xfcd   : > { %v4277_v1 = vmul.f32 -1.442695, %v2764_v63 }
 0xfcf   : > { %4566 = vpow2.f32 %v4277_v1 }
 0xfd5   : > { %v4567_v2 = vpop.eup %4566 }
 0xfd6   : > { %v2769_v3 = vadd.f32 1.0, %v4567_v2 }
 0xfd8   : > { %4568 = vrcp.f32 %v2769_v3  ;;  %v2781_v7 = vand.u32 2147483648, %v2769_v3  ;;  %v2779_v9 = vand.u32 2147483647, %v2769_v3  ;;  %vm2775_vm13 = vweird.f32 %v2769_v3 }
 0xfda   : > { %v2782_v30 = vor.u32 1.1754944e-38, %v2781_v7  ;;  %vm2780_vm11 = vcmp.eq.f32.partialorder %v2779_v9, 8.507059e+37  ;;  %v4296_v7 = vld [vmem:[%s4749_s24 + $0xd8] sm:$0xff]  ;;  %v4294_v9 = vld [vmem:[%s4749_s24 + $0xc8] sm:$0xff] }
 0xfde   : > { %v4569_v4 = vpop.eup %4568 }
 0xfdf   : > { %v2771_v5 = vmul.f32 %v4569_v4, %v2769_v3  ;;  %vm2776_vm12 = vweird.f32 %v4569_v4  ;;  %v4300_v3 = vld [vmem:[%s4749_s24 + $0xf8] sm:$0xff] }
 0xfe0   : > { %vm2777_vm10 = vmor %vm2775_vm13, %vm2776_vm12  ;;  %2952 = vmatpush.msra.mxu3 %v4300_v3 }
 0xfe1   : > { %v2772_v6 = vsub.f32 1.0, %v2771_v5  ;;  %v4298_v5 = vld [vmem:[%s4749_s24 + $0xe8] sm:$0xff] }
 0xfe3   : > { %v2773_v8 = vmul.f32 %v4569_v4, %v2772_v6  ;;  %v4297_v6 = vld [vmem:[%s4749_s24 + $0xe0] sm:$0xff] }
 0xfe5   : > { %v2774_v11 = vadd.f32 %v4569_v4, %v2773_v8  ;;  %v4295_v8 = vld [vmem:[%s4749_s24 + $0xd0] sm:$0xff] }
 0xfe7   : > { %v2778_v12 = vsel %vm2777_vm10, %v4569_v4, %v2774_v11  ;;  %v4299_v4 = vld [vmem:[%s4749_s24 + $0xf0] sm:$0xff]  ;;  %v4293_v11 = vld [vmem:[%s4749_s24 + $0xc0] sm:$0xff] }
 0xfe8   : > { %v2783_v13 = vsel %vm2780_vm11, %v2782_v30, %v2778_v12  ;;  %2953 = vmatpush.msra.mxu3 %v4299_v4  ;;  %v4292_v30 = vld [vmem:[%s4749_s24 + $0xb8] sm:$0xff]  ;;  %v4291_v12 = vld [vmem:[%s4749_s24 + $0xb0] sm:$0xff] }
 0xfe9   : > { %v2785_v14 = vmul.f32 %v2783_v13, %v2764_v63  ;;  %v4290_v13 = vld [vmem:[%s4749_s24 + $0xa8] sm:$0xff] }
 0xfea   : > { %2954 = vmatpush.msra.mxu3 %v4298_v5  ;;  %v4510_v5 = vld [vmem:[%s5889_s11 + $0x1] ss:$0 sm:$0xff]  ;;  %s5919_s11 = smov 88  }
 0xfeb   : > { %2805 = vmatmul.f32.vlgmr.msra.gmra.mxu1 %v2785_v14  ;;  %v4289_v14 = vld [vmem:[%s4749_s24 + $0xa0] sm:$0xff] }
 0xfec   : > { %2955 = vmatpush.msra.mxu3 %v4297_v6 }
 0xfee   : > { %2956 = vmatpush.msra.mxu3 %v4296_v7 }
 0xff0   : > { %2957 = vmatpush.msra.mxu3 %v4295_v8 }
 0xff2   : > { %2958 = vmatpush.msra.mxu3 %v4294_v9  ;;  %v4511_v9 = vld [vmem:[%s5891_s16 + $0x1] ss:$0 sm:$0xff] }
 0xff4   : > { %2959 = vmatpush.msra.mxu3 %v4293_v11  ;;  %v4512_v11 = vld [vmem:[%s5892_s18 + $0x1] ss:$0 sm:$0xff] }
 0xff6   : > { %2960 = vmatpush.msra.mxu3 %v4292_v30 }
 0xff8   : > { %2961 = vmatpush.msra.mxu3 %v4291_v12 }
 0xffa   : > { %2962 = vmatpush.msra.mxu3 %v4290_v13 }
 0xffc   : > { %2963 = vmatpush.msra.mxu3 %v4289_v14 }
0x1068   : > { %v2806_v16 = vpop.f32.mrf.mxu1 }
0x1069   : > { %v2807_v17 = vadd.f32 %v4502_v15, %v2806_v16  ;;  %v4507_v15 = vld [vmem:[%s4744_s19 + $0x1] ss:$0 sm:$0xff]  ;;  %v4288_v16 = vld [vmem:[%s4749_s24 + $0x98] sm:$0xff] }
0x106a   : > { %2964 = vmatpush.msra.mxu3 %v4288_v16 }
0x106b   : > { %v2809_v18 = vmul.f32 0.5, %v2807_v17  ;;  %v4287_v17 = vld [vmem:[%s4749_s24 + $0x90] sm:$0xff] }
0x106c   : > { %2965 = vmatpush.msra.mxu3 %v4287_v17 }
0x106d   : > { %v2810_v20 = vadd.f32 %v2809_v18, %v5431_v19 }
0x106f   : > { %v2813_v21 = vsel %vm1605_vm3, %v2810_v20, 0.0 }
0x1070   : > { %2814 = vadd.xlane.f32.xlu2 %v2813_v21 }
0x10e3   : > { %v2815_v22 = vpop.xlane.xlu2 %2814 }
0x10e4   : > { %v2816_v23 = vmul.f32 %v2815_v22, %v5159_v41  ;;  %v4285_v22 = vld [vmem:[%s4749_s24 + $0x80] sm:$0xff] }
0x10e6   : > { %v2817_v24 = vsub.f32 %v2810_v20, %v2816_v23  ;;  %v4286_v20 = vld [vmem:[%s4749_s24 + $0x88] sm:$0xff] }
0x10e7   : > { %2966 = vmatpush.msra.mxu3 %v4286_v20 }
0x10e8   : > { %v2818_v25 = vmul.f32 %v2817_v24, %v2817_v24 }
0x10e9   : > { %2967 = vmatpush.msra.mxu3 %v4285_v22 }
0x10ea   : > { %v2819_v26 = vsel %vm1605_vm3, %v2818_v25, 0.0 }
0x10eb   : > { %2820 = vadd.xlane.f32.xlu1 %v2819_v26 }
0x115e   : > { %v2821_v27 = vpop.xlane.xlu1 %2820 }
0x115f   : > { %v2822_v29 = vmul.f32 %v2821_v27, %v5159_v41 }
0x1161   : > { %v2823_v28 = vadd.f32 6.1e-05, %v2822_v29 }
0x1163   : > { %4570 = vrsqrt.f32 %v2823_v28  ;;  %vm2830_vm13 = vweird.f32 %v2823_v28 }
0x1169   : > { %v4571_v10 = vpop.eup %4570 }
0x116a   : > { %v2825_v19 = vmul.f32 %v4571_v10, %v2823_v28  ;;  %vm2831_vm12 = vweird.f32 %v4571_v10 }
0x116b   : > { %vm2832_vm10 = vmor %vm2830_vm13, %vm2831_vm12 }
0x116c   : > { %v2826_v32 = vmul.f32 %v4571_v10, %v2825_v19 }
0x116e   : > { %v2827_v34 = vmul.f32 0.5, %v2826_v32 }
0x1170   : > { %v2828_v35 = vsub.f32 1.5, %v2827_v34 }
0x1172   : > { %v2829_v36 = vmul.f32 %v4571_v10, %v2828_v35 }
0x1174   : > { %v2833_v38 = vsel %vm2832_vm10, %v4571_v10, %v2829_v36 }
0x1175   : > { %v2834_v40 = vmul.f32 %v2833_v38, %v2817_v24  ;;  %v4508_v38 = vld [vmem:[%s4754_s30 + $0x1] ss:$0 sm:$0xff] }
0x1177   : > { %v2838_v42 = vmul.f32 %v4503_v37, %v2834_v40 }
0x1179   : > { %v5471_v43 = vadd.f32 %v4504_v39, %v2838_v42 }
0x117b   : > { %v2873_v44 = vsel %vm1605_vm3, %v5471_v43, 0.0 }
0x117c   : > { %2874 = vadd.xlane.f32.xlu2 %v2873_v44 }
0x11ef   : > { %v2875_v45 = vpop.xlane.xlu2 %2874 }
0x11f0   : > { %v2876_v46 = vmul.f32 %v2875_v45, %v5159_v41 }
0x11f2   : > { %v2877_v47 = vsub.f32 %v5471_v43, %v2876_v46  ;;  %v4315_v46 = vld [vmem:[%s5880_s4 + $0x38] sm:$0xff] }
0x11f3   : > { %3058 = vmatpush.msra.mxu2 %v4315_v46 }
0x11f4   : > { %v2878_v48 = vmul.f32 %v2877_v47, %v2877_v47 }
0x11f6   : > { %v2879_v33 = vsel %vm1605_vm3, %v2878_v48, 0.0 }
0x11f7   : > { %2880 = vadd.xlane.f32.xlu1 %v2879_v33 }
0x126a   : > { %v2881_v52 = vpop.xlane.xlu1 %2880 }
0x126b   : > { %v2882_v53 = vmul.f32 %v2881_v52, %v5159_v41  ;;  %v4614_v52 = vld [vmem:[%s5890_s15] sm:$0x7f] }
0x126d   : > { %v2883_v54 = vadd.f32 6.1e-05, %v2882_v53  ;;  %v4309_v53 = vld [vmem:[%s4769_s20 + $0x38] sm:$0xff] }
0x126e   : > { %3033 = vmatpush.msrb.mxu0 %v4309_v53 }
0x126f   : > { %4572 = vrsqrt.f32 %v2883_v54  ;;  %vm2890_vm12 = vweird.f32 %v2883_v54 }
0x1275   : > { %v4573_v55 = vpop.eup %4572 }
0x1276   : > { %v2885_v56 = vmul.f32 %v4573_v55, %v2883_v54  ;;  %vm2891_vm11 = vweird.f32 %v4573_v55  ;;  %v4308_v54 = vld [vmem:[%s4769_s20 + $0x30] sm:$0xff] }
0x1277   : > { %vm2892_vm13 = vmor %vm2890_vm12, %vm2891_vm11  ;;  %3034 = vmatpush.msrb.mxu0 %v4308_v54 }
0x1278   : > { %v2886_v57 = vmul.f32 %v4573_v55, %v2885_v56  ;;  %v4306_v56 = vld [vmem:[%s4769_s20 + $0x20] sm:$0xff] }
0x127a   : > { %v2887_v58 = vmul.f32 0.5, %v2886_v57 }
0x127c   : > { %v2888_v59 = vsub.f32 1.5, %v2887_v58 }
0x127e   : > { %v2889_v60 = vmul.f32 %v4573_v55, %v2888_v59 }
0x1280   : > { %v2893_v62 = vsel %vm2892_vm13, %v4573_v55, %v2889_v60  ;;  %v4307_v55 = vld [vmem:[%s4769_s20 + $0x28] sm:$0xff] }
0x1281   : > { %v2894_v63 = vmul.f32 %v2893_v62, %v2877_v47  ;;  %v4314_v47 = vld [vmem:[%s5880_s4 + $0x30] sm:$0xff]  ;;  %3035 = vmatpush.msrb.mxu0 %v4307_v55  ;;  %s5916_s4 = smov 120  }
0x1282   : > { %3059 = vmatpush.msra.mxu2 %v4314_v47 }
0x1283   : > { %v2898_v1 = vmul.f32 %v4505_v61, %v2894_v63  ;;  %3036 = vmatpush.msrb.mxu0 %v4306_v56 }
0x1284   : > { %3060 = vmatpush.msra.mxu2 %v4313_v31 }
0x1285   : > { %v2902_v2 = vadd.f32 %v4506_v0, %v2898_v1 }
0x1286   : > { %3061 = vmatpush.msra.mxu2 %v4312_v51 }
0x1287   : > { %4302 = vmatmul.msk.f32.vlgmr.msrb.gmra.mxu2 %vm1273_vm0, %v2902_v2  ;;  %v4509_v2 = vld [vmem:[%s5878_s6 + $0x1] ss:$0 sm:$0xff]  ;;  %s5918_s6 = smov 72  }
0x128f   : > { %4316 = vmatmul.msk.f32.vlgmr.msra.gmra.mxu2 %vm1273_vm0, %v4614_v52 }
0x130a   : > { %v2926_v18 = vpop.f32.mrf.mxu2 }
0x130b   : > { %v2927_v21 = vadd.f32 %v4507_v15, %v2926_v18  ;;  %v4513_v15 = vld [vmem:[%s5893_s22 + $0x1] ss:$0 sm:$0xff] }
0x130d   : > { %v4303_v23 = vmul.f32 -1.442695, %v2927_v21 }
0x130f   : > { %4574 = vpow2.f32 %v4303_v23 }
0x1312   : > { %v3063_v8 = vpop.f32.mrf.mxu2 }
0x1313   : > { %3164 = vrot.lane.b32.xlu0 %v3063_v8, %s5916_s4  ;;  %4321 = vmatpush.xpose.msk.msrb.mxu2 %vm1819_vm15, %v3063_v8 }
0x1315   : > { %v4575_v24 = vpop.eup %4574 }
0x1316   : > { %v2932_v25 = vadd.f32 1.0, %v4575_v24 }
0x1318   : > { %4576 = vrcp.f32 %v2932_v25  ;;  %v2944_v28 = vand.u32 2147483648, %v2932_v25  ;;  %v2942_v19 = vand.u32 2147483647, %v2932_v25  ;;  %vm2938_vm11 = vweird.f32 %v2932_v25 }
0x131a   : > { %v2945_v34 = vor.u32 1.1754944e-38, %v2944_v28  ;;  %vm2943_vm13 = vcmp.eq.f32.partialorder %v2942_v19, 8.507059e+37 }
0x131e   : > { %v4577_v26 = vpop.eup %4576 }
0x131f   : > { %v2934_v27 = vmul.f32 %v4577_v26, %v2932_v25  ;;  %vm2939_vm10 = vweird.f32 %v4577_v26 }
0x1320   : > { %vm2940_vm12 = vmor %vm2938_vm11, %vm2939_vm10 }
0x1321   : > { %v2935_v29 = vsub.f32 1.0, %v2934_v27 }
0x1323   : > { %v2936_v10 = vmul.f32 %v4577_v26, %v2935_v29 }
0x1325   : > { %v2937_v32 = vadd.f32 %v4577_v26, %v2936_v10 }
0x1327   : > { %v2941_v35 = vsel %vm2940_vm12, %v4577_v26, %v2937_v32 }
0x1328   : > { %v2946_v36 = vsel %vm2943_vm13, %v2945_v34, %v2941_v35 }
0x1329   : > { %v2948_v37 = vmul.f32 %v2946_v36, %v2927_v21 }
0x132b   : > { %2968 = vmatmul.f32.vlgmr.msra.gmra.mxu3 %v2948_v37 }
0x1385   : > { %v3165_v21 = vpop.permute.xlu0 %3164 }
0x1386   : > { %4325 = vmatpush.xpose.msk.msra.mxu2 %vm1819_vm15, %v3165_v21 }
0x13ae   : > { %v2969_v40 = vpop.f32.mrf.mxu3 }
0x13af   : > { %v2970_v39 = vadd.f32 %v4508_v38, %v2969_v40 }
0x13b1   : > { %v2972_v42 = vmul.f32 0.5, %v2970_v39 }
0x13b3   : > { %v5505_v44 = vadd.f32 %v2972_v42, %v5471_v43 }
0x13b5   : > { %v2978_v45 = vsel %vm1605_vm3, %v5505_v44, 0.0 }
0x13b6   : > { %2979 = vadd.xlane.f32.xlu2 %v2978_v45 }
0x13ce   : > { %3276 = vrot.lane.b32.xlu2 %v3063_v8, %s5915_s3 }
0x13d6   : > { %3220 = vrot.lane.b32.xlu2 %v3063_v8, %s5917_s8 }
0x1429   : > { %v2980_v48 = vpop.xlane.xlu2 %2979 }
0x142a   : > { %v2981_v33 = vmul.f32 %v2980_v48, %v5159_v41 }
0x142c   : > { %v2982_v49 = vsub.f32 %v5505_v44, %v2981_v33 }
0x142e   : > { %v2983_v43 = vmul.f32 %v2982_v49, %v2982_v49 }
0x1430   : > { %v2984_v50 = vsel %vm1605_vm3, %v2983_v43, 0.0 }
0x1431   : > { %2985 = vadd.xlane.f32.xlu1 %v2984_v50  ;;  %v3277_v18 = vpop.permute.xlu2 %3276 }
0x1432   : > { %4333 = vmatpush.xpose.msk.msrb.mxu3 %vm1819_vm15, %v3277_v18 }
0x1439   : > { %v3221_v20 = vpop.permute.xlu2 %3220 }
0x143a   : > { %4329 = vmatpush.xpose.msk.msrb.mxu1 %vm1819_vm15, %v3221_v20 }
0x14a4   : > { %v2986_v57 = vpop.xlane.xlu1 %2985 }
0x14a5   : > { %v2987_v58 = vmul.f32 %v2986_v57, %v5159_v41 }
0x14a7   : > { %v2988_v59 = vadd.f32 6.1e-05, %v2987_v58 }
0x14a9   : > { %4578 = vrsqrt.f32 %v2988_v59  ;;  %vm2995_vm11 = vweird.f32 %v2988_v59 }
0x14af   : > { %v4579_v60 = vpop.eup %4578 }
0x14b0   : > { %v2990_v61 = vmul.f32 %v4579_v60, %v2988_v59  ;;  %vm2996_vm10 = vweird.f32 %v4579_v60 }
0x14b1   : > { %vm2997_vm12 = vmor %vm2995_vm11, %vm2996_vm10 }
0x14b2   : > { %v2991_v62 = vmul.f32 %v4579_v60, %v2990_v61 }
0x14b4   : > { %v2992_v63 = vmul.f32 0.5, %v2991_v62 }
0x14b6   : > { %v2993_v0 = vsub.f32 1.5, %v2992_v63 }
0x14b8   : > { %v2994_v1 = vmul.f32 %v4579_v60, %v2993_v0 }
0x14ba   : > { %v2998_v3 = vsel %vm2997_vm12, %v4579_v60, %v2994_v1 }
0x14bb   : > { %v2999_v4 = vmul.f32 %v2998_v3, %v2982_v49 }
0x14bd   : > { %v3003_v6 = vmul.f32 %v4509_v2, %v2999_v4 }
0x14bf   : > { %v3007_v7 = vadd.f32 %v4510_v5, %v3003_v6 }
0x14c1   : > { %4311 = vmatmul.msk.f32.vlgmr.msrb.gmra.mxu0 %vm1273_vm0, %v3007_v7 }
0x153e   : > { %v3038_v30 = vpop.f32.mrf.mxu0 }
0x153f   : > { %v5532_v12 = vadd.f32 %v4511_v9, %v3038_v30 }
0x1541   : > { %3081 = vrot.lane.b32.xlu0 %v5532_v12, %s5905_s28  ;;  %v3078_v13 = vadd.f32 %v4512_v11, %v5532_v12  ;;  %v3071_v16 = vadd.f32 %v4513_v15, %v5532_v12 }
0x1543   : > { %v3079_v14 = vmul.f32 0.17677669, %v3078_v13  ;;  %v3072_v17 = vmul.f32 0.17677669, %v3071_v16 }
0x1545   : > { %3218 = vrot.lane.b32.xlu2 %v3079_v14, %s5917_s8  ;;  %3274 = vrot.lane.b32.xlu1 %v3079_v14, %s5915_s3 }
0x1546   : > { %4322 = vmatmul.msk.f32.vlgmr.msrb.gmra.mxu2 %vm1819_vm15, %v3079_v14 }
0x1549   : > { %3248 = vrot.lane.b32.xlu0 %v5532_v12, %s5918_s6  ;;  %s5924_s6 = smov 4  }
0x154d   : > { %3162 = vrot.lane.b32.xlu1 %v3079_v14, %s5916_s4  ;;  %3134 = vrot.lane.b32.xlu2 %v3072_v17, %s5916_s4  ;;  %s5925_s4 = smov 5  }
0x1551   : > { %3190 = vrot.lane.b32.xlu0 %v3072_v17, %s5917_s8  ;;  %s5922_s8 = smov 2  }
0x1555   : > { %3136 = vrot.lane.b32.xlu1 %v5532_v12, %s5919_s11  ;;  %3192 = vrot.lane.b32.xlu2 %v5532_v12, %s5920_s14  ;;  %s5923_s14 = smov 1   ;;  %s5926_s11 = smov 6  }
0x155d   : > { %3246 = vrot.lane.b32.xlu1 %v3072_v17, %s5915_s3  ;;  %s5921_s3 = smov 3  }
0x159f   : > { %v3219_v22 = vpop.permute.xlu2 %3218 }
0x15a0   : > { %4330 = vmatmul.msk.f32.vlgmr.msrb.gmra.mxu1 %vm1819_vm15, %v3219_v22 }
0x15a7   : > { %v3135_v26 = vpop.permute.xlu2 %3134 }
0x15af   : > { %v3193_v28 = vpop.permute.xlu2 %3192 }
0x15b3   : > { %v3082_v23 = vpop.permute.xlu0 %3081 }
0x15b4   : > { %4319 = vmatpush.xpose.msk.msra.mxu0 %vm1819_vm15, %v3082_v23 }
0x15b7   : > { %v3275_v24 = vpop.permute.xlu1 %3274  ;;  %4320 = vmatmul.msk.f32.vlgmr.msra.gmra.mxu0 %vm1819_vm15, %v3072_v17 }
0x15b8   : > { %4334 = vmatmul.msk.f32.vlgmr.msrb.gmra.mxu3 %vm1819_vm15, %v3275_v24 }
0x15bb   : > { %v3249_v25 = vpop.permute.xlu0 %3248 }
0x15bc   : > { %4331 = vmatpush.xpose.msk.msrb.mxu2 %vm1819_vm15, %v3249_v25 }
0x15bf   : > { %v3163_v27 = vpop.permute.xlu1 %3162 }
0x15c0   : > { %4326 = vmatmul.msk.f32.vlgmr.msra.gmra.mxu2 %vm1819_vm15, %v3163_v27 }
0x15c3   : > { %v3191_v19 = vpop.permute.xlu0 %3190 }
0x15c7   : > { %v3137_v29 = vpop.permute.xlu1 %3136 }
0x15c8   : > { %4323 = vmatpush.xpose.msk.msrb.mxu0 %vm1819_vm15, %v3137_v29 }
0x15c9   : > { %v3131_v36 = vpop.f32.mrf.mxu2 }
0x15ca   : > { %v3306_v39 = vrot.slane %v3131_v36, 1  ;;  %v3334_v55 = vsel %vm2072_vm2, %v3131_v36, 0.0 }
0x15cb   : > { %4324 = vmatmul.msk.f32.vlgmr.msrb.gmra.mxu0 %vm1819_vm15, %v3135_v26 }
0x15cc   : > { %4327 = vmatpush.xpose.msk.msra.mxu0 %vm1819_vm15, %v3193_v28  ;;  %v3314_v47 = vsel %vm2051_vm1, %v3306_v39, 0.0 }
0x15cf   : > { %v3247_v10 = vpop.permute.xlu1 %3246 }
0x15d0   : > { %4332 = vmatmul.msk.f32.vlgmr.msrb.gmra.mxu2 %vm1819_vm15, %v3247_v10 }
0x15d3   : > { %4328 = vmatmul.msk.f32.vlgmr.msra.gmra.mxu0 %vm1819_vm15, %v3191_v19 }
0x161d   : > { %v3243_v32 = vpop.f32.mrf.mxu1 }
0x161e   : > { %v3308_v34 = vrot.slane %v3243_v32, 1  ;;  %v3336_v48 = vsel %vm2072_vm2, %v3243_v32, 0.0 }
0x1620   : > { %v3316_v35 = vsel %vm2051_vm1, %v3308_v34, 0.0 }
0x1621   : > { %3326 = vrot.lane.b32.xlu1 %v3316_v35, %s5896_s2 }
0x1634   : > { %v3105_v19 = vpop.f32.mrf.mxu0 }
0x163b   : > { %v3299_v37 = vpop.f32.mrf.mxu3 }
0x163c   : > { %v3309_v38 = vrot.slane %v3299_v37, 1  ;;  %v3337_v50 = vsel %vm2072_vm2, %v3299_v37, 0.0 }
0x163e   : > { %v3317_v40 = vsel %vm2051_vm1, %v3309_v38, 0.0 }
0x163f   : > { %3328 = vrot.lane.b32.xlu2 %v3317_v40, %s5896_s2  ;;  %v4615_v40 = vld [vmem:[%s5338_s26] sm:$0x7f]  ;;  %s5928_s26 = smov 48  }
0x1643   : > { %v3187_v42 = vpop.f32.mrf.mxu2 }
0x1644   : > { %v3307_v45 = vrot.slane %v3187_v42, 1  ;;  %v3335_v51 = vsel %vm2072_vm2, %v3187_v42, 0.0 }
0x1646   : > { %v3315_v46 = vsel %vm2051_vm1, %v3307_v45, 0.0 }
0x1647   : > { %3324 = vrot.lane.b32.xlu0 %v3315_v46, %s5896_s2  ;;  %3322 = vrot.lane.b32.xlu2 %v3314_v47, %s5896_s2 }
0x1648   : > { %v3159_v32 = vpop.f32.mrf.mxu0 }
0x1650   : > { %v3215_v36 = vpop.f32.mrf.mxu0 }
0x1653   : > { %v3271_v47 = vpop.f32.mrf.mxu2 }
0x1693   : > { %v3327_v33 = vpop.permute.xlu1 %3326 }
0x1694   : > { %v3340_v49 = vsel %vm1819_vm15, %v3336_v48, %v3327_v33 }
0x1695   : > { %3374 = vrot.lane.b32.xlu2 %v3340_v49, %s5921_s3  ;;  %3362 = vrot.lane.b32.xlu0 %v3340_v49, %s5922_s8 }
0x1696   : > { %3350 = vrot.lane.b32.xlu1 %v3340_v49, %s5923_s14 }
0x1699   : > { %v3329_v43 = vpop.permute.xlu2 %3328 }
0x169a   : > { %v3341_v31 = vsel %vm1819_vm15, %v3337_v50, %v3329_v43 }
0x169d   : > { %3376 = vrot.lane.b32.xlu0 %v3341_v31, %s5921_s3  ;;  %3352 = vrot.lane.b32.xlu2 %v3341_v31, %s5923_s14 }
0x169e   : > { %3386 = vrot.lane.b32.xlu1 %v3340_v49, %s5924_s6 }
0x16a1   : > { %v3323_v54 = vpop.permute.xlu2 %3322 }
0x16a2   : > { %v5598_v56 = vsel %vm1819_vm15, %v3334_v55, %v3323_v54 }
0x16a5   : > { %3388 = vrot.lane.b32.xlu0 %v3341_v31, %s5924_s6 }
0x16a6   : > { %3398 = vrot.lane.b32.xlu1 %v3340_v49, %s5925_s4 }
0x16ad   : > { %3400 = vrot.lane.b32.xlu0 %v3341_v31, %s5925_s4 }
0x16ae   : > { %3410 = vrot.lane.b32.xlu1 %v3340_v49, %s5926_s11 }
0x16b5   : > { %3412 = vrot.lane.b32.xlu0 %v3341_v31, %s5926_s11 }
0x16b6   : > { %3364 = vrot.lane.b32.xlu1 %v3341_v31, %s5922_s8 }
0x16b9   : > { %v3325_v52 = vpop.permute.xlu0 %3324 }
0x16ba   : > { %v3339_v53 = vsel %vm1819_vm15, %v3335_v51, %v3325_v52 }
0x16bb   : > { %3348 = vrot.lane.b32.xlu2 %v3339_v53, %s5923_s14 }
0x16bd   : > { %3396 = vrot.lane.b32.xlu0 %v3339_v53, %s5925_s4 }
0x16be   : > { %3372 = vrot.lane.b32.xlu1 %v3339_v53, %s5921_s3 }
0x16c3   : > { %3360 = vrot.lane.b32.xlu2 %v3339_v53, %s5922_s8 }
0x16c5   : > { %3358 = vrot.lane.b32.xlu0 %v5598_v56, %s5922_s8  ;;  %s5929_s8 = smov 40  }
0x16c6   : > { %3408 = vrot.lane.b32.xlu1 %v3339_v53, %s5926_s11 }
0x16cb   : > { %3384 = vrot.lane.b32.xlu2 %v3339_v53, %s5924_s6 }
0x16ce   : > { %3382 = vrot.lane.b32.xlu1 %v5598_v56, %s5924_s6  ;;  %s5936_s6 = smov 24  }
0x16d3   : > { %3346 = vrot.lane.b32.xlu2 %v5598_v56, %s5923_s14  ;;  %s5930_s14 = smov 56  }
0x16db   : > { %3370 = vrot.lane.b32.xlu2 %v5598_v56, %s5921_s3  ;;  %s5927_s3 = smov 122  }
0x16e3   : > { %3394 = vrot.lane.b32.xlu2 %v5598_v56, %s5925_s4  ;;  %s5939_s4 = sld [smem:[#allocation24_spill]] }
0x16ef   : > { %v3375_v59 = vpop.permute.xlu2 %3374 }
0x16f7   : > { %v3353_v62 = vpop.permute.xlu2 %3352 }
0x16f8   : > { %v3421_v11 = vsel %vm2157_vm4, %v3341_v31, %v3353_v62 }
0x1707   : > { %v3363_v57 = vpop.permute.xlu0 %3362 }
0x1708   : > { %v3351_v58 = vpop.permute.xlu1 %3350 }
0x1709   : > { %v3420_v63 = vsel %vm2157_vm4, %v3340_v49, %v3351_v58 }
0x170a   : > { %v3424_v2 = vsel %vm2162_vm5, %v3420_v63, %v3363_v57 }
0x170b   : > { %v3428_v3 = vsel %vm2167_vm6, %v3424_v2, %v3375_v59 }
0x170f   : > { %v3377_v60 = vpop.permute.xlu0 %3376 }
0x1710   : > { %v3387_v61 = vpop.permute.xlu1 %3386 }
0x1711   : > { %v3432_v4 = vsel %vm5842_vm7, %v3428_v3, %v3387_v61 }
0x1715   : > { %v3349_v5 = vpop.permute.xlu2 %3348 }
0x1716   : > { %v3419_v21 = vsel %vm2157_vm4, %v3339_v53, %v3349_v5 }
0x1717   : > { %v3389_v1 = vpop.permute.xlu0 %3388 }
0x1718   : > { %v3399_v0 = vpop.permute.xlu1 %3398 }
0x1719   : > { %v3436_v6 = vsel %vm2177_vm8, %v3432_v4, %v3399_v0 }
0x171d   : > { %v3361_v14 = vpop.permute.xlu2 %3360 }
0x171e   : > { %v3423_v23 = vsel %vm2162_vm5, %v3419_v21, %v3361_v14 }
0x171f   : > { %v3401_v9 = vpop.permute.xlu0 %3400 }
0x1720   : > { %v3411_v7 = vpop.permute.xlu1 %3410 }
0x1721   : > { %v3440_v8 = vsel %vm2051_vm1, %v3436_v6, %v3411_v7 }
0x1722   : > { %3450 = vrot.lane.b32.xlu1 %v3440_v8, %s5927_s3 }
0x1725   : > { %v3385_v25 = vpop.permute.xlu2 %3384 }
0x1727   : > { %v3413_v17 = vpop.permute.xlu0 %3412 }
0x1728   : > { %v3365_v30 = vpop.permute.xlu1 %3364 }
0x1729   : > { %v3425_v13 = vsel %vm2162_vm5, %v3421_v11, %v3365_v30 }
0x172a   : > { %v3429_v15 = vsel %vm2167_vm6, %v3425_v13, %v3377_v60 }
0x172b   : > { %v3433_v16 = vsel %vm5842_vm7, %v3429_v15, %v3389_v1 }
0x172c   : > { %v3437_v18 = vsel %vm2177_vm8, %v3433_v16, %v3401_v9 }
0x172d   : > { %v3441_v20 = vsel %vm2051_vm1, %v3437_v18, %v3413_v17  ;;  %v3347_v35 = vpop.permute.xlu2 %3346 }
0x172e   : > { %3452 = vrot.lane.b32.xlu0 %v3441_v20, %s5927_s3  ;;  %v3418_v48 = vsel %vm2157_vm4, %v5598_v56, %v3347_v35 }
0x172f   : > { %v3397_v27 = vpop.permute.xlu0 %3396 }
0x1730   : > { %v3373_v22 = vpop.permute.xlu1 %3372 }
0x1731   : > { %v3427_v24 = vsel %vm2167_vm6, %v3423_v23, %v3373_v22 }
0x1732   : > { %v3431_v26 = vsel %vm5842_vm7, %v3427_v24, %v3385_v25 }
0x1733   : > { %v3435_v28 = vsel %vm2177_vm8, %v3431_v26, %v3397_v27 }
0x1735   : > { %v3371_v46 = vpop.permute.xlu2 %3370 }
0x1736   : > { %3406 = vrot.lane.b32.xlu0 %v5598_v56, %s5926_s11  ;;  %s5940_s11 = sld [smem:[#allocation25_spill]] }
0x1737   : > { %v3359_v42 = vpop.permute.xlu0 %3358 }
0x1738   : > { %v3409_v29 = vpop.permute.xlu1 %3408  ;;  %v3422_v49 = vsel %vm2162_vm5, %v3418_v48, %v3359_v42 }
0x1739   : > { %v3439_v10 = vsel %vm2051_vm1, %v3435_v28, %v3409_v29  ;;  %v3426_v31 = vsel %vm2167_vm6, %v3422_v49, %v3371_v46 }
0x173a   : > { %3448 = vrot.lane.b32.xlu1 %v3439_v10, %s5927_s3 }
0x173d   : > { %v3395_v53 = vpop.permute.xlu2 %3394 }
0x1740   : > { %v3383_v34 = vpop.permute.xlu1 %3382 }
0x1741   : > { %v3430_v51 = vsel %vm5842_vm7, %v3426_v31, %v3383_v34 }
0x1742   : > { %v3434_v55 = vsel %vm2177_vm8, %v3430_v51, %v3395_v53 }
0x1794   : > { %v3451_v37 = vpop.permute.xlu1 %3450 }
0x1795   : > { %v3460_v38 = vadd.f32 %v3451_v37, %v3215_v36 }
0x1797   : > { %v3464_v39 = vadd.f32 %v4615_v40, %v3460_v38 }
0x1799   : > { %v3472_v45 = vsel %vm2210_vm9, %v3464_v39, -inf }
0x179a   : > { %3473 = vmax.xlane.f32.xlu0 %v3472_v45 }
0x17a0   : > { %v3453_v33 = vpop.permute.xlu0 %3452 }
0x17a1   : > { %v3461_v43 = vadd.f32 %v3453_v33, %v3271_v47 }
0x17a3   : > { %v3465_v50 = vadd.f32 %v4615_v40, %v3461_v43 }
0x17a5   : > { %v3475_v52 = vsel %vm2210_vm9, %v3465_v50, -inf }
0x17a6   : > { %3476 = vmax.xlane.f32.xlu1 %v3475_v52 }
0x17a8   : > { %v3407_v54 = vpop.permute.xlu0 %3406 }
0x17a9   : > { %v3438_v57 = vsel %vm2051_vm1, %v3434_v55, %v3407_v54 }
0x17aa   : > { %3446 = vrot.lane.b32.xlu2 %v3438_v57, %s5927_s3  ;;  %s5942_s3 = sld [smem:[#allocation27_spill]] }
0x17ac   : > { %v3449_v56 = vpop.permute.xlu1 %3448 }
0x17ad   : > { %v3459_v58 = vadd.f32 %v3449_v56, %v3159_v32 }
0x17af   : > { %v3463_v59 = vadd.f32 %v4615_v40, %v3459_v58 }
0x17b1   : > { %v3469_v60 = vsel %vm2210_vm9, %v3463_v59, -inf }
0x17d3   : > { %3470 = vmax.xlane.f32.xlu2 %v3469_v60 }
0x1804   : > { %v3447_v61 = vpop.permute.xlu2 %3446 }
0x1805   : > { %v3458_v62 = vadd.f32 %v3447_v61, %v3105_v19 }
0x1807   : > { %v3462_v63 = vadd.f32 %v4615_v40, %v3458_v62 }
0x1809   : > { %v3466_v0 = vsel %vm2210_vm9, %v3462_v63, -inf }
0x180a   : > { %3467 = vmax.xlane.f32.xlu0 %v3466_v0 }
0x180d   : > { %v3474_v1 = vpop.xlane.xlu0 %3473 }
0x180e   : > { %v3480_v2 = vsub.f32 %v3464_v39, %v3474_v1 }
0x1810   : > { %v3486_v3 = vmul.f32 1.442695, %v3480_v2 }
0x1812   : > { %4580 = vpow2.f32 %v3486_v3 }
0x1818   : > { %v4581_v4 = vpop.eup %4580 }
0x1819   : > { %v3477_v5 = vpop.xlane.xlu1 %3476  ;;  %v3496_v6 = vsel %vm2210_vm9, %v4581_v4, 0.0 }
0x181a   : > { %v3481_v7 = vsub.f32 %v3465_v50, %v3477_v5  ;;  %3497 = vadd.xlane.f32.xlu1 %v3496_v6 }
0x181c   : > { %v3488_v8 = vmul.f32 1.442695, %v3481_v7 }
0x181e   : > { %4582 = vpow2.f32 %v3488_v8 }
0x1824   : > { %v4583_v9 = vpop.eup %4582 }
0x1825   : > { %v3499_v11 = vsel %vm2210_vm9, %v4583_v9, 0.0 }
0x1826   : > { %3500 = vadd.xlane.f32.xlu2 %v3499_v11 }
0x1833   : > { %3616 = vrot.lane.b32.xlu1 %v5532_v12, %s5928_s26  ;;  %s5944_s26 = sld [smem:[#allocation29_spill]] }
0x183b   : > { %3562 = vrot.lane.b32.xlu1 %v5532_v12, %s5895_s10  ;;  %s5935_s10 = smov 16  }
0x183e   : > { %3643 = vrot.lane.b32.xlu2 %v5532_v12, %s5929_s8  ;;  %s5945_s8 = sld [smem:[#allocation30_spill]] }
0x1846   : > { %v3471_v30 = vpop.xlane.xlu2 %3470 }
0x1847   : > { %v3479_v13 = vsub.f32 %v3463_v59, %v3471_v30 }
0x1849   : > { %v3484_v14 = vmul.f32 1.442695, %v3479_v13 }
0x184b   : > { %4584 = vpow2.f32 %v3484_v14 }
0x1851   : > { %v5656_v15 = vpop.eup %4584 }
0x1852   : > { %v3493_v16 = vsel %vm2210_vm9, %v5656_v15, 0.0 }
0x1853   : > { %3494 = vadd.xlane.f32.xlu0 %v3493_v16  ;;  %v4345_v16 = vld [vmem:[%s5897_s7 + $0x30] sm:$0xff] }
0x1867   : > { %3589 = vrot.lane.b32.xlu0 %v5532_v12, %s5930_s14  ;;  %s5946_s14 = sld [smem:[#allocation37_spill]] }
0x187d   : > { %v3468_v17 = vpop.xlane.xlu0 %3467 }
0x187e   : > { %v3478_v18 = vsub.f32 %v3462_v63, %v3468_v17  ;;  %v4344_v17 = vld [vmem:[%s5897_s7 + $0x28] sm:$0xff] }
0x1880   : > { %v3482_v20 = vmul.f32 1.442695, %v3478_v18  ;;  %v4343_v18 = vld [vmem:[%s5897_s7 + $0x20] sm:$0xff] }
0x1882   : > { %4586 = vpow2.f32 %v3482_v20 }
0x1888   : > { %v5662_v21 = vpop.eup %4586 }
0x1889   : > { %v3490_v22 = vsel %vm2210_vm9, %v5662_v21, 0.0  ;;  %vm5931_vm9 = vcmask 1046528  }
0x188a   : > { %3491 = vadd.xlane.f32.xlu2 %v3490_v22  ;;  %vm5932_vm7 = vmmov %vm5931_vm9 }
0x188d   : > { %v3498_v23 = vpop.xlane.xlu1 %3497 }
0x188e   : > { %4588 = vrcp.f32 %v3498_v23  ;;  %v3543_v12 = vand.u32 2147483648, %v3498_v23  ;;  %vm3537_vm13 = vweird.f32 %v3498_v23  ;;  %v3541_v10 = vand.u32 2147483647, %v3498_v23 }
0x1890   : > { %v3544_v34 = vor.u32 1.1754944e-38, %v3543_v12  ;;  %vm3542_vm11 = vcmp.eq.f32.partialorder %v3541_v10, 8.507059e+37 }
0x1894   : > { %v4589_v24 = vpop.eup %4588 }
0x1895   : > { %v3533_v25 = vmul.f32 %v4589_v24, %v3498_v23  ;;  %vm3538_vm4 = vweird.f32 %v4589_v24 }
0x1896   : > { %vm3539_vm10 = vmor %vm3537_vm13, %vm3538_vm4 }
0x1897   : > { %v3534_v26 = vsub.f32 1.0, %v3533_v25 }
0x1899   : > { %v3535_v27 = vmul.f32 %v4589_v24, %v3534_v26  ;;  %v3501_v29 = vpop.xlane.xlu2 %3500 }
0x189a   : > { %4590 = vrcp.f32 %v3501_v29  ;;  %v3558_v40 = vand.u32 2147483648, %v3501_v29  ;;  %v3556_v42 = vand.u32 2147483647, %v3501_v29  ;;  %vm3552_vm4 = vweird.f32 %v3501_v29 }
0x189b   : > { %v3536_v28 = vadd.f32 %v4589_v24, %v3535_v27  ;;  %v4514_v27 = vld [vmem:[%s5898_s5 + $0x1] ss:$0 sm:$0xff] }
0x189c   : > { %v3559_v48 = vor.u32 1.1754944e-38, %v3558_v40  ;;  %v4352_v40 = vld [vmem:[%s5899_s0 + $0x28] sm:$0xff] }
0x189d   : > { %v3540_v19 = vsel %vm3539_vm10, %v4589_v24, %v3536_v28  ;;  %vm3557_vm10 = vcmp.eq.f32.partialorder %v3556_v42, 8.507059e+37 }
0x189e   : > { %v3545_v37 = vsel %vm3542_vm11, %v3544_v34, %v3540_v19  ;;  %vm5933_vm11 = vmmov %vm5932_vm7 }
0x189f   : > { %v3546_v46 = vmul.f32 %v4581_v4, %v3545_v37  ;;  %v4354_v37 = vld [vmem:[%s5899_s0 + $0x38] sm:$0xff] }
0x18a0   : > { %v4591_v32 = vpop.eup %4590 }
0x18a1   : > { %v3548_v35 = vmul.f32 %v4591_v32, %v3501_v29  ;;  %v3644_v36 = vpop.permute.xlu2 %3643  ;;  %vm3553_vm12 = vweird.f32 %v4591_v32 }
0x18a2   : > { %4341 = vmatpush.msk.msra.mxu3 %vm5931_vm9, %v3644_v36  ;;  %vm3554_vm13 = vmor %vm3552_vm4, %vm3553_vm12 }
0x18a3   : > { %v3549_v38 = vsub.f32 1.0, %v3548_v35 }
0x18a5   : > { %v3550_v39 = vmul.f32 %v4591_v32, %v3549_v38  ;;  %v3617_v45 = vpop.permute.xlu1 %3616  ;;  %v4353_v38 = vld [vmem:[%s5899_s0 + $0x30] sm:$0xff] }
0x18a6   : > { %4339 = vmatpush.msk.msra.mxu2 %vm5932_vm7, %v3617_v45 }
0x18a7   : > { %v3551_v47 = vadd.f32 %v4591_v32, %v3550_v39  ;;  %4340 = vmatmul.msk.f32.vlgmr.msra.gmra.mxu2 %vm2072_vm2, %v3546_v46 }
0x18a9   : > { %v3555_v33 = vsel %vm3554_vm13, %v4591_v32, %v3551_v47  ;;  %vm5934_vm13 = vmmov %vm5933_vm11 }
0x18aa   : > { %v3560_v49 = vsel %vm3557_vm10, %v3559_v48, %v3555_v33 }
0x18ab   : > { %v3561_v43 = vmul.f32 %v4583_v9, %v3560_v49 }
0x18ad   : > { %v3563_v50 = vpop.permute.xlu1 %3562  ;;  %4342 = vmatmul.msk.f32.vlgmr.msra.gmra.mxu3 %vm2072_vm2, %v3561_v43 }
0x18ae   : > { %4335 = vmatpush.msk.msrb.mxu0 %vm5933_vm11, %v3563_v50  ;;  %v4515_v50 = vld [vmem:[%s5900_s23 + $0x1] ss:$0 sm:$0xff] }
0x18c6   : > { %v3495_v31 = vpop.xlane.xlu0 %3494 }
0x18c7   : > { %4592 = vrcp.f32 %v3495_v31  ;;  %v3528_v54 = vand.u32 2147483648, %v3495_v31  ;;  %v3526_v57 = vand.u32 2147483647, %v3495_v31  ;;  %vm3522_vm9 = vweird.f32 %v3495_v31 }
0x18c9   : > { %v3529_v58 = vor.u32 1.1754944e-38, %v3528_v54  ;;  %vm3527_vm4 = vcmp.eq.f32.partialorder %v3526_v57, 8.507059e+37 }
0x18cd   : > { %v4593_v51 = vpop.eup %4592 }
0x18ce   : > { %v3518_v52 = vmul.f32 %v4593_v51, %v3495_v31  ;;  %vm3523_vm7 = vweird.f32 %v4593_v51 }
0x18cf   : > { %vm3524_vm12 = vmor %vm3522_vm9, %vm3523_vm7 }
0x18d0   : > { %v3519_v53 = vsub.f32 1.0, %v3518_v52  ;;  %v4516_v52 = vld [vmem:[%s5901_s17 + $0x1] ss:$0 sm:$0xff] }
0x18d2   : > { %v3520_v55 = vmul.f32 %v4593_v51, %v3519_v53 }
0x18d4   : > { %v3521_v56 = vadd.f32 %v4593_v51, %v3520_v55  ;;  %v4517_v55 = vld [vmem:[%s5902_s21 + $0x1] ss:$0 sm:$0xff] }
0x18d6   : > { %v3525_v59 = vsel %vm3524_vm12, %v4593_v51, %v3521_v56 }
0x18d7   : > { %v3530_v60 = vsel %vm3527_vm4, %v3529_v58, %v3525_v59 }
0x18d8   : > { %v3531_v61 = vmul.f32 %v5656_v15, %v3530_v60  ;;  %v4346_v15 = vld [vmem:[%s5897_s7 + $0x38] sm:$0xff] }
0x18d9   : > { %v3590_v62 = vpop.permute.xlu0 %3589  ;;  %3705 = vmatpush.msra.mxu0 %v4346_v15 }
0x18da   : > { %4337 = vmatpush.msk.msra.mxu1 %vm5934_vm13, %v3590_v62 }
0x18db   : > { %4338 = vmatmul.msk.f32.vlgmr.msra.gmra.mxu1 %vm2072_vm2, %v3531_v61  ;;  %3706 = vmatpush.msra.mxu0 %v4345_v16 }
0x18dc   : > { %3779 = vmatpush.msrb.mxu1 %v4354_v37 }
0x18dd   : > { %3707 = vmatpush.msra.mxu0 %v4344_v17 }
0x18de   : > { %3780 = vmatpush.msrb.mxu1 %v4353_v38 }
0x18df   : > { %3708 = vmatpush.msra.mxu0 %v4343_v18 }
0x18e0   : > { %3781 = vmatpush.msrb.mxu1 %v4352_v40 }
0x18fd   : > { %v3492_v63 = vpop.xlane.xlu2 %3491 }
0x18fe   : > { %4594 = vrcp.f32 %v3492_v63  ;;  %v3513_v3 = vand.u32 2147483648, %v3492_v63  ;;  %v3511_v5 = vand.u32 2147483647, %v3492_v63  ;;  %vm3507_vm11 = vweird.f32 %v3492_v63 }
0x1900   : > { %v3514_v7 = vor.u32 1.1754944e-38, %v3513_v3  ;;  %vm3512_vm9 = vcmp.eq.f32.partialorder %v3511_v5, 8.507059e+37 }
0x1904   : > { %v4595_v0 = vpop.eup %4594 }
0x1905   : > { %v3503_v1 = vmul.f32 %v4595_v0, %v3492_v63  ;;  %vm3508_vm10 = vweird.f32 %v4595_v0 }
0x1906   : > { %vm3509_vm7 = vmor %vm3507_vm11, %vm3508_vm10 }
0x1907   : > { %v3504_v2 = vsub.f32 1.0, %v3503_v1 }
0x1909   : > { %v3505_v4 = vmul.f32 %v4595_v0, %v3504_v2 }
0x190b   : > { %v3506_v6 = vadd.f32 %v4595_v0, %v3505_v4 }
0x190d   : > { %v3510_v8 = vsel %vm3509_vm7, %v4595_v0, %v3506_v6  ;;  %vm5943_vm7 = vcmask 1043456  }
0x190e   : > { %v3515_v9 = vsel %vm3512_vm9, %v3514_v7, %v3510_v8 }
0x190f   : > { %v3516_v11 = vmul.f32 %v5662_v21, %v3515_v9 }
0x1911   : > { %4336 = vmatmul.msk.f32.vlgmr.msrb.gmra.mxu0 %vm2072_vm2, %v3516_v11  ;;  %vm5937_vm2 = vcmask 195584  }
0x192a   : > { %v3640_v30 = vpop.f32.mrf.mxu2 }
0x192b   : > { %3675 = vrot.lane.b32.xlu1 %v3640_v30, %s5935_s10  ;;  %v4358_v30 = vld [vmem:[%s5939_s4 + $0x8] sm:$0x7f]  ;;  %s5947_s10 = sld [smem:[#allocation35_spill]] }
0x192c   : > { %v3824_v15 = vperm.slane %v4358_v30, 0  ;;  %v3827_v16 = vperm.slane %v4358_v30, 1  ;;  %v3833_v17 = vperm.slane %v4358_v30, 2  ;;  %v3843_v18 = vperm.slane %v4358_v30, 3 }
0x1930   : > { %v3667_v14 = vpop.f32.mrf.mxu3 }
0x1958   : > { %v3613_v13 = vpop.f32.mrf.mxu1 }
0x1959   : > { %3671 = vrot.lane.b32.xlu0 %v3613_v13, %s5896_s2  ;;  %s5938_s2 = sld [smem:[#allocation28_spill]] }
0x195f   : > { %v4366_v7 = vld [vmem:[%s5938_s2 + $0x38] sm:$0xff]  ;;  %v4365_v8 = vld [vmem:[%s5938_s2 + $0x30] sm:$0xff]  ;;  %v4364_v9 = vld [vmem:[%s5938_s2 + $0x28] sm:$0xff] }
0x1960   : > { %3935 = vmatpush.msrb.mxu2 %v4366_v7  ;;  %v4363_v11 = vld [vmem:[%s5938_s2 + $0x20] sm:$0xff] }
0x1961   : > { %3679 = vrot.lane.b32.xlu0 %v3667_v14, %s5936_s6  ;;  %s5948_s6 = sshll.u32 %s5946_s14, 3 }
0x1962   : > { %3936 = vmatpush.msrb.mxu2 %v4365_v8  ;;  %s1225_s4 = scalar_lea.vmem %s5947_s10, %s5948_s6 }
0x1964   : > { %3937 = vmatpush.msrb.mxu2 %v4364_v9 }
0x1966   : > { %3938 = vmatpush.msrb.mxu2 %v4363_v11 }
0x198e   : > { %v3586_v21 = vpop.f32.mrf.mxu0 }
0x199d   : > { %v3676_v23 = vpop.permute.xlu1 %3675 }
0x19cb   : > { %v3672_v20 = vpop.permute.xlu0 %3671 }
0x19cc   : > { %v3682_v22 = vsel %vm1819_vm15, %v3586_v21, %v3672_v20  ;;  %v3853_v20 = vperm.slane %v4358_v30, 4 }
0x19cd   : > { %v3683_v25 = vsel %vm2429_vm14, %v3682_v22, %v3676_v23  ;;  %v4518_v22 = vld [vmem:[%s5940_s11 + $0x1] ss:$0 sm:$0xff]  ;;  %v3863_v23 = vperm.slane %v4358_v30, 5 }
0x19d3   : > { %v3680_v24 = vpop.permute.xlu0 %3679 }
0x19d4   : > { %v3684_v26 = vsel %vm5937_vm2, %v3683_v25, %v3680_v24  ;;  %v3873_v24 = vperm.slane %v4358_v30, 6 }
0x19d5   : > { %4347 = vmatmul.msk.f32.vlgmr.msra.gmra.mxu0 %vm1273_vm0, %v3684_v26 }
0x1a52   : > { %v3710_v29 = vpop.f32.mrf.mxu0 }
0x1a53   : > { %v3713_v28 = vadd.f32 %v3710_v29, %v5505_v44  ;;  %v4351_v44 = vld [vmem:[%s5899_s0 + $0x20] sm:$0xff] }
0x1a54   : > { %3782 = vmatpush.msrb.mxu1 %v4351_v44 }
0x1a55   : > { %v5689_v12 = vadd.f32 %v4514_v27, %v3713_v28 }
0x1a57   : > { %v3724_v10 = vsel %vm1605_vm3, %v5689_v12, 0.0 }
0x1a58   : > { %3725 = vadd.xlane.f32.xlu1 %v3724_v10 }
0x1acb   : > { %v3726_v19 = vpop.xlane.xlu1 %3725 }
0x1acc   : > { %v3727_v32 = vmul.f32 %v3726_v19, %v5159_v41 }
0x1ace   : > { %v3728_v34 = vsub.f32 %v5689_v12, %v3727_v32 }
0x1ad0   : > { %v3729_v35 = vmul.f32 %v3728_v34, %v3728_v34 }
0x1ad2   : > { %v3730_v36 = vsel %vm1605_vm3, %v3729_v35, 0.0 }
0x1ad3   : > { %3731 = vadd.xlane.f32.xlu0 %v3730_v36 }
0x1b46   : > { %v3732_v39 = vpop.xlane.xlu0 %3731 }
0x1b47   : > { %v3733_v42 = vmul.f32 %v3732_v39, %v5159_v41 }
0x1b49   : > { %v3734_v45 = vadd.f32 6.1e-05, %v3733_v42 }
0x1b4b   : > { %4596 = vrsqrt.f32 %v3734_v45  ;;  %vm3741_vm14 = vweird.f32 %v3734_v45 }
0x1b51   : > { %v4597_v46 = vpop.eup %4596 }
0x1b52   : > { %v3736_v47 = vmul.f32 %v4597_v46, %v3734_v45  ;;  %vm3742_vm15 = vweird.f32 %v4597_v46 }
0x1b53   : > { %vm3743_vm12 = vmor %vm3741_vm14, %vm3742_vm15 }
0x1b54   : > { %v3737_v48 = vmul.f32 %v4597_v46, %v3736_v47 }
0x1b56   : > { %v3738_v33 = vmul.f32 0.5, %v3737_v48 }
0x1b58   : > { %v3739_v49 = vsub.f32 1.5, %v3738_v33 }
0x1b5a   : > { %v3740_v43 = vmul.f32 %v4597_v46, %v3739_v49 }
0x1b5c   : > { %v3744_v31 = vsel %vm3743_vm12, %v4597_v46, %v3740_v43 }
0x1b5d   : > { %v3745_v51 = vmul.f32 %v3744_v31, %v3728_v34 }
0x1b5f   : > { %v3749_v53 = vmul.f32 %v4515_v50, %v3745_v51 }
0x1b61   : > { %v3753_v54 = vadd.f32 %v4516_v52, %v3749_v53 }
0x1b63   : > { %4356 = vmatmul.msk.f32.vlgmr.msrb.gmra.mxu1 %vm1273_vm0, %v3753_v54 }
0x1be0   : > { %v3784_v57 = vpop.f32.mrf.mxu1 }
0x1be1   : > { %v3785_v56 = vadd.f32 %v4517_v55, %v3784_v57 }
0x1be3   : > { %v4357_v58 = vmul.f32 -1.442695, %v3785_v56 }
0x1be5   : > { %4598 = vpow2.f32 %v4357_v58 }
0x1beb   : > { %v4599_v59 = vpop.eup %4598 }
0x1bec   : > { %v3790_v60 = vadd.f32 1.0, %v4599_v59 }
0x1bee   : > { %4600 = vrcp.f32 %v3790_v60  ;;  %v3802_v0 = vand.u32 2147483648, %v3790_v60  ;;  %v3800_v2 = vand.u32 2147483647, %v3790_v60  ;;  %vm3796_vm13 = vweird.f32 %v3790_v60 }
0x1bf0   : > { %v3803_v4 = vor.u32 1.1754944e-38, %v3802_v0  ;;  %vm3801_vm11 = vcmp.eq.f32.partialorder %v3800_v2, 8.507059e+37 }
0x1bf4   : > { %v4601_v61 = vpop.eup %4600 }
0x1bf5   : > { %v3792_v62 = vmul.f32 %v4601_v61, %v3790_v60  ;;  %vm3797_vm4 = vweird.f32 %v4601_v61 }
0x1bf6   : > { %vm3798_vm10 = vmor %vm3796_vm13, %vm3797_vm4 }
0x1bf7   : > { %v3793_v63 = vsub.f32 1.0, %v3792_v62 }
0x1bf9   : > { %v3794_v1 = vmul.f32 %v4601_v61, %v3793_v63  ;;  %v4520_v63 = vld [vmem:[%s5942_s3 + $0x1] ss:$0 sm:$0xff] }
0x1bfb   : > { %v3795_v3 = vadd.f32 %v4601_v61, %v3794_v1 }
0x1bfd   : > { %v3799_v5 = vsel %vm3798_vm10, %v4601_v61, %v3795_v3 }
0x1bfe   : > { %v3804_v6 = vsel %vm3801_vm11, %v3803_v4, %v3799_v5 }
0x1bff   : > { %3807 = vrot.lane.b32.xlu2 %v3804_v6, %s5905_s28  ;;  %s5941_s28 = sld [smem:[#allocation26_spill]] }
0x1c05   : > { %v4519_v60 = vld [vmem:[%s5941_s28 + $0x1] ss:$0 sm:$0xff] }
0x1c59   : > { %v3808_v13 = vpop.permute.xlu2 %3807 }
0x1c5a   : > { %v3810_v14 = vmul.f32 %v3808_v13, %v3785_v56 }
0x1c5c   : > { %v3812_v21 = vrot.slane %v3810_v14, 5 }
0x1c5e   : > { %v3814_v25 = vsel %vm2167_vm6, 0.0, %v3812_v21  ;;  %v3815_v26 = vsel %vm2162_vm5, %v3812_v21, 0.0 }
0x1c5f   : > { %v3825_v27 = vmul.f32 %v3824_v15, %v3814_v25  ;;  %v3828_v29 = vmul.f32 %v3827_v16, %v3814_v25  ;;  %v3834_v28 = vmul.f32 %v3833_v17, %v3814_v25  ;;  %v3835_v10 = vmul.f32 %v3833_v17, %v3815_v26  ;;  %v4521_v17 = vld [vmem:[%s5944_s26 + $0x1] ss:$0 sm:$0xff] }
0x1c60   : > { %v3844_v19 = vmul.f32 %v3843_v18, %v3814_v25  ;;  %v3845_v32 = vmul.f32 %v3843_v18, %v3815_v26  ;;  %v3854_v34 = vmul.f32 %v3853_v20, %v3814_v25  ;;  %v3855_v35 = vmul.f32 %v3853_v20, %v3815_v26 }
0x1c61   : > { %v3826_v36 = vadd.f32 %v4518_v22, %v3825_v27  ;;  %v3830_v37 = vrot.slane %v3828_v29, 1  ;;  %v3838_v38 = vrot.slane %v3834_v28, 2  ;;  %v3839_v40 = vrot.slane %v3835_v10, 2  ;;  %v4374_v29 = vld [vmem:[%s5910_s27 + $0x38] sm:$0xff]  ;;  %v4373_v28 = vld [vmem:[%s5910_s27 + $0x30] sm:$0xff]  ;;  %v4372_v10 = vld [vmem:[%s5910_s27 + $0x28] sm:$0xff] }
0x1c62   : > { %v3848_v44 = vrot.slane %v3844_v19, 3  ;;  %v3849_v39 = vrot.slane %v3845_v32, 3  ;;  %v3864_v46 = vmul.f32 %v3863_v23, %v3814_v25  ;;  %v3865_v47 = vmul.f32 %v3863_v23, %v3815_v26  ;;  %4028 = vmatpush.msrb.mxu3 %v4374_v29 }
0x1c63   : > { %v3832_v42 = vadd.f32 %v3830_v37, %v3826_v36  ;;  %v3840_v45 = vsel %vm2051_vm1, %v3838_v38, %v3839_v40  ;;  %v3858_v48 = vrot.slane %v3854_v34, 4  ;;  %v3859_v33 = vrot.slane %v3855_v35, 4 }
0x1c64   : > { %v3874_v49 = vmul.f32 %v3873_v24, %v3814_v25  ;;  %v3875_v43 = vmul.f32 %v3873_v24, %v3815_v26  ;;  %v3850_v31 = vsel %vm2177_vm8, %v3848_v44, %v3849_v39  ;;  %v3868_v51 = vrot.slane %v3864_v46, 5  ;;  %4029 = vmatpush.msrb.mxu3 %v4373_v28  ;;  %v4522_v39 = vld [vmem:[%s5945_s8 + $0x1] ss:$0 sm:$0xff] }
0x1c65   : > { %v3842_v50 = vadd.f32 %v3840_v45, %v3832_v42  ;;  %v3869_v52 = vrot.slane %v3865_v47, 5  ;;  %v3860_v54 = vsel %vm5943_vm7, %v3858_v48, %v3859_v33  ;;  %v4523_v46 = vld [vmem:[%s5912_s1 + $0x1] ss:$0 sm:$0xff]  ;;  %v4391_v33 = vld [vmem:[%s5913_s25 + $0xf8] sm:$0xff] }
0x1c66   : > { %v3878_v55 = vrot.slane %v3874_v49, 6  ;;  %v3879_v57 = vrot.slane %v3875_v43, 6  ;;  %4030 = vmatpush.msrb.mxu3 %v4372_v10  ;;  %4059 = vmatpush.msrb.mxu0 %v4391_v33  ;;  %v4390_v49 = vld [vmem:[%s5913_s25 + $0xf0] sm:$0xff]  ;;  %v4389_v43 = vld [vmem:[%s5913_s25 + $0xe8] sm:$0xff] }
0x1c67   : > { %v3852_v53 = vadd.f32 %v3850_v31, %v3842_v50  ;;  %v3870_v58 = vsel %vm2167_vm6, %v3868_v51, %v3869_v52  ;;  %v4388_v50 = vld [vmem:[%s5913_s25 + $0xe0] sm:$0xff]  ;;  %v4387_v31 = vld [vmem:[%s5913_s25 + $0xd8] sm:$0xff]  ;;  %v4386_v51 = vld [vmem:[%s5913_s25 + $0xd0] sm:$0xff] }
0x1c68   : > { %v3880_v61 = vsel %vm2162_vm5, %v3878_v55, %v3879_v57  ;;  %4060 = vmatpush.msrb.mxu0 %v4390_v49  ;;  %v4385_v52 = vld [vmem:[%s5913_s25 + $0xc8] sm:$0xff]  ;;  %v4382_v55 = vld [vmem:[%s5913_s25 + $0xb0] sm:$0xff] }
0x1c69   : > { %v3862_v56 = vadd.f32 %v3860_v54, %v3852_v53  ;;  %v4384_v53 = vld [vmem:[%s5913_s25 + $0xc0] sm:$0xff]  ;;  %v4383_v54 = vld [vmem:[%s5913_s25 + $0xb8] sm:$0xff]  ;;  %v4381_v57 = vld [vmem:[%s5913_s25 + $0xa8] sm:$0xff] }
0x1c6a   : > { %4061 = vmatpush.msrb.mxu0 %v4389_v43 }
0x1c6b   : > { %v3872_v59 = vadd.f32 %v3870_v58, %v3862_v56  ;;  %v4380_v56 = vld [vmem:[%s5913_s25 + $0xa0] sm:$0xff] }
0x1c6c   : > { %4062 = vmatpush.msrb.mxu0 %v4388_v50  ;;  %v4524_v58 = vld [vmem:[%s5914_s29 + $0x1] ss:$0 sm:$0xff] }
0x1c6d   : > { %v3882_v62 = vadd.f32 %v3880_v61, %v3872_v59  ;;  %v4379_v59 = vld [vmem:[%s5913_s25 + $0x98] sm:$0xff] }
0x1c6e   : > { %4063 = vmatpush.msrb.mxu0 %v4387_v31 }
0x1c6f   : > { %v3888_v0 = vmul.f32 %v4519_v60, %v3882_v62  ;;  %v4378_v60 = vld [vmem:[%s5913_s25 + $0x90] sm:$0xff]  ;;  %v4377_v62 = vld [vmem:[%s5913_s25 + $0x88] sm:$0xff] }
0x1c70   : > { %4064 = vmatpush.msrb.mxu0 %v4386_v51 }
0x1c71   : > { %v3894_v1 = vadd.f32 %v4520_v63, %v3888_v0  ;;  %v4376_v0 = vld [vmem:[%s5913_s25 + $0x80] sm:$0xff] }
0x1c72   : > { %4065 = vmatpush.msrb.mxu0 %v4385_v52 }
0x1c73   : > { %v4362_v2 = vmul.f32 -1.442695, %v3894_v1 }
0x1c74   : > { %4066 = vmatpush.msrb.mxu0 %v4384_v53 }
0x1c75   : > { %4602 = vpow2.f32 %v4362_v2 }
0x1c76   : > { %4067 = vmatpush.msrb.mxu0 %v4383_v54 }
0x1c78   : > { %4068 = vmatpush.msrb.mxu0 %v4382_v55 }
0x1c7a   : > { %4069 = vmatpush.msrb.mxu0 %v4381_v57 }
0x1c7b   : > { %v4603_v3 = vpop.eup %4602 }
0x1c7c   : > { %v3898_v4 = vadd.f32 1.0, %v4603_v3  ;;  %4070 = vmatpush.msrb.mxu0 %v4380_v56 }
0x1c7e   : > { %4604 = vrcp.f32 %v3898_v4  ;;  %v3910_v8 = vand.u32 2147483648, %v3898_v4  ;;  %v3908_v11 = vand.u32 2147483647, %v3898_v4  ;;  %vm3904_vm6 = vweird.f32 %v3898_v4  ;;  %4071 = vmatpush.msrb.mxu0 %v4379_v59 }
0x1c80   : > { %v3911_v13 = vor.u32 1.1754944e-38, %v3910_v8  ;;  %vm3909_vm8 = vcmp.eq.f32.partialorder %v3908_v11, 8.507059e+37  ;;  %4072 = vmatpush.msrb.mxu0 %v4378_v60 }
0x1c82   : > { %4073 = vmatpush.msrb.mxu0 %v4377_v62 }
0x1c84   : > { %v4605_v5 = vpop.eup %4604  ;;  %4074 = vmatpush.msrb.mxu0 %v4376_v0 }
0x1c85   : > { %v3900_v6 = vmul.f32 %v4605_v5, %v3898_v4  ;;  %vm3905_vm1 = vweird.f32 %v4605_v5 }
0x1c86   : > { %vm3906_vm5 = vmor %vm3904_vm6, %vm3905_vm1 }
0x1c87   : > { %v3901_v7 = vsub.f32 1.0, %v3900_v6 }
0x1c89   : > { %v3902_v9 = vmul.f32 %v4605_v5, %v3901_v7 }
0x1c8b   : > { %v3903_v30 = vadd.f32 %v4605_v5, %v3902_v9 }
0x1c8d   : > { %v3907_v14 = vsel %vm3906_vm5, %v4605_v5, %v3903_v30 }
0x1c8e   : > { %v3912_v15 = vsel %vm3909_vm8, %v3911_v13, %v3907_v14 }
0x1c8f   : > { %v3914_v16 = vmul.f32 %v3912_v15, %v3894_v1 }
0x1c91   : > { %4367 = vmatmul.msk.f32.vlgmr.msrb.gmra.mxu2 %vm1273_vm0, %v3914_v16  ;;  %v4525_v16 = vld [vmem:[%s4879_s12 + $0x1] ss:$0 sm:$0xff] }
0x1d14   : > { %v3940_v18 = vpop.f32.mrf.mxu2 }
0x1d15   : > { %v3943_v20 = vadd.f32 %v3940_v18, %v5689_v12  ;;  %v4371_v12 = vld [vmem:[%s5910_s27 + $0x20] sm:$0xff] }
0x1d16   : > { %4031 = vmatpush.msrb.mxu3 %v4371_v12 }
0x1d17   : > { %v5724_v21 = vadd.f32 %v4521_v17, %v3943_v20 }
0x1d19   : > { %v3980_v22 = vsel %vm1605_vm3, %v5724_v21, 0.0 }
0x1d1a   : > { %3981 = vadd.xlane.f32.xlu1 %v3980_v22 }
0x1d8d   : > { %v3982_v23 = vpop.xlane.xlu1 %3981 }
0x1d8e   : > { %v3983_v24 = vmul.f32 %v3982_v23, %v5159_v41 }
0x1d90   : > { %v3984_v25 = vsub.f32 %v5724_v21, %v3983_v24 }
0x1d92   : > { %v3985_v26 = vmul.f32 %v3984_v25, %v3984_v25 }
0x1d94   : > { %v3986_v27 = vsel %vm1605_vm3, %v3985_v26, 0.0 }
0x1d95   : > { %3987 = vadd.xlane.f32.xlu0 %v3986_v27 }
0x1e08   : > { %v3988_v19 = vpop.xlane.xlu0 %3987 }
0x1e09   : > { %v3989_v32 = vmul.f32 %v3988_v19, %v5159_v41 }
0x1e0b   : > { %v3990_v34 = vadd.f32 6.1e-05, %v3989_v32 }
0x1e0d   : > { %4606 = vrsqrt.f32 %v3990_v34  ;;  %vm3997_vm2 = vweird.f32 %v3990_v34 }
0x1e13   : > { %v4607_v35 = vpop.eup %4606 }
0x1e14   : > { %v3992_v36 = vmul.f32 %v4607_v35, %v3990_v34  ;;  %vm3998_vm9 = vweird.f32 %v4607_v35 }
0x1e15   : > { %vm3999_vm15 = vmor %vm3997_vm2, %vm3998_vm9 }
0x1e16   : > { %v3993_v37 = vmul.f32 %v4607_v35, %v3992_v36 }
0x1e18   : > { %v3994_v38 = vmul.f32 0.5, %v3993_v37  ;;  %v4526_v37 = vld [vmem:[%s4884_s13 + $0x1] ss:$0 sm:$0xff] }
0x1e1a   : > { %v3995_v40 = vsub.f32 1.5, %v3994_v38 }
0x1e1c   : > { %v3996_v44 = vmul.f32 %v4607_v35, %v3995_v40  ;;  %v4527_v40 = vld [vmem:[%s4889_s9 + $0x1] ss:$0 sm:$0xff] }
0x1e1e   : > { %v4000_v42 = vsel %vm3999_vm15, %v4607_v35, %v3996_v44 }
0x1e1f   : > { %v4001_v45 = vmul.f32 %v4000_v42, %v3984_v25 }
0x1e21   : > { %v4005_v47 = vmul.f32 %v4522_v39, %v4001_v45 }
0x1e23   : > { %v4009_v48 = vadd.f32 %v4523_v46, %v4005_v47 }
0x1e25   : > { %4393 = vmatmul.msk.f32.vlgmr.msrb.gmra.mxu3 %vm1273_vm0, %v4009_v48 }
0x1ea8   : > { %v4033_v61 = vpop.f32.mrf.mxu3 }
0x1ea9   : > { %v4034_v63 = vadd.f32 %v4524_v58, %v4033_v61 }
0x1eab   : > { %v4394_v1 = vmul.f32 -1.442695, %v4034_v63 }
0x1ead   : > { %4608 = vpow2.f32 %v4394_v1 }
0x1eb3   : > { %v4609_v2 = vpop.eup %4608 }
0x1eb4   : > { %v4039_v3 = vadd.f32 1.0, %v4609_v2 }
0x1eb6   : > { %4610 = vrcp.f32 %v4039_v3  ;;  %v4051_v7 = vand.u32 2147483648, %v4039_v3  ;;  %v4049_v9 = vand.u32 2147483647, %v4039_v3  ;;  %vm4045_vm14 = vweird.f32 %v4039_v3 }
0x1eb8   : > { %v4052_v30 = vor.u32 1.1754944e-38, %v4051_v7  ;;  %vm4050_vm4 = vcmp.eq.f32.partialorder %v4049_v9, 8.507059e+37 }
0x1ebc   : > { %v4611_v4 = vpop.eup %4610 }
0x1ebd   : > { %v4041_v5 = vmul.f32 %v4611_v4, %v4039_v3  ;;  %vm4046_vm0 = vweird.f32 %v4611_v4 }
0x1ebe   : > { %vm4047_vm12 = vmor %vm4045_vm14, %vm4046_vm0 }
0x1ebf   : > { %v4042_v6 = vsub.f32 1.0, %v4041_v5 }
0x1ec1   : > { %v4043_v8 = vmul.f32 %v4611_v4, %v4042_v6 }
0x1ec3   : > { %v4044_v11 = vadd.f32 %v4611_v4, %v4043_v8 }
0x1ec5   : > { %v4048_v13 = vsel %vm4047_vm12, %v4611_v4, %v4044_v11 }
0x1ec6   : > { %v4053_v14 = vsel %vm4050_vm4, %v4052_v30, %v4048_v13 }
0x1ec7   : > { %v4055_v15 = vmul.f32 %v4053_v14, %v4034_v63 }
0x1ec9   : > { %4075 = vmatmul.f32.vlgmr.msrb.gmra.mxu0 %v4055_v15 }
0x1f46   : > { %v4076_v17 = vpop.f32.mrf.mxu0 }
0x1f47   : > { %v4077_v18 = vadd.f32 %v4525_v16, %v4076_v17 }
0x1f49   : > { %v4079_v20 = vmul.f32 0.5, %v4077_v18 }
0x1f4b   : > { %v4080_v22 = vadd.f32 %v4079_v20, %v5724_v21 }
0x1f4d   : > { %v4085_v23 = vsel %vm1605_vm3, %v4080_v22, 0.0 }
0x1f4e   : > { %4086 = vadd.xlane.f32.xlu2 %v4085_v23 }
0x1fc1   : > { %v4087_v24 = vpop.xlane.xlu2 %4086 }
0x1fc2   : > { %v4088_v25 = vmul.f32 %v4087_v24, %v5159_v41 }
0x1fc4   : > { %v4089_v26 = vsub.f32 %v4080_v22, %v4088_v25 }
0x1fc6   : > { %v4090_v27 = vmul.f32 %v4089_v26, %v4089_v26 }
0x1fc8   : > { %v4091_v29 = vsel %vm1605_vm3, %v4090_v27, 0.0 }
0x1fc9   : > { %4092 = vadd.xlane.f32.xlu1 %v4091_v29 }
0x203c   : > { %v4093_v28 = vpop.xlane.xlu1 %4092 }
0x203d   : > { %v4094_v10 = vmul.f32 %v4093_v28, %v5159_v41 }
0x203f   : > { %v4095_v12 = vadd.f32 6.1e-05, %v4094_v10 }
0x2041   : > { %4612 = vrsqrt.f32 %v4095_v12  ;;  %vm4102_vm10 = vweird.f32 %v4095_v12 }
0x2047   : > { %v4613_v21 = vpop.eup %4612 }
0x2048   : > { %v4097_v19 = vmul.f32 %v4613_v21, %v4095_v12  ;;  %vm4103_vm13 = vweird.f32 %v4613_v21 }
0x2049   : > { %vm4104_vm11 = vmor %vm4102_vm10, %vm4103_vm13 }
0x204a   : > { %v4098_v32 = vmul.f32 %v4613_v21, %v4097_v19 }
0x204c   : > { %v4099_v34 = vmul.f32 0.5, %v4098_v32 }
0x204e   : > { %v4100_v35 = vsub.f32 1.5, %v4099_v34 }
0x2050   : > { %v4101_v36 = vmul.f32 %v4613_v21, %v4100_v35 }
0x2052   : > { %v4105_v38 = vsel %vm4104_vm11, %v4613_v21, %v4101_v36 }
0x2053   : > { %v4106_v44 = vmul.f32 %v4105_v38, %v4089_v26 }
0x2055   : > { %v4110_v39 = vmul.f32 %v4526_v37, %v4106_v44 }
0x2057   : > { %v4114_v41 = vadd.f32 %v4527_v40, %v4110_v39 }
0x2059   : > { %4115 = vst.msk [vmem:[%s1225_s4] sm:$0x7f] %vm1605_vm3, %v4114_v41 }
0x205a PF: > { %s5949_s11 = sld [smem:[#allocation36_spill]] }
0x2060   : > { %s91_s28 = sadd.s32 1, %s5949_s11  }
0x2061   : > { %p88_p4 = scmp.ge.s32.totalorder %s91_s28, 4  }
0x2063   :  { %90 = sbr.rel (!%p88_p4) target bundleno = 85 (0x55), region = 288 }

</bundles_post_ra>
